<compile_context>
chip_gen: v5e
topology: v5e:2x2
jax: 0.10.0
libtpu: 0.0.40
codegen_flags: <defaults>
</compile_context>

<pallas_src>
import jax
import jax.numpy as jnp
import numpy as np
from jax.experimental import pallas as pl
from jax.experimental.pallas import tpu as pltpu

HIDDEN = 64
LAYERS = 8


def rnn_kernel(x_ref, h0_ref, wih0_ref, wih_ref, whh_ref, b_ref, seq_ref, hout_ref):
    """Wavefront-scheduled stacked tanh-RNN.

    x_ref   : (T*Bp, D)    time-major input slab
    h0_ref  : (L, Bp, H)   initial hidden states
    wih0_ref: (D, H)       layer-0 input weights (pre-transposed)
    wih_ref : (L-1, H, H)  layer-l (l>0) input weights (pre-transposed)
    whh_ref : (L, H, H)    recurrent weights (pre-transposed)
    b_ref   : (L, 1, H)    b_ih + b_hh per layer
    seq_ref : (T*Bp, H)    OUTPUT: last layer's hidden sequence
                           (transiently holds layer-0 pre-activations)
    hout_ref: (L, Bp, H)   OUTPUT: final hidden state per layer
    """
    L, BP, H = h0_ref.shape
    TB = seq_ref.shape[0]
    T = TB // BP

    # ---- hoisted layer-0 input projection: ONE slab matmul ----
    seq_ref[...] = (jnp.dot(x_ref[...], wih0_ref[...],
                            preferred_element_type=jnp.float32) + b_ref[0])

    # ---- hidden states carried as values ----
    h = [h0_ref[l] for l in range(L)]          # each (Bp, H), f32

    # ---- wavefront: step s advances layer l at time t = s - l ----
    # All new states read the *old* h list, so the up-to-L matmuls per step are
    # mutually independent and can be kept in flight together by the scheduler.
    for s in range(T + L - 1):
        new_h = list(h)
        for l in range(L):
            t = s - l
            if not (0 <= t < T):
                continue                        # statically inactive at this step
            row = t * BP                        # static, sublane-aligned
            if l == 0:
                pre = seq_ref[pl.ds(row, BP), :]                    # x(t)@Wih0 + b0
            else:
                pre = (jnp.dot(h[l - 1], wih_ref[l - 1],
                               preferred_element_type=jnp.float32) + b_ref[l])
            h_new = jnp.tanh(
                pre + jnp.dot(h[l], whh_ref[l], preferred_element_type=jnp.float32))
            new_h[l] = h_new
            if l == L - 1:
                # Row t was consumed by layer 0 at step s-(L-1); safe to overwrite.
                seq_ref[pl.ds(row, BP), :] = h_new
            if t == T - 1:
                hout_ref[l] = h_new             # layer l finished its sequence
        h = new_h
    # NOTE: padded batch rows [B:Bp] evolve as tanh(b...) and are sliced off in
    # the wrapper; do not read them downstream.


def radar_rnn5_forward(params, x, h_state):
    """x: (B, T, D) f32, h_state: (L, B, H) f32 -> ((B, T, 1), (L, B, H))."""
    B, T, D = x.shape
    L = h_state.shape[0]
    BP = ((B + 7) // 8) * 8                                    # pad batch to sublanes

    x_t = jnp.transpose(x, (1, 0, 2)).astype(jnp.float32)     # (T, B, D)
    x_p = jnp.pad(x_t, ((0, 0), (0, BP - B), (0, 0)))         # (T, Bp, D)
    x_slab = x_p.reshape(T * BP, D)                           # (T*Bp, D)
    h_p = jnp.pad(h_state.astype(jnp.float32), ((0, 0), (0, BP - B), (0, 0)))

    flops = (2 * T * BP * D * HIDDEN                          # layer-0 projection
             + 2 * T * BP * HIDDEN * HIDDEN * (2 * L - 1))    # ih (l>0) + hh dots
    bytes_accessed = 4 * (x_slab.size + 2 * h_p.size + T * BP * HIDDEN
                          + (2 * L - 1) * HIDDEN * HIDDEN + L * HIDDEN)
    cost = pl.CostEstimate(flops=flops,
                           transcendentals=T * BP * HIDDEN * L,
                           bytes_accessed=bytes_accessed)

    seq_slab, h_out = pl.pallas_call(
        rnn_kernel,
        out_shape=(jax.ShapeDtypeStruct((T * BP, HIDDEN), jnp.float32),
                   jax.ShapeDtypeStruct((L, BP, HIDDEN), jnp.float32)),
        in_specs=[pl.BlockSpec(memory_space=pltpu.MemorySpace.VMEM)] * 6,
        out_specs=(pl.BlockSpec(memory_space=pltpu.MemorySpace.VMEM),
                   pl.BlockSpec(memory_space=pltpu.MemorySpace.VMEM)),
        cost_estimate=cost,
    )(x_slab, h_p,
      params["w_ih0"], params["w_ih"], params["w_hh"], params["b"])

    # Output projection (H -> 1) in the wrapper: keeps kernel stores lane-dense
    # and avoids a 1-column MXU pass / masked vst.msk stores inside the kernel.
    out_slab = seq_slab @ params["w_out"] + params["b_out"]   # (T*Bp, 1)
    out = jnp.transpose(out_slab.reshape(T, BP, 1)[:, :B, :], (1, 0, 2))  # (B, T, 1)
    return out, h_out[:, :B, :]


def init_params(key, input_size):
    """Deterministic synthetic params (shapes match nn.RNN(in, 64, 8) + Linear(64,1))."""
    ks = jax.random.split(key, 6)
    scale = 1.0 / np.sqrt(HIDDEN)
    u = lambda k, shape: jax.random.uniform(k, shape, jnp.float32, -scale, scale)
    return dict(
        w_ih0=u(ks[0], (input_size, HIDDEN)),            # W_ih^0, pre-transposed
        w_ih=u(ks[1], (LAYERS - 1, HIDDEN, HIDDEN)),     # W_ih^{1..7}, pre-transposed
        w_hh=u(ks[2], (LAYERS, HIDDEN, HIDDEN)),         # W_hh^{0..7}, pre-transposed
        b=u(ks[3], (LAYERS, 1, HIDDEN)),                 # b_ih + b_hh combined
        w_out=u(ks[4], (HIDDEN, 1)),                     # Linear weight, pre-transposed
        b_out=u(ks[5], (1, 1)),                          # Linear bias
    )


def reference_forward(params, x, h_state):
    """Pure-JAX reference matching PyTorch nn.RNN(tanh) + per-timestep Linear."""
    B, T, D = x.shape
    seq = x
    h_finals = []
    for l in range(LAYERS):
        w_ih = params["w_ih0"] if l == 0 else params["w_ih"][l - 1]
        w_hh = params["w_hh"][l]
        b = params["b"][l]
        h = h_state[l]
        outs = []
        for t in range(T):
            h = jnp.tanh(seq[:, t, :] @ w_ih + h @ w_hh + b)
            outs.append(h)
        seq = jnp.stack(outs, axis=1)
        h_finals.append(h)
    out = seq @ params["w_out"] + params["b_out"][0]
    return out, jnp.stack(h_finals, axis=0)


if __name__ == "__main__":
    B, T, INPUT_SIZE = 2, 8, 16

    key = jax.random.PRNGKey(0)
    kx, kh, kp = jax.random.split(key, 3)
    x = jax.random.normal(kx, (B, T, INPUT_SIZE), jnp.float32)
    h_state = jax.random.normal(kh, (LAYERS, B, HIDDEN), jnp.float32)
    params = init_params(kp, INPUT_SIZE)

    out, h_out = jax.jit(radar_rnn5_forward)(params, x, h_state)
    out = jax.block_until_ready(out)
    h_out = jax.block_until_ready(h_out)

    ref_out, ref_h = reference_forward(params, x, h_state)
    assert out.shape == (B, T, 1) and h_out.shape == (LAYERS, B, HIDDEN)
    np.testing.assert_allclose(np.asarray(out), np.asarray(ref_out), rtol=2e-3, atol=2e-3)
    np.testing.assert_allclose(np.asarray(h_out), np.asarray(ref_h), rtol=2e-3, atol=2e-3)

    print("KERNEL_OK")
</pallas_src>

<mosaic_0001>
module attributes {stable_mosaic.version = 11 : i64} {
  func.func @rnn_kernel(%arg0: memref<64x16xf32, #tpu.memory_space<vmem>>, %arg1: memref<8x8x64xf32, #tpu.memory_space<vmem>>, %arg2: memref<16x64xf32, #tpu.memory_space<vmem>>, %arg3: memref<7x64x64xf32, #tpu.memory_space<vmem>>, %arg4: memref<8x64x64xf32, #tpu.memory_space<vmem>>, %arg5: memref<8x1x64xf32, #tpu.memory_space<vmem>>, %arg6: memref<64x64xf32, #tpu.memory_space<vmem>>, %arg7: memref<8x8x64xf32, #tpu.memory_space<vmem>>) attributes {dimension_semantics = [], scalar_prefetch = 0 : i64, scratch_operands = 0 : i64, tpu.core_type = #tpu.core_type<tc>} {
    %c0 = arith.constant 0 : index
    %c0_0 = arith.constant 0 : index
    %0 = vector.load %arg0[%c0, %c0_0] : memref<64x16xf32, #tpu.memory_space<vmem>>, vector<64x16xf32>
    %c0_1 = arith.constant 0 : index
    %c0_2 = arith.constant 0 : index
    %1 = vector.load %arg2[%c0_1, %c0_2] : memref<16x64xf32, #tpu.memory_space<vmem>>, vector<16x64xf32>
    %cst = arith.constant dense<0.000000e+00> : vector<64x64xf32>
    %2 = tpu.matmul %0, %1, %cst {dimension_numbers = #tpu.dot_dimension_numbers<[1], [0], [0], [1], [0, 0, 1, 1], [], []>} : vector<64x16xf32>, vector<16x64xf32>, vector<64x64xf32> -> vector<64x64xf32>
    %c0_3 = arith.constant 0 : index
    %c0_4 = arith.constant 0 : index
    %c0_5 = arith.constant 0 : index
    %3 = vector.load %arg5[%c0_3, %c0_4, %c0_5] : memref<8x1x64xf32, #tpu.memory_space<vmem>>, vector<1x1x64xf32>
    %4 = vector.shape_cast %3 : vector<1x1x64xf32> to vector<1x64xf32>
    %5 = vector.broadcast %4 : vector<1x64xf32> to vector<64x64xf32>
    %6 = arith.addf %2, %5 : vector<64x64xf32>
    %c0_6 = arith.constant 0 : index
    %c0_7 = arith.constant 0 : index
    %7 = vector.load %arg6[%c0_6, %c0_7] : memref<64x64xf32, #tpu.memory_space<vmem>>, vector<64x64xf32>
    tpu.vector_store %arg6[%c0_6, %c0_7], %6 {strides = array<i32>} : memref<64x64xf32, #tpu.memory_space<vmem>>, vector<64x64xf32>,
    %c0_8 = arith.constant 0 : index
    %c0_9 = arith.constant 0 : index
    %c0_10 = arith.constant 0 : index
    %8 = vector.load %arg1[%c0_8, %c0_9, %c0_10] : memref<8x8x64xf32, #tpu.memory_space<vmem>>, vector<1x8x64xf32>
    %9 = vector.shape_cast %8 : vector<1x8x64xf32> to vector<8x64xf32>
    %c1 = arith.constant 1 : index
    %c0_11 = arith.constant 0 : index
    %c0_12 = arith.constant 0 : index
    %10 = vector.load %arg1[%c1, %c0_11, %c0_12] : memref<8x8x64xf32, #tpu.memory_space<vmem>>, vector<1x8x64xf32>
    %11 = vector.shape_cast %10 : vector<1x8x64xf32> to vector<8x64xf32>
    %c2 = arith.constant 2 : index
    %c0_13 = arith.constant 0 : index
    %c0_14 = arith.constant 0 : index
    %12 = vector.load %arg1[%c2, %c0_13, %c0_14] : memref<8x8x64xf32, #tpu.memory_space<vmem>>, vector<1x8x64xf32>
    %13 = vector.shape_cast %12 : vector<1x8x64xf32> to vector<8x64xf32>
    %c3 = arith.constant 3 : index
    %c0_15 = arith.constant 0 : index
    %c0_16 = arith.constant 0 : index
    %14 = vector.load %arg1[%c3, %c0_15, %c0_16] : memref<8x8x64xf32, #tpu.memory_space<vmem>>, vector<1x8x64xf32>
    %15 = vector.shape_cast %14 : vector<1x8x64xf32> to vector<8x64xf32>
    %c4 = arith.constant 4 : index
    %c0_17 = arith.constant 0 : index
    %c0_18 = arith.constant 0 : index
    %16 = vector.load %arg1[%c4, %c0_17, %c0_18] : memref<8x8x64xf32, #tpu.memory_space<vmem>>, vector<1x8x64xf32>
    %17 = vector.shape_cast %16 : vector<1x8x64xf32> to vector<8x64xf32>
    %c5 = arith.constant 5 : index
    %c0_19 = arith.constant 0 : index
    %c0_20 = arith.constant 0 : index
    %18 = vector.load %arg1[%c5, %c0_19, %c0_20] : memref<8x8x64xf32, #tpu.memory_space<vmem>>, vector<1x8x64xf32>
    %19 = vector.shape_cast %18 : vector<1x8x64xf32> to vector<8x64xf32>
    %c6 = arith.constant 6 : index
    %c0_21 = arith.constant 0 : index
    %c0_22 = arith.constant 0 : index
    %20 = vector.load %arg1[%c6, %c0_21, %c0_22] : memref<8x8x64xf32, #tpu.memory_space<vmem>>, vector<1x8x64xf32>
    %21 = vector.shape_cast %20 : vector<1x8x64xf32> to vector<8x64xf32>
    %c7 = arith.constant 7 : index
    %c0_23 = arith.constant 0 : index
    %c0_24 = arith.constant 0 : index
    %22 = vector.load %arg1[%c7, %c0_23, %c0_24] : memref<8x8x64xf32, #tpu.memory_space<vmem>>, vector<1x8x64xf32>
    %23 = vector.shape_cast %22 : vector<1x8x64xf32> to vector<8x64xf32>
    %c0_25 = arith.constant 0 : index
    %c0_26 = arith.constant 0 : index
    %24 = vector.load %arg6[%c0_25, %c0_26] : memref<64x64xf32, #tpu.memory_space<vmem>>, vector<8x64xf32>
    %c0_27 = arith.constant 0 : index
    %c0_28 = arith.constant 0 : index
    %c0_29 = arith.constant 0 : index
    %25 = vector.load %arg4[%c0_27, %c0_28, %c0_29] : memref<8x64x64xf32, #tpu.memory_space<vmem>>, vector<1x64x64xf32>
    %26 = vector.shape_cast %25 : vector<1x64x64xf32> to vector<64x64xf32>
    %cst_30 = arith.constant dense<0.000000e+00> : vector<8x64xf32>
    %27 = tpu.matmul %9, %26, %cst_30 {dimension_numbers = #tpu.dot_dimension_numbers<[1], [0], [0], [1], [0, 0, 1, 1], [], []>} : vector<8x64xf32>, vector<64x64xf32>, vector<8x64xf32> -> vector<8x64xf32>
    %28 = arith.addf %24, %27 : vector<8x64xf32>
    %29 = math.tanh %28 : vector<8x64xf32>
    %c8 = arith.constant 8 : index
    %c0_31 = arith.constant 0 : index
    %30 = vector.load %arg6[%c8, %c0_31] : memref<64x64xf32, #tpu.memory_space<vmem>>, vector<8x64xf32>
    %c0_32 = arith.constant 0 : index
    %c0_33 = arith.constant 0 : index
    %c0_34 = arith.constant 0 : index
    %31 = vector.load %arg4[%c0_32, %c0_33, %c0_34] : memref<8x64x64xf32, #tpu.memory_space<vmem>>, vector<1x64x64xf32>
    %32 = vector.shape_cast %31 : vector<1x64x64xf32> to vector<64x64xf32>
    %cst_35 = arith.constant dense<0.000000e+00> : vector<8x64xf32>
    %33 = tpu.matmul %29, %32, %cst_35 {dimension_numbers = #tpu.dot_dimension_numbers<[1], [0], [0], [1], [0, 0, 1, 1], [], []>} : vector<8x64xf32>, vector<64x64xf32>, vector<8x64xf32> -> vector<8x64xf32>
    %34 = arith.addf %30, %33 : vector<8x64xf32>
    %35 = math.tanh %34 : vector<8x64xf32>
    %c0_36 = arith.constant 0 : index
    %c0_37 = arith.constant 0 : index
    %c0_38 = arith.constant 0 : index
    %36 = vector.load %arg3[%c0_36, %c0_37, %c0_38] : memref<7x64x64xf32, #tpu.memory_space<vmem>>, vector<1x64x64xf32>
    %37 = vector.shape_cast %36 : vector<1x64x64xf32> to vector<64x64xf32>
    %cst_39 = arith.constant dense<0.000000e+00> : vector<8x64xf32>
    %38 = tpu.matmul %29, %37, %cst_39 {dimension_numbers = #tpu.dot_dimension_numbers<[1], [0], [0], [1], [0, 0, 1, 1], [], []>} : vector<8x64xf32>, vector<64x64xf32>, vector<8x64xf32> -> vector<8x64xf32>
    %c1_40 = arith.constant 1 : index
    %c0_41 = arith.constant 0 : index
    %c0_42 = arith.constant 0 : index
    %39 = vector.load %arg5[%c1_40, %c0_41, %c0_42] : memref<8x1x64xf32, #tpu.memory_space<vmem>>, vector<1x1x64xf32>
    %40 = vector.shape_cast %39 : vector<1x1x64xf32> to vector<1x64xf32>
    %41 = vector.broadcast %40 : vector<1x64xf32> to vector<8x64xf32>
    %42 = arith.addf %38, %41 : vector<8x64xf32>
    %c1_43 = arith.constant 1 : index
    %c0_44 = arith.constant 0 : index
    %c0_45 = arith.constant 0 : index
    %43 = vector.load %arg4[%c1_43, %c0_44, %c0_45] : memref<8x64x64xf32, #tpu.memory_space<vmem>>, vector<1x64x64xf32>
    %44 = vector.shape_cast %43 : vector<1x64x64xf32> to vector<64x64xf32>
    %cst_46 = arith.constant dense<0.000000e+00> : vector<8x64xf32>
    %45 = tpu.matmul %11, %44, %cst_46 {dimension_numbers = #tpu.dot_dimension_numbers<[1], [0], [0], [1], [0, 0, 1, 1], [], []>} : vector<8x64xf32>, vector<64x64xf32>, vector<8x64xf32> -> vector<8x64xf32>
    %46 = arith.addf %42, %45 : vector<8x64xf32>
    %47 = math.tanh %46 : vector<8x64xf32>
    %c16 = arith.constant 16 : index
    %c0_47 = arith.constant 0 : index
    %48 = vector.load %arg6[%c16, %c0_47] : memref<64x64xf32, #tpu.memory_space<vmem>>, vector<8x64xf32>
    %c0_48 = arith.constant 0 : index
    %c0_49 = arith.constant 0 : index
    %c0_50 = arith.constant 0 : index
    %49 = vector.load %arg4[%c0_48, %c0_49, %c0_50] : memref<8x64x64xf32, #tpu.memory_space<vmem>>, vector<1x64x64xf32>
    %50 = vector.shape_cast %49 : vector<1x64x64xf32> to vector<64x64xf32>
    %cst_51 = arith.constant dense<0.000000e+00> : vector<8x64xf32>
    %51 = tpu.matmul %35, %50, %cst_51 {dimension_numbers = #tpu.dot_dimension_numbers<[1], [0], [0], [1], [0, 0, 1, 1], [], []>} : vector<8x64xf32>, vector<64x64xf32>, vector<8x64xf32> -> vector<8x64xf32>
    %52 = arith.addf %48, %51 : vector<8x64xf32>
    %53 = math.tanh %52 : vector<8x64xf32>
    %c0_52 = arith.constant 0 : index
    %c0_53 = arith.constant 0 : index
    %c0_54 = arith.constant 0 : index
    %54 = vector.load %arg3[%c0_52, %c0_53, %c0_54] : memref<7x64x64xf32, #tpu.memory_space<vmem>>, vector<1x64x64xf32>
    %55 = vector.shape_cast %54 : vector<1x64x64xf32> to vector<64x64xf32>
    %cst_55 = arith.constant dense<0.000000e+00> : vector<8x64xf32>
    %56 = tpu.matmul %35, %55, %cst_55 {dimension_numbers = #tpu.dot_dimension_numbers<[1], [0], [0], [1], [0, 0, 1, 1], [], []>} : vector<8x64xf32>, vector<64x64xf32>, vector<8x64xf32> -> vector<8x64xf32>
    %c1_56 = arith.constant 1 : index
    %c0_57 = arith.constant 0 : index
    %c0_58 = arith.constant 0 : index
    %57 = vector.load %arg5[%c1_56, %c0_57, %c0_58] : memref<8x1x64xf32, #tpu.memory_space<vmem>>, vector<1x1x64xf32>
    %58 = vector.shape_cast %57 : vector<1x1x64xf32> to vector<1x64xf32>
    %59 = vector.broadcast %58 : vector<1x64xf32> to vector<8x64xf32>
    %60 = arith.addf %56, %59 : vector<8x64xf32>
    %c1_59 = arith.constant 1 : index
    %c0_60 = arith.constant 0 : index
    %c0_61 = arith.constant 0 : index
    %61 = vector.load %arg4[%c1_59, %c0_60, %c0_61] : memref<8x64x64xf32, #tpu.memory_space<vmem>>, vector<1x64x64xf32>
    %62 = vector.shape_cast %61 : vector<1x64x64xf32> to vector<64x64xf32>
    %cst_62 = arith.constant dense<0.000000e+00> : vector<8x64xf32>
    %63 = tpu.matmul %47, %62, %cst_62 {dimension_numbers = #tpu.dot_dimension_numbers<[1], [0], [0], [1], [0, 0, 1, 1], [], []>} : vector<8x64xf32>, vector<64x64xf32>, vector<8x64xf32> -> vector<8x64xf32>
    %64 = arith.addf %60, %63 : vector<8x64xf32>
    %65 = math.tanh %64 : vector<8x64xf32>
    %c1_63 = arith.constant 1 : index
    %c0_64 = arith.constant 0 : index
    %c0_65 = arith.constant 0 : index
    %66 = vector.load %arg3[%c1_63, %c0_64, %c0_65] : memref<7x64x64xf32, #tpu.memory_space<vmem>>, vector<1x64x64xf32>
    %67 = vector.shape_cast %66 : vector<1x64x64xf32> to vector<64x64xf32>
    %cst_66 = arith.constant dense<0.000000e+00> : vector<8x64xf32>
    %68 = tpu.matmul %47, %67, %cst_66 {dimension_numbers = #tpu.dot_dimension_numbers<[1], [0], [0], [1], [0, 0, 1, 1], [], []>} : vector<8x64xf32>, vector<64x64xf32>, vector<8x64xf32> -> vector<8x64xf32>
    %c2_67 = arith.constant 2 : index
    %c0_68 = arith.constant 0 : index
    %c0_69 = arith.constant 0 : index
    %69 = vector.load %arg5[%c2_67, %c0_68, %c0_69] : memref<8x1x64xf32, #tpu.memory_space<vmem>>, vector<1x1x64xf32>
    %70 = vector.shape_cast %69 : vector<1x1x64xf32> to vector<1x64xf32>
    %71 = vector.broadcast %70 : vector<1x64xf32> to vector<8x64xf32>
    %72 = arith.addf %68, %71 : vector<8x64xf32>
    %c2_70 = arith.constant 2 : index
    %c0_71 = arith.constant 0 : index
    %c0_72 = arith.constant 0 : index
    %73 = vector.load %arg4[%c2_70, %c0_71, %c0_72] : memref<8x64x64xf32, #tpu.memory_space<vmem>>, vector<1x64x64xf32>
    %74 = vector.shape_cast %73 : vector<1x64x64xf32> to vector<64x64xf32>
    %cst_73 = arith.constant dense<0.000000e+00> : vector<8x64xf32>
    %75 = tpu.matmul %13, %74, %cst_73 {dimension_numbers = #tpu.dot_dimension_numbers<[1], [0], [0], [1], [0, 0, 1, 1], [], []>} : vector<8x64xf32>, vector<64x64xf32>, vector<8x64xf32> -> vector<8x64xf32>
    %76 = arith.addf %72, %75 : vector<8x64xf32>
    %77 = math.tanh %76 : vector<8x64xf32>
    %c24 = arith.constant 24 : index
    %c0_74 = arith.constant 0 : index
    %78 = vector.load %arg6[%c24, %c0_74] : memref<64x64xf32, #tpu.memory_space<vmem>>, vector<8x64xf32>
    %c0_75 = arith.constant 0 : index
    %c0_76 = arith.constant 0 : index
    %c0_77 = arith.constant 0 : index
    %79 = vector.load %arg4[%c0_75, %c0_76, %c0_77] : memref<8x64x64xf32, #tpu.memory_space<vmem>>, vector<1x64x64xf32>
    %80 = vector.shape_cast %79 : vector<1x64x64xf32> to vector<64x64xf32>
    %cst_78 = arith.constant dense<0.000000e+00> : vector<8x64xf32>
    %81 = tpu.matmul %53, %80, %cst_78 {dimension_numbers = #tpu.dot_dimension_numbers<[1], [0], [0], [1], [0, 0, 1, 1], [], []>} : vector<8x64xf32>, vector<64x64xf32>, vector<8x64xf32> -> vector<8x64xf32>
    %82 = arith.addf %78, %81 : vector<8x64xf32>
    %83 = math.tanh %82 : vector<8x64xf32>
    %c0_79 = arith.constant 0 : index
    %c0_80 = arith.constant 0 : index
    %c0_81 = arith.constant 0 : index
    %84 = vector.load %arg3[%c0_79, %c0_80, %c0_81] : memref<7x64x64xf32, #tpu.memory_space<vmem>>, vector<1x64x64xf32>
    %85 = vector.shape_cast %84 : vector<1x64x64xf32> to vector<64x64xf32>
    %cst_82 = arith.constant dense<0.000000e+00> : vector<8x64xf32>
    %86 = tpu.matmul %53, %85, %cst_82 {dimension_numbers = #tpu.dot_dimension_numbers<[1], [0], [0], [1], [0, 0, 1, 1], [], []>} : vector<8x64xf32>, vector<64x64xf32>, vector<8x64xf32> -> vector<8x64xf32>
    %c1_83 = arith.constant 1 : index
    %c0_84 = arith.constant 0 : index
    %c0_85 = arith.constant 0 : index
    %87 = vector.load %arg5[%c1_83, %c0_84, %c0_85] : memref<8x1x64xf32, #tpu.memory_space<vmem>>, vector<1x1x64xf32>
    %88 = vector.shape_cast %87 : vector<1x1x64xf32> to vector<1x64xf32>
    %89 = vector.broadcast %88 : vector<1x64xf32> to vector<8x64xf32>
    %90 = arith.addf %86, %89 : vector<8x64xf32>
    %c1_86 = arith.constant 1 : index
    %c0_87 = arith.constant 0 : index
    %c0_88 = arith.constant 0 : index
    %91 = vector.load %arg4[%c1_86, %c0_87, %c0_88] : memref<8x64x64xf32, #tpu.memory_space<vmem>>, vector<1x64x64xf32>
    %92 = vector.shape_cast %91 : vector<1x64x64xf32> to vector<64x64xf32>
    %cst_89 = arith.constant dense<0.000000e+00> : vector<8x64xf32>
    %93 = tpu.matmul %65, %92, %cst_89 {dimension_numbers = #tpu.dot_dimension_numbers<[1], [0], [0], [1], [0, 0, 1, 1], [], []>} : vector<8x64xf32>, vector<64x64xf32>, vector<8x64xf32> -> vector<8x64xf32>
    %94 = arith.addf %90, %93 : vector<8x64xf32>
    %95 = math.tanh %94 : vector<8x64xf32>
    %c1_90 = arith.constant 1 : index
    %c0_91 = arith.constant 0 : index
    %c0_92 = arith.constant 0 : index
    %96 = vector.load %arg3[%c1_90, %c0_91, %c0_92] : memref<7x64x64xf32, #tpu.memory_space<vmem>>, vector<1x64x64xf32>
    %97 = vector.shape_cast %96 : vector<1x64x64xf32> to vector<64x64xf32>
    %cst_93 = arith.constant dense<0.000000e+00> : vector<8x64xf32>
    %98 = tpu.matmul %65, %97, %cst_93 {dimension_numbers = #tpu.dot_dimension_numbers<[1], [0], [0], [1], [0, 0, 1, 1], [], []>} : vector<8x64xf32>, vector<64x64xf32>, vector<8x64xf32> -> vector<8x64xf32>
    %c2_94 = arith.constant 2 : index
    %c0_95 = arith.constant 0 : index
    %c0_96 = arith.constant 0 : index
    %99 = vector.load %arg5[%c2_94, %c0_95, %c0_96] : memref<8x1x64xf32, #tpu.memory_space<vmem>>, vector<1x1x64xf32>
    %100 = vector.shape_cast %99 : vector<1x1x64xf32> to vector<1x64xf32>
    %101 = vector.broadcast %100 : vector<1x64xf32> to vector<8x64xf32>
    %102 = arith.addf %98, %101 : vector<8x64xf32>
    %c2_97 = arith.constant 2 : index
    %c0_98 = arith.constant 0 : index
    %c0_99 = arith.constant 0 : index
    %103 = vector.load %arg4[%c2_97, %c0_98, %c0_99] : memref<8x64x64xf32, #tpu.memory_space<vmem>>, vector<1x64x64xf32>
    %104 = vector.shape_cast %103 : vector<1x64x64xf32> to vector<64x64xf32>
    %cst_100 = arith.constant dense<0.000000e+00> : vector<8x64xf32>
    %105 = tpu.matmul %77, %104, %cst_100 {dimension_numbers = #tpu.dot_dimension_numbers<[1], [0], [0], [1], [0, 0, 1, 1], [], []>} : vector<8x64xf32>, vector<64x64xf32>, vector<8x64xf32> -> vector<8x64xf32>
    %106 = arith.addf %102, %105 : vector<8x64xf32>
    %107 = math.tanh %106 : vector<8x64xf32>
    %c2_101 = arith.constant 2 : index
    %c0_102 = arith.constant 0 : index
    %c0_103 = arith.constant 0 : index
    %108 = vector.load %arg3[%c2_101, %c0_102, %c0_103] : memref<7x64x64xf32, #tpu.memory_space<vmem>>, vector<1x64x64xf32>
    %109 = vector.shape_cast %108 : vector<1x64x64xf32> to vector<64x64xf32>
    %cst_104 = arith.constant dense<0.000000e+00> : vector<8x64xf32>
    %110 = tpu.matmul %77, %109, %cst_104 {dimension_numbers = #tpu.dot_dimension_numbers<[1], [0], [0], [1], [0, 0, 1, 1], [], []>} : vector<8x64xf32>, vector<64x64xf32>, vector<8x64xf32> -> vector<8x64xf32>
    %c3_105 = arith.constant 3 : index
    %c0_106 = arith.constant 0 : index
    %c0_107 = arith.constant 0 : index
    %111 = vector.load %arg5[%c3_105, %c0_106, %c0_107] : memref<8x1x64xf32, #tpu.memory_space<vmem>>, vector<1x1x64xf32>
    %112 = vector.shape_cast %111 : vector<1x1x64xf32> to vector<1x64xf32>
    %113 = vector.broadcast %112 : vector<1x64xf32> to vector<8x64xf32>
    %114 = arith.addf %110, %113 : vector<8x64xf32>
    %c3_108 = arith.constant 3 : index
    %c0_109 = arith.constant 0 : index
    %c0_110 = arith.constant 0 : index
    %115 = vector.load %arg4[%c3_108, %c0_109, %c0_110] : memref<8x64x64xf32, #tpu.memory_space<vmem>>, vector<1x64x64xf32>
    %116 = vector.shape_cast %115 : vector<1x64x64xf32> to vector<64x64xf32>
    %cst_111 = arith.constant dense<0.000000e+00> : vector<8x64xf32>
    %117 = tpu.matmul %15, %116, %cst_111 {dimension_numbers = #tpu.dot_dimension_numbers<[1], [0], [0], [1], [0, 0, 1, 1], [], []>} : vector<8x64xf32>, vector<64x64xf32>, vector<8x64xf32> -> vector<8x64xf32>
    %118 = arith.addf %114, %117 : vector<8x64xf32>
    %119 = math.tanh %118 : vector<8x64xf32>
    %c32 = arith.constant 32 : index
    %c0_112 = arith.constant 0 : index
    %120 = vector.load %arg6[%c32, %c0_112] : memref<64x64xf32, #tpu.memory_space<vmem>>, vector<8x64xf32>
    %c0_113 = arith.constant 0 : index
    %c0_114 = arith.constant 0 : index
    %c0_115 = arith.constant 0 : index
    %121 = vector.load %arg4[%c0_113, %c0_114, %c0_115] : memref<8x64x64xf32, #tpu.memory_space<vmem>>, vector<1x64x64xf32>
    %122 = vector.shape_cast %121 : vector<1x64x64xf32> to vector<64x64xf32>
    %cst_116 = arith.constant dense<0.000000e+00> : vector<8x64xf32>
    %123 = tpu.matmul %83, %122, %cst_116 {dimension_numbers = #tpu.dot_dimension_numbers<[1], [0], [0], [1], [0, 0, 1, 1], [], []>} : vector<8x64xf32>, vector<64x64xf32>, vector<8x64xf32> -> vector<8x64xf32>
    %124 = arith.addf %120, %123 : vector<8x64xf32>
    %125 = math.tanh %124 : vector<8x64xf32>
    %c0_117 = arith.constant 0 : index
    %c0_118 = arith.constant 0 : index
    %c0_119 = arith.constant 0 : index
    %126 = vector.load %arg3[%c0_117, %c0_118, %c0_119] : memref<7x64x64xf32, #tpu.memory_space<vmem>>, vector<1x64x64xf32>
    %127 = vector.shape_cast %126 : vector<1x64x64xf32> to vector<64x64xf32>
    %cst_120 = arith.constant dense<0.000000e+00> : vector<8x64xf32>
    %128 = tpu.matmul %83, %127, %cst_120 {dimension_numbers = #tpu.dot_dimension_numbers<[1], [0], [0], [1], [0, 0, 1, 1], [], []>} : vector<8x64xf32>, vector<64x64xf32>, vector<8x64xf32> -> vector<8x64xf32>
    %c1_121 = arith.constant 1 : index
    %c0_122 = arith.constant 0 : index
    %c0_123 = arith.constant 0 : index
    %129 = vector.load %arg5[%c1_121, %c0_122, %c0_123] : memref<8x1x64xf32, #tpu.memory_space<vmem>>, vector<1x1x64xf32>
    %130 = vector.shape_cast %129 : vector<1x1x64xf32> to vector<1x64xf32>
    %131 = vector.broadcast %130 : vector<1x64xf32> to vector<8x64xf32>
    %132 = arith.addf %128, %131 : vector<8x64xf32>
    %c1_124 = arith.constant 1 : index
    %c0_125 = arith.constant 0 : index
    %c0_126 = arith.constant 0 : index
    %133 = vector.load %arg4[%c1_124, %c0_125, %c0_126] : memref<8x64x64xf32, #tpu.memory_space<vmem>>, vector<1x64x64xf32>
    %134 = vector.shape_cast %133 : vector<1x64x64xf32> to vector<64x64xf32>
    %cst_127 = arith.constant dense<0.000000e+00> : vector<8x64xf32>
    %135 = tpu.matmul %95, %134, %cst_127 {dimension_numbers = #tpu.dot_dimension_numbers<[1], [0], [0], [1], [0, 0, 1, 1], [], []>} : vector<8x64xf32>, vector<64x64xf32>, vector<8x64xf32> -> vector<8x64xf32>
    %136 = arith.addf %132, %135 : vector<8x64xf32>
    %137 = math.tanh %136 : vector<8x64xf32>
    %c1_128 = arith.constant 1 : index
    %c0_129 = arith.constant 0 : index
    %c0_130 = arith.constant 0 : index
    %138 = vector.load %arg3[%c1_128, %c0_129, %c0_130] : memref<7x64x64xf32, #tpu.memory_space<vmem>>, vector<1x64x64xf32>
    %139 = vector.shape_cast %138 : vector<1x64x64xf32> to vector<64x64xf32>
    %cst_131 = arith.constant dense<0.000000e+00> : vector<8x64xf32>
    %140 = tpu.matmul %95, %139, %cst_131 {dimension_numbers = #tpu.dot_dimension_numbers<[1], [0], [0], [1], [0, 0, 1, 1], [], []>} : vector<8x64xf32>, vector<64x64xf32>, vector<8x64xf32> -> vector<8x64xf32>
    %c2_132 = arith.constant 2 : index
    %c0_133 = arith.constant 0 : index
    %c0_134 = arith.constant 0 : index
    %141 = vector.load %arg5[%c2_132, %c0_133, %c0_134] : memref<8x1x64xf32, #tpu.memory_space<vmem>>, vector<1x1x64xf32>
    %142 = vector.shape_cast %141 : vector<1x1x64xf32> to vector<1x64xf32>
    %143 = vector.broadcast %142 : vector<1x64xf32> to vector<8x64xf32>
    %144 = arith.addf %140, %143 : vector<8x64xf32>
    %c2_135 = arith.constant 2 : index
    %c0_136 = arith.constant 0 : index
    %c0_137 = arith.constant 0 : index
    %145 = vector.load %arg4[%c2_135, %c0_136, %c0_137] : memref<8x64x64xf32, #tpu.memory_space<vmem>>, vector<1x64x64xf32>
    %146 = vector.shape_cast %145 : vector<1x64x64xf32> to vector<64x64xf32>
    %cst_138 = arith.constant dense<0.000000e+00> : vector<8x64xf32>
    %147 = tpu.matmul %107, %146, %cst_138 {dimension_numbers = #tpu.dot_dimension_numbers<[1], [0], [0], [1], [0, 0, 1, 1], [], []>} : vector<8x64xf32>, vector<64x64xf32>, vector<8x64xf32> -> vector<8x64xf32>
    %148 = arith.addf %144, %147 : vector<8x64xf32>
    %149 = math.tanh %148 : vector<8x64xf32>
    %c2_139 = arith.constant 2 : index
    %c0_140 = arith.constant 0 : index
    %c0_141 = arith.constant 0 : index
    %150 = vector.load %arg3[%c2_139, %c0_140, %c0_141] : memref<7x64x64xf32, #tpu.memory_space<vmem>>, vector<1x64x64xf32>
    %151 = vector.shape_cast %150 : vector<1x64x64xf32> to vector<64x64xf32>
    %cst_142 = arith.constant dense<0.000000e+00> : vector<8x64xf32>
    %152 = tpu.matmul %107, %151, %cst_142 {dimension_numbers = #tpu.dot_dimension_numbers<[1], [0], [0], [1], [0, 0, 1, 1], [], []>} : vector<8x64xf32>, vector<64x64xf32>, vector<8x64xf32> -> vector<8x64xf32>
    %c3_143 = arith.constant 3 : index
    %c0_144 = arith.constant 0 : index
    %c0_145 = arith.constant 0 : index
    %153 = vector.load %arg5[%c3_143, %c0_144, %c0_145] : memref<8x1x64xf32, #tpu.memory_space<vmem>>, vector<1x1x64xf32>
    %154 = vector.shape_cast %153 : vector<1x1x64xf32> to vector<1x64xf32>
    %155 = vector.broadcast %154 : vector<1x64xf32> to vector<8x64xf32>
    %156 = arith.addf %152, %155 : vector<8x64xf32>
    %c3_146 = arith.constant 3 : index
    %c0_147 = arith.constant 0 : index
    %c0_148 = arith.constant 0 : index
    %157 = vector.load %arg4[%c3_146, %c0_147, %c0_148] : memref<8x64x64xf32, #tpu.memory_space<vmem>>, vector<1x64x64xf32>
    %158 = vector.shape_cast %157 : vector<1x64x64xf32> to vector<64x64xf32>
    %cst_149 = arith.constant dense<0.000000e+00> : vector<8x64xf32>
    %159 = tpu.matmul %119, %158, %cst_149 {dimension_numbers = #tpu.dot_dimension_numbers<[1], [0], [0], [1], [0, 0, 1, 1], [], []>} : vector<8x64xf32>, vector<64x64xf32>, vector<8x64xf32> -> vector<8x64xf32>
    %160 = arith.addf %156, %159 : vector<8x64xf32>
    %161 = math.tanh %160 : vector<8x64xf32>
    %c3_150 = arith.constant 3 : index
    %c0_151 = arith.constant 0 : index
    %c0_152 = arith.constant 0 : index
    %162 = vector.load %arg3[%c3_150, %c0_151, %c0_152] : memref<7x64x64xf32, #tpu.memory_space<vmem>>, vector<1x64x64xf32>
    %163 = vector.shape_cast %162 : vector<1x64x64xf32> to vector<64x64xf32>
    %cst_153 = arith.constant dense<0.000000e+00> : vector<8x64xf32>
    %164 = tpu.matmul %119, %163, %cst_153 {dimension_numbers = #tpu.dot_dimension_numbers<[1], [0], [0], [1], [0, 0, 1, 1], [], []>} : vector<8x64xf32>, vector<64x64xf32>, vector<8x64xf32> -> vector<8x64xf32>
    %c4_154 = arith.constant 4 : index
    %c0_155 = arith.constant 0 : index
    %c0_156 = arith.constant 0 : index
    %165 = vector.load %arg5[%c4_154, %c0_155, %c0_156] : memref<8x1x64xf32, #tpu.memory_space<vmem>>, vector<1x1x64xf32>
    %166 = vector.shape_cast %165 : vector<1x1x64xf32> to vector<1x64xf32>
    %167 = vector.broadcast %166 : vector<1x64xf32> to vector<8x64xf32>
    %168 = arith.addf %164, %167 : vector<8x64xf32>
    %c4_157 = arith.constant 4 : index
    %c0_158 = arith.constant 0 : index
    %c0_159 = arith.constant 0 : index
    %169 = vector.load %arg4[%c4_157, %c0_158, %c0_159] : memref<8x64x64xf32, #tpu.memory_space<vmem>>, vector<1x64x64xf32>
    %170 = vector.shape_cast %169 : vector<1x64x64xf32> to vector<64x64xf32>
    %cst_160 = arith.constant dense<0.000000e+00> : vector<8x64xf32>
    %171 = tpu.matmul %17, %170, %cst_160 {dimension_numbers = #tpu.dot_dimension_numbers<[1], [0], [0], [1], [0, 0, 1, 1], [], []>} : vector<8x64xf32>, vector<64x64xf32>, vector<8x64xf32> -> vector<8x64xf32>
    %172 = arith.addf %168, %171 : vector<8x64xf32>
    %173 = math.tanh %172 : vector<8x64xf32>
    %c40 = arith.constant 40 : index
    %c0_161 = arith.constant 0 : index
    %174 = vector.load %arg6[%c40, %c0_161] : memref<64x64xf32, #tpu.memory_space<vmem>>, vector<8x64xf32>
    %c0_162 = arith.constant 0 : index
    %c0_163 = arith.constant 0 : index
    %c0_164 = arith.constant 0 : index
    %175 = vector.load %arg4[%c0_162, %c0_163, %c0_164] : memref<8x64x64xf32, #tpu.memory_space<vmem>>, vector<1x64x64xf32>
    %176 = vector.shape_cast %175 : vector<1x64x64xf32> to vector<64x64xf32>
    %cst_165 = arith.constant dense<0.000000e+00> : vector<8x64xf32>
    %177 = tpu.matmul %125, %176, %cst_165 {dimension_numbers = #tpu.dot_dimension_numbers<[1], [0], [0], [1], [0, 0, 1, 1], [], []>} : vector<8x64xf32>, vector<64x64xf32>, vector<8x64xf32> -> vector<8x64xf32>
    %178 = arith.addf %174, %177 : vector<8x64xf32>
    %179 = math.tanh %178 : vector<8x64xf32>
    %c0_166 = arith.constant 0 : index
    %c0_167 = arith.constant 0 : index
    %c0_168 = arith.constant 0 : index
    %180 = vector.load %arg3[%c0_166, %c0_167, %c0_168] : memref<7x64x64xf32, #tpu.memory_space<vmem>>, vector<1x64x64xf32>
    %181 = vector.shape_cast %180 : vector<1x64x64xf32> to vector<64x64xf32>
    %cst_169 = arith.constant dense<0.000000e+00> : vector<8x64xf32>
    %182 = tpu.matmul %125, %181, %cst_169 {dimension_numbers = #tpu.dot_dimension_numbers<[1], [0], [0], [1], [0, 0, 1, 1], [], []>} : vector<8x64xf32>, vector<64x64xf32>, vector<8x64xf32> -> vector<8x64xf32>
    %c1_170 = arith.constant 1 : index
    %c0_171 = arith.constant 0 : index
    %c0_172 = arith.constant 0 : index
    %183 = vector.load %arg5[%c1_170, %c0_171, %c0_172] : memref<8x1x64xf32, #tpu.memory_space<vmem>>, vector<1x1x64xf32>
    %184 = vector.shape_cast %183 : vector<1x1x64xf32> to vector<1x64xf32>
    %185 = vector.broadcast %184 : vector<1x64xf32> to vector<8x64xf32>
    %186 = arith.addf %182, %185 : vector<8x64xf32>
    %c1_173 = arith.constant 1 : index
    %c0_174 = arith.constant 0 : index
    %c0_175 = arith.constant 0 : index
    %187 = vector.load %arg4[%c1_173, %c0_174, %c0_175] : memref<8x64x64xf32, #tpu.memory_space<vmem>>, vector<1x64x64xf32>
    %188 = vector.shape_cast %187 : vector<1x64x64xf32> to vector<64x64xf32>
    %cst_176 = arith.constant dense<0.000000e+00> : vector<8x64xf32>
    %189 = tpu.matmul %137, %188, %cst_176 {dimension_numbers = #tpu.dot_dimension_numbers<[1], [0], [0], [1], [0, 0, 1, 1], [], []>} : vector<8x64xf32>, vector<64x64xf32>, vector<8x64xf32> -> vector<8x64xf32>
    %190 = arith.addf %186, %189 : vector<8x64xf32>
    %191 = math.tanh %190 : vector<8x64xf32>
    %c1_177 = arith.constant 1 : index
    %c0_178 = arith.constant 0 : index
    %c0_179 = arith.constant 0 : index
    %192 = vector.load %arg3[%c1_177, %c0_178, %c0_179] : memref<7x64x64xf32, #tpu.memory_space<vmem>>, vector<1x64x64xf32>
    %193 = vector.shape_cast %192 : vector<1x64x64xf32> to vector<64x64xf32>
    %cst_180 = arith.constant dense<0.000000e+00> : vector<8x64xf32>
    %194 = tpu.matmul %137, %193, %cst_180 {dimension_numbers = #tpu.dot_dimension_numbers<[1], [0], [0], [1], [0, 0, 1, 1], [], []>} : vector<8x64xf32>, vector<64x64xf32>, vector<8x64xf32> -> vector<8x64xf32>
    %c2_181 = arith.constant 2 : index
    %c0_182 = arith.constant 0 : index
    %c0_183 = arith.constant 0 : index
    %195 = vector.load %arg5[%c2_181, %c0_182, %c0_183] : memref<8x1x64xf32, #tpu.memory_space<vmem>>, vector<1x1x64xf32>
    %196 = vector.shape_cast %195 : vector<1x1x64xf32> to vector<1x64xf32>
    %197 = vector.broadcast %196 : vector<1x64xf32> to vector<8x64xf32>
    %198 = arith.addf %194, %197 : vector<8x64xf32>
    %c2_184 = arith.constant 2 : index
    %c0_185 = arith.constant 0 : index
    %c0_186 = arith.constant 0 : index
    %199 = vector.load %arg4[%c2_184, %c0_185, %c0_186] : memref<8x64x64xf32, #tpu.memory_space<vmem>>, vector<1x64x64xf32>
    %200 = vector.shape_cast %199 : vector<1x64x64xf32> to vector<64x64xf32>
    %cst_187 = arith.constant dense<0.000000e+00> : vector<8x64xf32>
    %201 = tpu.matmul %149, %200, %cst_187 {dimension_numbers = #tpu.dot_dimension_numbers<[1], [0], [0], [1], [0, 0, 1, 1], [], []>} : vector<8x64xf32>, vector<64x64xf32>, vector<8x64xf32> -> vector<8x64xf32>
    %202 = arith.addf %198, %201 : vector<8x64xf32>
    %203 = math.tanh %202 : vector<8x64xf32>
    %c2_188 = arith.constant 2 : index
    %c0_189 = arith.constant 0 : index
    %c0_190 = arith.constant 0 : index
    %204 = vector.load %arg3[%c2_188, %c0_189, %c0_190] : memref<7x64x64xf32, #tpu.memory_space<vmem>>, vector<1x64x64xf32>
    %205 = vector.shape_cast %204 : vector<1x64x64xf32> to vector<64x64xf32>
    %cst_191 = arith.constant dense<0.000000e+00> : vector<8x64xf32>
    %206 = tpu.matmul %149, %205, %cst_191 {dimension_numbers = #tpu.dot_dimension_numbers<[1], [0], [0], [1], [0, 0, 1, 1], [], []>} : vector<8x64xf32>, vector<64x64xf32>, vector<8x64xf32> -> vector<8x64xf32>
    %c3_192 = arith.constant 3 : index
    %c0_193 = arith.constant 0 : index
    %c0_194 = arith.constant 0 : index
    %207 = vector.load %arg5[%c3_192, %c0_193, %c0_194] : memref<8x1x64xf32, #tpu.memory_space<vmem>>, vector<1x1x64xf32>
    %208 = vector.shape_cast %207 : vector<1x1x64xf32> to vector<1x64xf32>
    %209 = vector.broadcast %208 : vector<1x64xf32> to vector<8x64xf32>
    %210 = arith.addf %206, %209 : vector<8x64xf32>
    %c3_195 = arith.constant 3 : index
    %c0_196 = arith.constant 0 : index
    %c0_197 = arith.constant 0 : index
    %211 = vector.load %arg4[%c3_195, %c0_196, %c0_197] : memref<8x64x64xf32, #tpu.memory_space<vmem>>, vector<1x64x64xf32>
    %212 = vector.shape_cast %211 : vector<1x64x64xf32> to vector<64x64xf32>
    %cst_198 = arith.constant dense<0.000000e+00> : vector<8x64xf32>
    %213 = tpu.matmul %161, %212, %cst_198 {dimension_numbers = #tpu.dot_dimension_numbers<[1], [0], [0], [1], [0, 0, 1, 1], [], []>} : vector<8x64xf32>, vector<64x64xf32>, vector<8x64xf32> -> vector<8x64xf32>
    %214 = arith.addf %210, %213 : vector<8x64xf32>
    %215 = math.tanh %214 : vector<8x64xf32>
    %c3_199 = arith.constant 3 : index
    %c0_200 = arith.constant 0 : index
    %c0_201 = arith.constant 0 : index
    %216 = vector.load %arg3[%c3_199, %c0_200, %c0_201] : memref<7x64x64xf32, #tpu.memory_space<vmem>>, vector<1x64x64xf32>
    %217 = vector.shape_cast %216 : vector<1x64x64xf32> to vector<64x64xf32>
    %cst_202 = arith.constant dense<0.000000e+00> : vector<8x64xf32>
    %218 = tpu.matmul %161, %217, %cst_202 {dimension_numbers = #tpu.dot_dimension_numbers<[1], [0], [0], [1], [0, 0, 1, 1], [], []>} : vector<8x64xf32>, vector<64x64xf32>, vector<8x64xf32> -> vector<8x64xf32>
    %c4_203 = arith.constant 4 : index
    %c0_204 = arith.constant 0 : index
    %c0_205 = arith.constant 0 : index
    %219 = vector.load %arg5[%c4_203, %c0_204, %c0_205] : memref<8x1x64xf32, #tpu.memory_space<vmem>>, vector<1x1x64xf32>
    %220 = vector.shape_cast %219 : vector<1x1x64xf32> to vector<1x64xf32>
    %221 = vector.broadcast %220 : vector<1x64xf32> to vector<8x64xf32>
    %222 = arith.addf %218, %221 : vector<8x64xf32>
    %c4_206 = arith.constant 4 : index
    %c0_207 = arith.constant 0 : index
    %c0_208 = arith.constant 0 : index
    %223 = vector.load %arg4[%c4_206, %c0_207, %c0_208] : memref<8x64x64xf32, #tpu.memory_space<vmem>>, vector<1x64x64xf32>
    %224 = vector.shape_cast %223 : vector<1x64x64xf32> to vector<64x64xf32>
    %cst_209 = arith.constant dense<0.000000e+00> : vector<8x64xf32>
    %225 = tpu.matmul %173, %224, %cst_209 {dimension_numbers = #tpu.dot_dimension_numbers<[1], [0], [0], [1], [0, 0, 1, 1], [], []>} : vector<8x64xf32>, vector<64x64xf32>, vector<8x64xf32> -> vector<8x64xf32>
    %226 = arith.addf %222, %225 : vector<8x64xf32>
    %227 = math.tanh %226 : vector<8x64xf32>
    %c4_210 = arith.constant 4 : index
    %c0_211 = arith.constant 0 : index
    %c0_212 = arith.constant 0 : index
    %228 = vector.load %arg3[%c4_210, %c0_211, %c0_212] : memref<7x64x64xf32, #tpu.memory_space<vmem>>, vector<1x64x64xf32>
    %229 = vector.shape_cast %228 : vector<1x64x64xf32> to vector<64x64xf32>
    %cst_213 = arith.constant dense<0.000000e+00> : vector<8x64xf32>
    %230 = tpu.matmul %173, %229, %cst_213 {dimension_numbers = #tpu.dot_dimension_numbers<[1], [0], [0], [1], [0, 0, 1, 1], [], []>} : vector<8x64xf32>, vector<64x64xf32>, vector<8x64xf32> -> vector<8x64xf32>
    %c5_214 = arith.constant 5 : index
    %c0_215 = arith.constant 0 : index
    %c0_216 = arith.constant 0 : index
    %231 = vector.load %arg5[%c5_214, %c0_215, %c0_216] : memref<8x1x64xf32, #tpu.memory_space<vmem>>, vector<1x1x64xf32>
    %232 = vector.shape_cast %231 : vector<1x1x64xf32> to vector<1x64xf32>
    %233 = vector.broadcast %232 : vector<1x64xf32> to vector<8x64xf32>
    %234 = arith.addf %230, %233 : vector<8x64xf32>
    %c5_217 = arith.constant 5 : index
    %c0_218 = arith.constant 0 : index
    %c0_219 = arith.constant 0 : index
    %235 = vector.load %arg4[%c5_217, %c0_218, %c0_219] : memref<8x64x64xf32, #tpu.memory_space<vmem>>, vector<1x64x64xf32>
    %236 = vector.shape_cast %235 : vector<1x64x64xf32> to vector<64x64xf32>
    %cst_220 = arith.constant dense<0.000000e+00> : vector<8x64xf32>
    %237 = tpu.matmul %19, %236, %cst_220 {dimension_numbers = #tpu.dot_dimension_numbers<[1], [0], [0], [1], [0, 0, 1, 1], [], []>} : vector<8x64xf32>, vector<64x64xf32>, vector<8x64xf32> -> vector<8x64xf32>
    %238 = arith.addf %234, %237 : vector<8x64xf32>
    %239 = math.tanh %238 : vector<8x64xf32>
    %c48 = arith.constant 48 : index
    %c0_221 = arith.constant 0 : index
    %240 = vector.load %arg6[%c48, %c0_221] : memref<64x64xf32, #tpu.memory_space<vmem>>, vector<8x64xf32>
    %c0_222 = arith.constant 0 : index
    %c0_223 = arith.constant 0 : index
    %c0_224 = arith.constant 0 : index
    %241 = vector.load %arg4[%c0_222, %c0_223, %c0_224] : memref<8x64x64xf32, #tpu.memory_space<vmem>>, vector<1x64x64xf32>
    %242 = vector.shape_cast %241 : vector<1x64x64xf32> to vector<64x64xf32>
    %cst_225 = arith.constant dense<0.000000e+00> : vector<8x64xf32>
    %243 = tpu.matmul %179, %242, %cst_225 {dimension_numbers = #tpu.dot_dimension_numbers<[1], [0], [0], [1], [0, 0, 1, 1], [], []>} : vector<8x64xf32>, vector<64x64xf32>, vector<8x64xf32> -> vector<8x64xf32>
    %244 = arith.addf %240, %243 : vector<8x64xf32>
    %245 = math.tanh %244 : vector<8x64xf32>
    %c0_226 = arith.constant 0 : index
    %c0_227 = arith.constant 0 : index
    %c0_228 = arith.constant 0 : index
    %246 = vector.load %arg3[%c0_226, %c0_227, %c0_228] : memref<7x64x64xf32, #tpu.memory_space<vmem>>, vector<1x64x64xf32>
    %247 = vector.shape_cast %246 : vector<1x64x64xf32> to vector<64x64xf32>
    %cst_229 = arith.constant dense<0.000000e+00> : vector<8x64xf32>
    %248 = tpu.matmul %179, %247, %cst_229 {dimension_numbers = #tpu.dot_dimension_numbers<[1], [0], [0], [1], [0, 0, 1, 1], [], []>} : vector<8x64xf32>, vector<64x64xf32>, vector<8x64xf32> -> vector<8x64xf32>
    %c1_230 = arith.constant 1 : index
    %c0_231 = arith.constant 0 : index
    %c0_232 = arith.constant 0 : index
    %249 = vector.load %arg5[%c1_230, %c0_231, %c0_232] : memref<8x1x64xf32, #tpu.memory_space<vmem>>, vector<1x1x64xf32>
    %250 = vector.shape_cast %249 : vector<1x1x64xf32> to vector<1x64xf32>
    %251 = vector.broadcast %250 : vector<1x64xf32> to vector<8x64xf32>
    %252 = arith.addf %248, %251 : vector<8x64xf32>
    %c1_233 = arith.constant 1 : index
    %c0_234 = arith.constant 0 : index
    %c0_235 = arith.constant 0 : index
    %253 = vector.load %arg4[%c1_233, %c0_234, %c0_235] : memref<8x64x64xf32, #tpu.memory_space<vmem>>, vector<1x64x64xf32>
    %254 = vector.shape_cast %253 : vector<1x64x64xf32> to vector<64x64xf32>
    %cst_236 = arith.constant dense<0.000000e+00> : vector<8x64xf32>
    %255 = tpu.matmul %191, %254, %cst_236 {dimension_numbers = #tpu.dot_dimension_numbers<[1], [0], [0], [1], [0, 0, 1, 1], [], []>} : vector<8x64xf32>, vector<64x64xf32>, vector<8x64xf32> -> vector<8x64xf32>
    %256 = arith.addf %252, %255 : vector<8x64xf32>
    %257 = math.tanh %256 : vector<8x64xf32>
    %c1_237 = arith.constant 1 : index
    %c0_238 = arith.constant 0 : index
    %c0_239 = arith.constant 0 : index
    %258 = vector.load %arg3[%c1_237, %c0_238, %c0_239] : memref<7x64x64xf32, #tpu.memory_space<vmem>>, vector<1x64x64xf32>
    %259 = vector.shape_cast %258 : vector<1x64x64xf32> to vector<64x64xf32>
    %cst_240 = arith.constant dense<0.000000e+00> : vector<8x64xf32>
    %260 = tpu.matmul %191, %259, %cst_240 {dimension_numbers = #tpu.dot_dimension_numbers<[1], [0], [0], [1], [0, 0, 1, 1], [], []>} : vector<8x64xf32>, vector<64x64xf32>, vector<8x64xf32> -> vector<8x64xf32>
    %c2_241 = arith.constant 2 : index
    %c0_242 = arith.constant 0 : index
    %c0_243 = arith.constant 0 : index
    %261 = vector.load %arg5[%c2_241, %c0_242, %c0_243] : memref<8x1x64xf32, #tpu.memory_space<vmem>>, vector<1x1x64xf32>
    %262 = vector.shape_cast %261 : vector<1x1x64xf32> to vector<1x64xf32>
    %263 = vector.broadcast %262 : vector<1x64xf32> to vector<8x64xf32>
    %264 = arith.addf %260, %263 : vector<8x64xf32>
    %c2_244 = arith.constant 2 : index
    %c0_245 = arith.constant 0 : index
    %c0_246 = arith.constant 0 : index
    %265 = vector.load %arg4[%c2_244, %c0_245, %c0_246] : memref<8x64x64xf32, #tpu.memory_space<vmem>>, vector<1x64x64xf32>
    %266 = vector.shape_cast %265 : vector<1x64x64xf32> to vector<64x64xf32>
    %cst_247 = arith.constant dense<0.000000e+00> : vector<8x64xf32>
    %267 = tpu.matmul %203, %266, %cst_247 {dimension_numbers = #tpu.dot_dimension_numbers<[1], [0], [0], [1], [0, 0, 1, 1], [], []>} : vector<8x64xf32>, vector<64x64xf32>, vector<8x64xf32> -> vector<8x64xf32>
    %268 = arith.addf %264, %267 : vector<8x64xf32>
    %269 = math.tanh %268 : vector<8x64xf32>
    %c2_248 = arith.constant 2 : index
    %c0_249 = arith.constant 0 : index
    %c0_250 = arith.constant 0 : index
    %270 = vector.load %arg3[%c2_248, %c0_249, %c0_250] : memref<7x64x64xf32, #tpu.memory_space<vmem>>, vector<1x64x64xf32>
    %271 = vector.shape_cast %270 : vector<1x64x64xf32> to vector<64x64xf32>
    %cst_251 = arith.constant dense<0.000000e+00> : vector<8x64xf32>
    %272 = tpu.matmul %203, %271, %cst_251 {dimension_numbers = #tpu.dot_dimension_numbers<[1], [0], [0], [1], [0, 0, 1, 1], [], []>} : vector<8x64xf32>, vector<64x64xf32>, vector<8x64xf32> -> vector<8x64xf32>
    %c3_252 = arith.constant 3 : index
    %c0_253 = arith.constant 0 : index
    %c0_254 = arith.constant 0 : index
    %273 = vector.load %arg5[%c3_252, %c0_253, %c0_254] : memref<8x1x64xf32, #tpu.memory_space<vmem>>, vector<1x1x64xf32>
    %274 = vector.shape_cast %273 : vector<1x1x64xf32> to vector<1x64xf32>
    %275 = vector.broadcast %274 : vector<1x64xf32> to vector<8x64xf32>
    %276 = arith.addf %272, %275 : vector<8x64xf32>
    %c3_255 = arith.constant 3 : index
    %c0_256 = arith.constant 0 : index
    %c0_257 = arith.constant 0 : index
    %277 = vector.load %arg4[%c3_255, %c0_256, %c0_257] : memref<8x64x64xf32, #tpu.memory_space<vmem>>, vector<1x64x64xf32>
    %278 = vector.shape_cast %277 : vector<1x64x64xf32> to vector<64x64xf32>
    %cst_258 = arith.constant dense<0.000000e+00> : vector<8x64xf32>
    %279 = tpu.matmul %215, %278, %cst_258 {dimension_numbers = #tpu.dot_dimension_numbers<[1], [0], [0], [1], [0, 0, 1, 1], [], []>} : vector<8x64xf32>, vector<64x64xf32>, vector<8x64xf32> -> vector<8x64xf32>
    %280 = arith.addf %276, %279 : vector<8x64xf32>
    %281 = math.tanh %280 : vector<8x64xf32>
    %c3_259 = arith.constant 3 : index
    %c0_260 = arith.constant 0 : index
    %c0_261 = arith.constant 0 : index
    %282 = vector.load %arg3[%c3_259, %c0_260, %c0_261] : memref<7x64x64xf32, #tpu.memory_space<vmem>>, vector<1x64x64xf32>
    %283 = vector.shape_cast %282 : vector<1x64x64xf32> to vector<64x64xf32>
    %cst_262 = arith.constant dense<0.000000e+00> : vector<8x64xf32>
    %284 = tpu.matmul %215, %283, %cst_262 {dimension_numbers = #tpu.dot_dimension_numbers<[1], [0], [0], [1], [0, 0, 1, 1], [], []>} : vector<8x64xf32>, vector<64x64xf32>, vector<8x64xf32> -> vector<8x64xf32>
    %c4_263 = arith.constant 4 : index
    %c0_264 = arith.constant 0 : index
    %c0_265 = arith.constant 0 : index
    %285 = vector.load %arg5[%c4_263, %c0_264, %c0_265] : memref<8x1x64xf32, #tpu.memory_space<vmem>>, vector<1x1x64xf32>
    %286 = vector.shape_cast %285 : vector<1x1x64xf32> to vector<1x64xf32>
    %287 = vector.broadcast %286 : vector<1x64xf32> to vector<8x64xf32>
    %288 = arith.addf %284, %287 : vector<8x64xf32>
    %c4_266 = arith.constant 4 : index
    %c0_267 = arith.constant 0 : index
    %c0_268 = arith.constant 0 : index
    %289 = vector.load %arg4[%c4_266, %c0_267, %c0_268] : memref<8x64x64xf32, #tpu.memory_space<vmem>>, vector<1x64x64xf32>
    %290 = vector.shape_cast %289 : vector<1x64x64xf32> to vector<64x64xf32>
    %cst_269 = arith.constant dense<0.000000e+00> : vector<8x64xf32>
    %291 = tpu.matmul %227, %290, %cst_269 {dimension_numbers = #tpu.dot_dimension_numbers<[1], [0], [0], [1], [0, 0, 1, 1], [], []>} : vector<8x64xf32>, vector<64x64xf32>, vector<8x64xf32> -> vector<8x64xf32>
    %292 = arith.addf %288, %291 : vector<8x64xf32>
    %293 = math.tanh %292 : vector<8x64xf32>
    %c4_270 = arith.constant 4 : index
    %c0_271 = arith.constant 0 : index
    %c0_272 = arith.constant 0 : index
    %294 = vector.load %arg3[%c4_270, %c0_271, %c0_272] : memref<7x64x64xf32, #tpu.memory_space<vmem>>, vector<1x64x64xf32>
    %295 = vector.shape_cast %294 : vector<1x64x64xf32> to vector<64x64xf32>
    %cst_273 = arith.constant dense<0.000000e+00> : vector<8x64xf32>
    %296 = tpu.matmul %227, %295, %cst_273 {dimension_numbers = #tpu.dot_dimension_numbers<[1], [0], [0], [1], [0, 0, 1, 1], [], []>} : vector<8x64xf32>, vector<64x64xf32>, vector<8x64xf32> -> vector<8x64xf32>
    %c5_274 = arith.constant 5 : index
    %c0_275 = arith.constant 0 : index
    %c0_276 = arith.constant 0 : index
    %297 = vector.load %arg5[%c5_274, %c0_275, %c0_276] : memref<8x1x64xf32, #tpu.memory_space<vmem>>, vector<1x1x64xf32>
    %298 = vector.shape_cast %297 : vector<1x1x64xf32> to vector<1x64xf32>
    %299 = vector.broadcast %298 : vector<1x64xf32> to vector<8x64xf32>
    %300 = arith.addf %296, %299 : vector<8x64xf32>
    %c5_277 = arith.constant 5 : index
    %c0_278 = arith.constant 0 : index
    %c0_279 = arith.constant 0 : index
    %301 = vector.load %arg4[%c5_277, %c0_278, %c0_279] : memref<8x64x64xf32, #tpu.memory_space<vmem>>, vector<1x64x64xf32>
    %302 = vector.shape_cast %301 : vector<1x64x64xf32> to vector<64x64xf32>
    %cst_280 = arith.constant dense<0.000000e+00> : vector<8x64xf32>
    %303 = tpu.matmul %239, %302, %cst_280 {dimension_numbers = #tpu.dot_dimension_numbers<[1], [0], [0], [1], [0, 0, 1, 1], [], []>} : vector<8x64xf32>, vector<64x64xf32>, vector<8x64xf32> -> vector<8x64xf32>
    %304 = arith.addf %300, %303 : vector<8x64xf32>
    %305 = math.tanh %304 : vector<8x64xf32>
    %c5_281 = arith.constant 5 : index
    %c0_282 = arith.constant 0 : index
    %c0_283 = arith.constant 0 : index
    %306 = vector.load %arg3[%c5_281, %c0_282, %c0_283] : memref<7x64x64xf32, #tpu.memory_space<vmem>>, vector<1x64x64xf32>
    %307 = vector.shape_cast %306 : vector<1x64x64xf32> to vector<64x64xf32>
    %cst_284 = arith.constant dense<0.000000e+00> : vector<8x64xf32>
    %308 = tpu.matmul %239, %307, %cst_284 {dimension_numbers = #tpu.dot_dimension_numbers<[1], [0], [0], [1], [0, 0, 1, 1], [], []>} : vector<8x64xf32>, vector<64x64xf32>, vector<8x64xf32> -> vector<8x64xf32>
    %c6_285 = arith.constant 6 : index
    %c0_286 = arith.constant 0 : index
    %c0_287 = arith.constant 0 : index
    %309 = vector.load %arg5[%c6_285, %c0_286, %c0_287] : memref<8x1x64xf32, #tpu.memory_space<vmem>>, vector<1x1x64xf32>
    %310 = vector.shape_cast %309 : vector<1x1x64xf32> to vector<1x64xf32>
    %311 = vector.broadcast %310 : vector<1x64xf32> to vector<8x64xf32>
    %312 = arith.addf %308, %311 : vector<8x64xf32>
    %c6_288 = arith.constant 6 : index
    %c0_289 = arith.constant 0 : index
    %c0_290 = arith.constant 0 : index
    %313 = vector.load %arg4[%c6_288, %c0_289, %c0_290] : memref<8x64x64xf32, #tpu.memory_space<vmem>>, vector<1x64x64xf32>
    %314 = vector.shape_cast %313 : vector<1x64x64xf32> to vector<64x64xf32>
    %cst_291 = arith.constant dense<0.000000e+00> : vector<8x64xf32>
    %315 = tpu.matmul %21, %314, %cst_291 {dimension_numbers = #tpu.dot_dimension_numbers<[1], [0], [0], [1], [0, 0, 1, 1], [], []>} : vector<8x64xf32>, vector<64x64xf32>, vector<8x64xf32> -> vector<8x64xf32>
    %316 = arith.addf %312, %315 : vector<8x64xf32>
    %317 = math.tanh %316 : vector<8x64xf32>
    %c56 = arith.constant 56 : index
    %c0_292 = arith.constant 0 : index
    %318 = vector.load %arg6[%c56, %c0_292] : memref<64x64xf32, #tpu.memory_space<vmem>>, vector<8x64xf32>
    %c0_293 = arith.constant 0 : index
    %c0_294 = arith.constant 0 : index
    %c0_295 = arith.constant 0 : index
    %319 = vector.load %arg4[%c0_293, %c0_294, %c0_295] : memref<8x64x64xf32, #tpu.memory_space<vmem>>, vector<1x64x64xf32>
    %320 = vector.shape_cast %319 : vector<1x64x64xf32> to vector<64x64xf32>
    %cst_296 = arith.constant dense<0.000000e+00> : vector<8x64xf32>
    %321 = tpu.matmul %245, %320, %cst_296 {dimension_numbers = #tpu.dot_dimension_numbers<[1], [0], [0], [1], [0, 0, 1, 1], [], []>} : vector<8x64xf32>, vector<64x64xf32>, vector<8x64xf32> -> vector<8x64xf32>
    %322 = arith.addf %318, %321 : vector<8x64xf32>
    %323 = math.tanh %322 : vector<8x64xf32>
    %c0_297 = arith.constant 0 : index
    %c0_298 = arith.constant 0 : index
    %c0_299 = arith.constant 0 : index
    %324 = vector.load %arg7[%c0_297, %c0_298, %c0_299] : memref<8x8x64xf32, #tpu.memory_space<vmem>>, vector<1x8x64xf32>
    %325 = vector.shape_cast %324 : vector<1x8x64xf32> to vector<8x64xf32>
    %326 = vector.shape_cast %323 : vector<8x64xf32> to vector<1x8x64xf32>
    tpu.vector_store %arg7[%c0_297, %c0_298, %c0_299], %326 {strides = array<i32>} : memref<8x8x64xf32, #tpu.memory_space<vmem>>, vector<1x8x64xf32>,
    %c0_300 = arith.constant 0 : index
    %c0_301 = arith.constant 0 : index
    %c0_302 = arith.constant 0 : index
    %327 = vector.load %arg3[%c0_300, %c0_301, %c0_302] : memref<7x64x64xf32, #tpu.memory_space<vmem>>, vector<1x64x64xf32>
    %328 = vector.shape_cast %327 : vector<1x64x64xf32> to vector<64x64xf32>
    %cst_303 = arith.constant dense<0.000000e+00> : vector<8x64xf32>
    %329 = tpu.matmul %245, %328, %cst_303 {dimension_numbers = #tpu.dot_dimension_numbers<[1], [0], [0], [1], [0, 0, 1, 1], [], []>} : vector<8x64xf32>, vector<64x64xf32>, vector<8x64xf32> -> vector<8x64xf32>
    %c1_304 = arith.constant 1 : index
    %c0_305 = arith.constant 0 : index
    %c0_306 = arith.constant 0 : index
    %330 = vector.load %arg5[%c1_304, %c0_305, %c0_306] : memref<8x1x64xf32, #tpu.memory_space<vmem>>, vector<1x1x64xf32>
    %331 = vector.shape_cast %330 : vector<1x1x64xf32> to vector<1x64xf32>
    %332 = vector.broadcast %331 : vector<1x64xf32> to vector<8x64xf32>
    %333 = arith.addf %329, %332 : vector<8x64xf32>
    %c1_307 = arith.constant 1 : index
    %c0_308 = arith.constant 0 : index
    %c0_309 = arith.constant 0 : index
    %334 = vector.load %arg4[%c1_307, %c0_308, %c0_309] : memref<8x64x64xf32, #tpu.memory_space<vmem>>, vector<1x64x64xf32>
    %335 = vector.shape_cast %334 : vector<1x64x64xf32> to vector<64x64xf32>
    %cst_310 = arith.constant dense<0.000000e+00> : vector<8x64xf32>
    %336 = tpu.matmul %257, %335, %cst_310 {dimension_numbers = #tpu.dot_dimension_numbers<[1], [0], [0], [1], [0, 0, 1, 1], [], []>} : vector<8x64xf32>, vector<64x64xf32>, vector<8x64xf32> -> vector<8x64xf32>
    %337 = arith.addf %333, %336 : vector<8x64xf32>
    %338 = math.tanh %337 : vector<8x64xf32>
    %c1_311 = arith.constant 1 : index
    %c0_312 = arith.constant 0 : index
    %c0_313 = arith.constant 0 : index
    %339 = vector.load %arg3[%c1_311, %c0_312, %c0_313] : memref<7x64x64xf32, #tpu.memory_space<vmem>>, vector<1x64x64xf32>
    %340 = vector.shape_cast %339 : vector<1x64x64xf32> to vector<64x64xf32>
    %cst_314 = arith.constant dense<0.000000e+00> : vector<8x64xf32>
    %341 = tpu.matmul %257, %340, %cst_314 {dimension_numbers = #tpu.dot_dimension_numbers<[1], [0], [0], [1], [0, 0, 1, 1], [], []>} : vector<8x64xf32>, vector<64x64xf32>, vector<8x64xf32> -> vector<8x64xf32>
    %c2_315 = arith.constant 2 : index
    %c0_316 = arith.constant 0 : index
    %c0_317 = arith.constant 0 : index
    %342 = vector.load %arg5[%c2_315, %c0_316, %c0_317] : memref<8x1x64xf32, #tpu.memory_space<vmem>>, vector<1x1x64xf32>
    %343 = vector.shape_cast %342 : vector<1x1x64xf32> to vector<1x64xf32>
    %344 = vector.broadcast %343 : vector<1x64xf32> to vector<8x64xf32>
    %345 = arith.addf %341, %344 : vector<8x64xf32>
    %c2_318 = arith.constant 2 : index
    %c0_319 = arith.constant 0 : index
    %c0_320 = arith.constant 0 : index
    %346 = vector.load %arg4[%c2_318, %c0_319, %c0_320] : memref<8x64x64xf32, #tpu.memory_space<vmem>>, vector<1x64x64xf32>
    %347 = vector.shape_cast %346 : vector<1x64x64xf32> to vector<64x64xf32>
    %cst_321 = arith.constant dense<0.000000e+00> : vector<8x64xf32>
    %348 = tpu.matmul %269, %347, %cst_321 {dimension_numbers = #tpu.dot_dimension_numbers<[1], [0], [0], [1], [0, 0, 1, 1], [], []>} : vector<8x64xf32>, vector<64x64xf32>, vector<8x64xf32> -> vector<8x64xf32>
    %349 = arith.addf %345, %348 : vector<8x64xf32>
    %350 = math.tanh %349 : vector<8x64xf32>
    %c2_322 = arith.constant 2 : index
    %c0_323 = arith.constant 0 : index
    %c0_324 = arith.constant 0 : index
    %351 = vector.load %arg3[%c2_322, %c0_323, %c0_324] : memref<7x64x64xf32, #tpu.memory_space<vmem>>, vector<1x64x64xf32>
    %352 = vector.shape_cast %351 : vector<1x64x64xf32> to vector<64x64xf32>
    %cst_325 = arith.constant dense<0.000000e+00> : vector<8x64xf32>
    %353 = tpu.matmul %269, %352, %cst_325 {dimension_numbers = #tpu.dot_dimension_numbers<[1], [0], [0], [1], [0, 0, 1, 1], [], []>} : vector<8x64xf32>, vector<64x64xf32>, vector<8x64xf32> -> vector<8x64xf32>
    %c3_326 = arith.constant 3 : index
    %c0_327 = arith.constant 0 : index
    %c0_328 = arith.constant 0 : index
    %354 = vector.load %arg5[%c3_326, %c0_327, %c0_328] : memref<8x1x64xf32, #tpu.memory_space<vmem>>, vector<1x1x64xf32>
    %355 = vector.shape_cast %354 : vector<1x1x64xf32> to vector<1x64xf32>
    %356 = vector.broadcast %355 : vector<1x64xf32> to vector<8x64xf32>
    %357 = arith.addf %353, %356 : vector<8x64xf32>
    %c3_329 = arith.constant 3 : index
    %c0_330 = arith.constant 0 : index
    %c0_331 = arith.constant 0 : index
    %358 = vector.load %arg4[%c3_329, %c0_330, %c0_331] : memref<8x64x64xf32, #tpu.memory_space<vmem>>, vector<1x64x64xf32>
    %359 = vector.shape_cast %358 : vector<1x64x64xf32> to vector<64x64xf32>
    %cst_332 = arith.constant dense<0.000000e+00> : vector<8x64xf32>
    %360 = tpu.matmul %281, %359, %cst_332 {dimension_numbers = #tpu.dot_dimension_numbers<[1], [0], [0], [1], [0, 0, 1, 1], [], []>} : vector<8x64xf32>, vector<64x64xf32>, vector<8x64xf32> -> vector<8x64xf32>
    %361 = arith.addf %357, %360 : vector<8x64xf32>
    %362 = math.tanh %361 : vector<8x64xf32>
    %c3_333 = arith.constant 3 : index
    %c0_334 = arith.constant 0 : index
    %c0_335 = arith.constant 0 : index
    %363 = vector.load %arg3[%c3_333, %c0_334, %c0_335] : memref<7x64x64xf32, #tpu.memory_space<vmem>>, vector<1x64x64xf32>
    %364 = vector.shape_cast %363 : vector<1x64x64xf32> to vector<64x64xf32>
    %cst_336 = arith.constant dense<0.000000e+00> : vector<8x64xf32>
    %365 = tpu.matmul %281, %364, %cst_336 {dimension_numbers = #tpu.dot_dimension_numbers<[1], [0], [0], [1], [0, 0, 1, 1], [], []>} : vector<8x64xf32>, vector<64x64xf32>, vector<8x64xf32> -> vector<8x64xf32>
    %c4_337 = arith.constant 4 : index
    %c0_338 = arith.constant 0 : index
    %c0_339 = arith.constant 0 : index
    %366 = vector.load %arg5[%c4_337, %c0_338, %c0_339] : memref<8x1x64xf32, #tpu.memory_space<vmem>>, vector<1x1x64xf32>
    %367 = vector.shape_cast %366 : vector<1x1x64xf32> to vector<1x64xf32>
    %368 = vector.broadcast %367 : vector<1x64xf32> to vector<8x64xf32>
    %369 = arith.addf %365, %368 : vector<8x64xf32>
    %c4_340 = arith.constant 4 : index
    %c0_341 = arith.constant 0 : index
    %c0_342 = arith.constant 0 : index
    %370 = vector.load %arg4[%c4_340, %c0_341, %c0_342] : memref<8x64x64xf32, #tpu.memory_space<vmem>>, vector<1x64x64xf32>
    %371 = vector.shape_cast %370 : vector<1x64x64xf32> to vector<64x64xf32>
    %cst_343 = arith.constant dense<0.000000e+00> : vector<8x64xf32>
    %372 = tpu.matmul %293, %371, %cst_343 {dimension_numbers = #tpu.dot_dimension_numbers<[1], [0], [0], [1], [0, 0, 1, 1], [], []>} : vector<8x64xf32>, vector<64x64xf32>, vector<8x64xf32> -> vector<8x64xf32>
    %373 = arith.addf %369, %372 : vector<8x64xf32>
    %374 = math.tanh %373 : vector<8x64xf32>
    %c4_344 = arith.constant 4 : index
    %c0_345 = arith.constant 0 : index
    %c0_346 = arith.constant 0 : index
    %375 = vector.load %arg3[%c4_344, %c0_345, %c0_346] : memref<7x64x64xf32, #tpu.memory_space<vmem>>, vector<1x64x64xf32>
    %376 = vector.shape_cast %375 : vector<1x64x64xf32> to vector<64x64xf32>
    %cst_347 = arith.constant dense<0.000000e+00> : vector<8x64xf32>
    %377 = tpu.matmul %293, %376, %cst_347 {dimension_numbers = #tpu.dot_dimension_numbers<[1], [0], [0], [1], [0, 0, 1, 1], [], []>} : vector<8x64xf32>, vector<64x64xf32>, vector<8x64xf32> -> vector<8x64xf32>
    %c5_348 = arith.constant 5 : index
    %c0_349 = arith.constant 0 : index
    %c0_350 = arith.constant 0 : index
    %378 = vector.load %arg5[%c5_348, %c0_349, %c0_350] : memref<8x1x64xf32, #tpu.memory_space<vmem>>, vector<1x1x64xf32>
    %379 = vector.shape_cast %378 : vector<1x1x64xf32> to vector<1x64xf32>
    %380 = vector.broadcast %379 : vector<1x64xf32> to vector<8x64xf32>
    %381 = arith.addf %377, %380 : vector<8x64xf32>
    %c5_351 = arith.constant 5 : index
    %c0_352 = arith.constant 0 : index
    %c0_353 = arith.constant 0 : index
    %382 = vector.load %arg4[%c5_351, %c0_352, %c0_353] : memref<8x64x64xf32, #tpu.memory_space<vmem>>, vector<1x64x64xf32>
    %383 = vector.shape_cast %382 : vector<1x64x64xf32> to vector<64x64xf32>
    %cst_354 = arith.constant dense<0.000000e+00> : vector<8x64xf32>
    %384 = tpu.matmul %305, %383, %cst_354 {dimension_numbers = #tpu.dot_dimension_numbers<[1], [0], [0], [1], [0, 0, 1, 1], [], []>} : vector<8x64xf32>, vector<64x64xf32>, vector<8x64xf32> -> vector<8x64xf32>
    %385 = arith.addf %381, %384 : vector<8x64xf32>
    %386 = math.tanh %385 : vector<8x64xf32>
    %c5_355 = arith.constant 5 : index
    %c0_356 = arith.constant 0 : index
    %c0_357 = arith.constant 0 : index
    %387 = vector.load %arg3[%c5_355, %c0_356, %c0_357] : memref<7x64x64xf32, #tpu.memory_space<vmem>>, vector<1x64x64xf32>
    %388 = vector.shape_cast %387 : vector<1x64x64xf32> to vector<64x64xf32>
    %cst_358 = arith.constant dense<0.000000e+00> : vector<8x64xf32>
    %389 = tpu.matmul %305, %388, %cst_358 {dimension_numbers = #tpu.dot_dimension_numbers<[1], [0], [0], [1], [0, 0, 1, 1], [], []>} : vector<8x64xf32>, vector<64x64xf32>, vector<8x64xf32> -> vector<8x64xf32>
    %c6_359 = arith.constant 6 : index
    %c0_360 = arith.constant 0 : index
    %c0_361 = arith.constant 0 : index
    %390 = vector.load %arg5[%c6_359, %c0_360, %c0_361] : memref<8x1x64xf32, #tpu.memory_space<vmem>>, vector<1x1x64xf32>
    %391 = vector.shape_cast %390 : vector<1x1x64xf32> to vector<1x64xf32>
    %392 = vector.broadcast %391 : vector<1x64xf32> to vector<8x64xf32>
    %393 = arith.addf %389, %392 : vector<8x64xf32>
    %c6_362 = arith.constant 6 : index
    %c0_363 = arith.constant 0 : index
    %c0_364 = arith.constant 0 : index
    %394 = vector.load %arg4[%c6_362, %c0_363, %c0_364] : memref<8x64x64xf32, #tpu.memory_space<vmem>>, vector<1x64x64xf32>
    %395 = vector.shape_cast %394 : vector<1x64x64xf32> to vector<64x64xf32>
    %cst_365 = arith.constant dense<0.000000e+00> : vector<8x64xf32>
    %396 = tpu.matmul %317, %395, %cst_365 {dimension_numbers = #tpu.dot_dimension_numbers<[1], [0], [0], [1], [0, 0, 1, 1], [], []>} : vector<8x64xf32>, vector<64x64xf32>, vector<8x64xf32> -> vector<8x64xf32>
    %397 = arith.addf %393, %396 : vector<8x64xf32>
    %398 = math.tanh %397 : vector<8x64xf32>
    %c6_366 = arith.constant 6 : index
    %c0_367 = arith.constant 0 : index
    %c0_368 = arith.constant 0 : index
    %399 = vector.load %arg3[%c6_366, %c0_367, %c0_368] : memref<7x64x64xf32, #tpu.memory_space<vmem>>, vector<1x64x64xf32>
    %400 = vector.shape_cast %399 : vector<1x64x64xf32> to vector<64x64xf32>
    %cst_369 = arith.constant dense<0.000000e+00> : vector<8x64xf32>
    %401 = tpu.matmul %317, %400, %cst_369 {dimension_numbers = #tpu.dot_dimension_numbers<[1], [0], [0], [1], [0, 0, 1, 1], [], []>} : vector<8x64xf32>, vector<64x64xf32>, vector<8x64xf32> -> vector<8x64xf32>
    %c7_370 = arith.constant 7 : index
    %c0_371 = arith.constant 0 : index
    %c0_372 = arith.constant 0 : index
    %402 = vector.load %arg5[%c7_370, %c0_371, %c0_372] : memref<8x1x64xf32, #tpu.memory_space<vmem>>, vector<1x1x64xf32>
    %403 = vector.shape_cast %402 : vector<1x1x64xf32> to vector<1x64xf32>
    %404 = vector.broadcast %403 : vector<1x64xf32> to vector<8x64xf32>
    %405 = arith.addf %401, %404 : vector<8x64xf32>
    %c7_373 = arith.constant 7 : index
    %c0_374 = arith.constant 0 : index
    %c0_375 = arith.constant 0 : index
    %406 = vector.load %arg4[%c7_373, %c0_374, %c0_375] : memref<8x64x64xf32, #tpu.memory_space<vmem>>, vector<1x64x64xf32>
    %407 = vector.shape_cast %406 : vector<1x64x64xf32> to vector<64x64xf32>
    %cst_376 = arith.constant dense<0.000000e+00> : vector<8x64xf32>
    %408 = tpu.matmul %23, %407, %cst_376 {dimension_numbers = #tpu.dot_dimension_numbers<[1], [0], [0], [1], [0, 0, 1, 1], [], []>} : vector<8x64xf32>, vector<64x64xf32>, vector<8x64xf32> -> vector<8x64xf32>
    %409 = arith.addf %405, %408 : vector<8x64xf32>
    %410 = math.tanh %409 : vector<8x64xf32>
    %c0_377 = arith.constant 0 : index
    %c0_378 = arith.constant 0 : index
    %411 = vector.load %arg6[%c0_377, %c0_378] : memref<64x64xf32, #tpu.memory_space<vmem>>, vector<8x64xf32>
    tpu.vector_store %arg6[%c0_377, %c0_378], %410 {strides = array<i32>} : memref<64x64xf32, #tpu.memory_space<vmem>>, vector<8x64xf32>,
    %c0_379 = arith.constant 0 : index
    %c0_380 = arith.constant 0 : index
    %c0_381 = arith.constant 0 : index
    %412 = vector.load %arg3[%c0_379, %c0_380, %c0_381] : memref<7x64x64xf32, #tpu.memory_space<vmem>>, vector<1x64x64xf32>
    %413 = vector.shape_cast %412 : vector<1x64x64xf32> to vector<64x64xf32>
    %cst_382 = arith.constant dense<0.000000e+00> : vector<8x64xf32>
    %414 = tpu.matmul %323, %413, %cst_382 {dimension_numbers = #tpu.dot_dimension_numbers<[1], [0], [0], [1], [0, 0, 1, 1], [], []>} : vector<8x64xf32>, vector<64x64xf32>, vector<8x64xf32> -> vector<8x64xf32>
    %c1_383 = arith.constant 1 : index
    %c0_384 = arith.constant 0 : index
    %c0_385 = arith.constant 0 : index
    %415 = vector.load %arg5[%c1_383, %c0_384, %c0_385] : memref<8x1x64xf32, #tpu.memory_space<vmem>>, vector<1x1x64xf32>
    %416 = vector.shape_cast %415 : vector<1x1x64xf32> to vector<1x64xf32>
    %417 = vector.broadcast %416 : vector<1x64xf32> to vector<8x64xf32>
    %418 = arith.addf %414, %417 : vector<8x64xf32>
    %c1_386 = arith.constant 1 : index
    %c0_387 = arith.constant 0 : index
    %c0_388 = arith.constant 0 : index
    %419 = vector.load %arg4[%c1_386, %c0_387, %c0_388] : memref<8x64x64xf32, #tpu.memory_space<vmem>>, vector<1x64x64xf32>
    %420 = vector.shape_cast %419 : vector<1x64x64xf32> to vector<64x64xf32>
    %cst_389 = arith.constant dense<0.000000e+00> : vector<8x64xf32>
    %421 = tpu.matmul %338, %420, %cst_389 {dimension_numbers = #tpu.dot_dimension_numbers<[1], [0], [0], [1], [0, 0, 1, 1], [], []>} : vector<8x64xf32>, vector<64x64xf32>, vector<8x64xf32> -> vector<8x64xf32>
    %422 = arith.addf %418, %421 : vector<8x64xf32>
    %423 = math.tanh %422 : vector<8x64xf32>
    %c1_390 = arith.constant 1 : index
    %c0_391 = arith.constant 0 : index
    %c0_392 = arith.constant 0 : index
    %424 = vector.load %arg7[%c1_390, %c0_391, %c0_392] : memref<8x8x64xf32, #tpu.memory_space<vmem>>, vector<1x8x64xf32>
    %425 = vector.shape_cast %424 : vector<1x8x64xf32> to vector<8x64xf32>
    %426 = vector.shape_cast %423 : vector<8x64xf32> to vector<1x8x64xf32>
    tpu.vector_store %arg7[%c1_390, %c0_391, %c0_392], %426 {strides = array<i32>} : memref<8x8x64xf32, #tpu.memory_space<vmem>>, vector<1x8x64xf32>,
    %c1_393 = arith.constant 1 : index
    %c0_394 = arith.constant 0 : index
    %c0_395 = arith.constant 0 : index
    %427 = vector.load %arg3[%c1_393, %c0_394, %c0_395] : memref<7x64x64xf32, #tpu.memory_space<vmem>>, vector<1x64x64xf32>
    %428 = vector.shape_cast %427 : vector<1x64x64xf32> to vector<64x64xf32>
    %cst_396 = arith.constant dense<0.000000e+00> : vector<8x64xf32>
    %429 = tpu.matmul %338, %428, %cst_396 {dimension_numbers = #tpu.dot_dimension_numbers<[1], [0], [0], [1], [0, 0, 1, 1], [], []>} : vector<8x64xf32>, vector<64x64xf32>, vector<8x64xf32> -> vector<8x64xf32>
    %c2_397 = arith.constant 2 : index
    %c0_398 = arith.constant 0 : index
    %c0_399 = arith.constant 0 : index
    %430 = vector.load %arg5[%c2_397, %c0_398, %c0_399] : memref<8x1x64xf32, #tpu.memory_space<vmem>>, vector<1x1x64xf32>
    %431 = vector.shape_cast %430 : vector<1x1x64xf32> to vector<1x64xf32>
    %432 = vector.broadcast %431 : vector<1x64xf32> to vector<8x64xf32>
    %433 = arith.addf %429, %432 : vector<8x64xf32>
    %c2_400 = arith.constant 2 : index
    %c0_401 = arith.constant 0 : index
    %c0_402 = arith.constant 0 : index
    %434 = vector.load %arg4[%c2_400, %c0_401, %c0_402] : memref<8x64x64xf32, #tpu.memory_space<vmem>>, vector<1x64x64xf32>
    %435 = vector.shape_cast %434 : vector<1x64x64xf32> to vector<64x64xf32>
    %cst_403 = arith.constant dense<0.000000e+00> : vector<8x64xf32>
    %436 = tpu.matmul %350, %435, %cst_403 {dimension_numbers = #tpu.dot_dimension_numbers<[1], [0], [0], [1], [0, 0, 1, 1], [], []>} : vector<8x64xf32>, vector<64x64xf32>, vector<8x64xf32> -> vector<8x64xf32>
    %437 = arith.addf %433, %436 : vector<8x64xf32>
    %438 = math.tanh %437 : vector<8x64xf32>
    %c2_404 = arith.constant 2 : index
    %c0_405 = arith.constant 0 : index
    %c0_406 = arith.constant 0 : index
    %439 = vector.load %arg3[%c2_404, %c0_405, %c0_406] : memref<7x64x64xf32, #tpu.memory_space<vmem>>, vector<1x64x64xf32>
    %440 = vector.shape_cast %439 : vector<1x64x64xf32> to vector<64x64xf32>
    %cst_407 = arith.constant dense<0.000000e+00> : vector<8x64xf32>
    %441 = tpu.matmul %350, %440, %cst_407 {dimension_numbers = #tpu.dot_dimension_numbers<[1], [0], [0], [1], [0, 0, 1, 1], [], []>} : vector<8x64xf32>, vector<64x64xf32>, vector<8x64xf32> -> vector<8x64xf32>
    %c3_408 = arith.constant 3 : index
    %c0_409 = arith.constant 0 : index
    %c0_410 = arith.constant 0 : index
    %442 = vector.load %arg5[%c3_408, %c0_409, %c0_410] : memref<8x1x64xf32, #tpu.memory_space<vmem>>, vector<1x1x64xf32>
    %443 = vector.shape_cast %442 : vector<1x1x64xf32> to vector<1x64xf32>
    %444 = vector.broadcast %443 : vector<1x64xf32> to vector<8x64xf32>
    %445 = arith.addf %441, %444 : vector<8x64xf32>
    %c3_411 = arith.constant 3 : index
    %c0_412 = arith.constant 0 : index
    %c0_413 = arith.constant 0 : index
    %446 = vector.load %arg4[%c3_411, %c0_412, %c0_413] : memref<8x64x64xf32, #tpu.memory_space<vmem>>, vector<1x64x64xf32>
    %447 = vector.shape_cast %446 : vector<1x64x64xf32> to vector<64x64xf32>
    %cst_414 = arith.constant dense<0.000000e+00> : vector<8x64xf32>
    %448 = tpu.matmul %362, %447, %cst_414 {dimension_numbers = #tpu.dot_dimension_numbers<[1], [0], [0], [1], [0, 0, 1, 1], [], []>} : vector<8x64xf32>, vector<64x64xf32>, vector<8x64xf32> -> vector<8x64xf32>
    %449 = arith.addf %445, %448 : vector<8x64xf32>
    %450 = math.tanh %449 : vector<8x64xf32>
    %c3_415 = arith.constant 3 : index
    %c0_416 = arith.constant 0 : index
    %c0_417 = arith.constant 0 : index
    %451 = vector.load %arg3[%c3_415, %c0_416, %c0_417] : memref<7x64x64xf32, #tpu.memory_space<vmem>>, vector<1x64x64xf32>
    %452 = vector.shape_cast %451 : vector<1x64x64xf32> to vector<64x64xf32>
    %cst_418 = arith.constant dense<0.000000e+00> : vector<8x64xf32>
    %453 = tpu.matmul %362, %452, %cst_418 {dimension_numbers = #tpu.dot_dimension_numbers<[1], [0], [0], [1], [0, 0, 1, 1], [], []>} : vector<8x64xf32>, vector<64x64xf32>, vector<8x64xf32> -> vector<8x64xf32>
    %c4_419 = arith.constant 4 : index
    %c0_420 = arith.constant 0 : index
    %c0_421 = arith.constant 0 : index
    %454 = vector.load %arg5[%c4_419, %c0_420, %c0_421] : memref<8x1x64xf32, #tpu.memory_space<vmem>>, vector<1x1x64xf32>
    %455 = vector.shape_cast %454 : vector<1x1x64xf32> to vector<1x64xf32>
    %456 = vector.broadcast %455 : vector<1x64xf32> to vector<8x64xf32>
    %457 = arith.addf %453, %456 : vector<8x64xf32>
    %c4_422 = arith.constant 4 : index
    %c0_423 = arith.constant 0 : index
    %c0_424 = arith.constant 0 : index
    %458 = vector.load %arg4[%c4_422, %c0_423, %c0_424] : memref<8x64x64xf32, #tpu.memory_space<vmem>>, vector<1x64x64xf32>
    %459 = vector.shape_cast %458 : vector<1x64x64xf32> to vector<64x64xf32>
    %cst_425 = arith.constant dense<0.000000e+00> : vector<8x64xf32>
    %460 = tpu.matmul %374, %459, %cst_425 {dimension_numbers = #tpu.dot_dimension_numbers<[1], [0], [0], [1], [0, 0, 1, 1], [], []>} : vector<8x64xf32>, vector<64x64xf32>, vector<8x64xf32> -> vector<8x64xf32>
    %461 = arith.addf %457, %460 : vector<8x64xf32>
    %462 = math.tanh %461 : vector<8x64xf32>
    %c4_426 = arith.constant 4 : index
    %c0_427 = arith.constant 0 : index
    %c0_428 = arith.constant 0 : index
    %463 = vector.load %arg3[%c4_426, %c0_427, %c0_428] : memref<7x64x64xf32, #tpu.memory_space<vmem>>, vector<1x64x64xf32>
    %464 = vector.shape_cast %463 : vector<1x64x64xf32> to vector<64x64xf32>
    %cst_429 = arith.constant dense<0.000000e+00> : vector<8x64xf32>
    %465 = tpu.matmul %374, %464, %cst_429 {dimension_numbers = #tpu.dot_dimension_numbers<[1], [0], [0], [1], [0, 0, 1, 1], [], []>} : vector<8x64xf32>, vector<64x64xf32>, vector<8x64xf32> -> vector<8x64xf32>
    %c5_430 = arith.constant 5 : index
    %c0_431 = arith.constant 0 : index
    %c0_432 = arith.constant 0 : index
    %466 = vector.load %arg5[%c5_430, %c0_431, %c0_432] : memref<8x1x64xf32, #tpu.memory_space<vmem>>, vector<1x1x64xf32>
    %467 = vector.shape_cast %466 : vector<1x1x64xf32> to vector<1x64xf32>
    %468 = vector.broadcast %467 : vector<1x64xf32> to vector<8x64xf32>
    %469 = arith.addf %465, %468 : vector<8x64xf32>
    %c5_433 = arith.constant 5 : index
    %c0_434 = arith.constant 0 : index
    %c0_435 = arith.constant 0 : index
    %470 = vector.load %arg4[%c5_433, %c0_434, %c0_435] : memref<8x64x64xf32, #tpu.memory_space<vmem>>, vector<1x64x64xf32>
    %471 = vector.shape_cast %470 : vector<1x64x64xf32> to vector<64x64xf32>
    %cst_436 = arith.constant dense<0.000000e+00> : vector<8x64xf32>
    %472 = tpu.matmul %386, %471, %cst_436 {dimension_numbers = #tpu.dot_dimension_numbers<[1], [0], [0], [1], [0, 0, 1, 1], [], []>} : vector<8x64xf32>, vector<64x64xf32>, vector<8x64xf32> -> vector<8x64xf32>
    %473 = arith.addf %469, %472 : vector<8x64xf32>
    %474 = math.tanh %473 : vector<8x64xf32>
    %c5_437 = arith.constant 5 : index
    %c0_438 = arith.constant 0 : index
    %c0_439 = arith.constant 0 : index
    %475 = vector.load %arg3[%c5_437, %c0_438, %c0_439] : memref<7x64x64xf32, #tpu.memory_space<vmem>>, vector<1x64x64xf32>
    %476 = vector.shape_cast %475 : vector<1x64x64xf32> to vector<64x64xf32>
    %cst_440 = arith.constant dense<0.000000e+00> : vector<8x64xf32>
    %477 = tpu.matmul %386, %476, %cst_440 {dimension_numbers = #tpu.dot_dimension_numbers<[1], [0], [0], [1], [0, 0, 1, 1], [], []>} : vector<8x64xf32>, vector<64x64xf32>, vector<8x64xf32> -> vector<8x64xf32>
    %c6_441 = arith.constant 6 : index
    %c0_442 = arith.constant 0 : index
    %c0_443 = arith.constant 0 : index
    %478 = vector.load %arg5[%c6_441, %c0_442, %c0_443] : memref<8x1x64xf32, #tpu.memory_space<vmem>>, vector<1x1x64xf32>
    %479 = vector.shape_cast %478 : vector<1x1x64xf32> to vector<1x64xf32>
    %480 = vector.broadcast %479 : vector<1x64xf32> to vector<8x64xf32>
    %481 = arith.addf %477, %480 : vector<8x64xf32>
    %c6_444 = arith.constant 6 : index
    %c0_445 = arith.constant 0 : index
    %c0_446 = arith.constant 0 : index
    %482 = vector.load %arg4[%c6_444, %c0_445, %c0_446] : memref<8x64x64xf32, #tpu.memory_space<vmem>>, vector<1x64x64xf32>
    %483 = vector.shape_cast %482 : vector<1x64x64xf32> to vector<64x64xf32>
    %cst_447 = arith.constant dense<0.000000e+00> : vector<8x64xf32>
    %484 = tpu.matmul %398, %483, %cst_447 {dimension_numbers = #tpu.dot_dimension_numbers<[1], [0], [0], [1], [0, 0, 1, 1], [], []>} : vector<8x64xf32>, vector<64x64xf32>, vector<8x64xf32> -> vector<8x64xf32>
    %485 = arith.addf %481, %484 : vector<8x64xf32>
    %486 = math.tanh %485 : vector<8x64xf32>
    %c6_448 = arith.constant 6 : index
    %c0_449 = arith.constant 0 : index
    %c0_450 = arith.constant 0 : index
    %487 = vector.load %arg3[%c6_448, %c0_449, %c0_450] : memref<7x64x64xf32, #tpu.memory_space<vmem>>, vector<1x64x64xf32>
    %488 = vector.shape_cast %487 : vector<1x64x64xf32> to vector<64x64xf32>
    %cst_451 = arith.constant dense<0.000000e+00> : vector<8x64xf32>
    %489 = tpu.matmul %398, %488, %cst_451 {dimension_numbers = #tpu.dot_dimension_numbers<[1], [0], [0], [1], [0, 0, 1, 1], [], []>} : vector<8x64xf32>, vector<64x64xf32>, vector<8x64xf32> -> vector<8x64xf32>
    %c7_452 = arith.constant 7 : index
    %c0_453 = arith.constant 0 : index
    %c0_454 = arith.constant 0 : index
    %490 = vector.load %arg5[%c7_452, %c0_453, %c0_454] : memref<8x1x64xf32, #tpu.memory_space<vmem>>, vector<1x1x64xf32>
    %491 = vector.shape_cast %490 : vector<1x1x64xf32> to vector<1x64xf32>
    %492 = vector.broadcast %491 : vector<1x64xf32> to vector<8x64xf32>
    %493 = arith.addf %489, %492 : vector<8x64xf32>
    %c7_455 = arith.constant 7 : index
    %c0_456 = arith.constant 0 : index
    %c0_457 = arith.constant 0 : index
    %494 = vector.load %arg4[%c7_455, %c0_456, %c0_457] : memref<8x64x64xf32, #tpu.memory_space<vmem>>, vector<1x64x64xf32>
    %495 = vector.shape_cast %494 : vector<1x64x64xf32> to vector<64x64xf32>
    %cst_458 = arith.constant dense<0.000000e+00> : vector<8x64xf32>
    %496 = tpu.matmul %410, %495, %cst_458 {dimension_numbers = #tpu.dot_dimension_numbers<[1], [0], [0], [1], [0, 0, 1, 1], [], []>} : vector<8x64xf32>, vector<64x64xf32>, vector<8x64xf32> -> vector<8x64xf32>
    %497 = arith.addf %493, %496 : vector<8x64xf32>
    %498 = math.tanh %497 : vector<8x64xf32>
    %c8_459 = arith.constant 8 : index
    %c0_460 = arith.constant 0 : index
    %499 = vector.load %arg6[%c8_459, %c0_460] : memref<64x64xf32, #tpu.memory_space<vmem>>, vector<8x64xf32>
    tpu.vector_store %arg6[%c8_459, %c0_460], %498 {strides = array<i32>} : memref<64x64xf32, #tpu.memory_space<vmem>>, vector<8x64xf32>,
    %c1_461 = arith.constant 1 : index
    %c0_462 = arith.constant 0 : index
    %c0_463 = arith.constant 0 : index
    %500 = vector.load %arg3[%c1_461, %c0_462, %c0_463] : memref<7x64x64xf32, #tpu.memory_space<vmem>>, vector<1x64x64xf32>
    %501 = vector.shape_cast %500 : vector<1x64x64xf32> to vector<64x64xf32>
    %cst_464 = arith.constant dense<0.000000e+00> : vector<8x64xf32>
    %502 = tpu.matmul %423, %501, %cst_464 {dimension_numbers = #tpu.dot_dimension_numbers<[1], [0], [0], [1], [0, 0, 1, 1], [], []>} : vector<8x64xf32>, vector<64x64xf32>, vector<8x64xf32> -> vector<8x64xf32>
    %c2_465 = arith.constant 2 : index
    %c0_466 = arith.constant 0 : index
    %c0_467 = arith.constant 0 : index
    %503 = vector.load %arg5[%c2_465, %c0_466, %c0_467] : memref<8x1x64xf32, #tpu.memory_space<vmem>>, vector<1x1x64xf32>
    %504 = vector.shape_cast %503 : vector<1x1x64xf32> to vector<1x64xf32>
    %505 = vector.broadcast %504 : vector<1x64xf32> to vector<8x64xf32>
    %506 = arith.addf %502, %505 : vector<8x64xf32>
    %c2_468 = arith.constant 2 : index
    %c0_469 = arith.constant 0 : index
    %c0_470 = arith.constant 0 : index
    %507 = vector.load %arg4[%c2_468, %c0_469, %c0_470] : memref<8x64x64xf32, #tpu.memory_space<vmem>>, vector<1x64x64xf32>
    %508 = vector.shape_cast %507 : vector<1x64x64xf32> to vector<64x64xf32>
    %cst_471 = arith.constant dense<0.000000e+00> : vector<8x64xf32>
    %509 = tpu.matmul %438, %508, %cst_471 {dimension_numbers = #tpu.dot_dimension_numbers<[1], [0], [0], [1], [0, 0, 1, 1], [], []>} : vector<8x64xf32>, vector<64x64xf32>, vector<8x64xf32> -> vector<8x64xf32>
    %510 = arith.addf %506, %509 : vector<8x64xf32>
    %511 = math.tanh %510 : vector<8x64xf32>
    %c2_472 = arith.constant 2 : index
    %c0_473 = arith.constant 0 : index
    %c0_474 = arith.constant 0 : index
    %512 = vector.load %arg7[%c2_472, %c0_473, %c0_474] : memref<8x8x64xf32, #tpu.memory_space<vmem>>, vector<1x8x64xf32>
    %513 = vector.shape_cast %512 : vector<1x8x64xf32> to vector<8x64xf32>
    %514 = vector.shape_cast %511 : vector<8x64xf32> to vector<1x8x64xf32>
    tpu.vector_store %arg7[%c2_472, %c0_473, %c0_474], %514 {strides = array<i32>} : memref<8x8x64xf32, #tpu.memory_space<vmem>>, vector<1x8x64xf32>,
    %c2_475 = arith.constant 2 : index
    %c0_476 = arith.constant 0 : index
    %c0_477 = arith.constant 0 : index
    %515 = vector.load %arg3[%c2_475, %c0_476, %c0_477] : memref<7x64x64xf32, #tpu.memory_space<vmem>>, vector<1x64x64xf32>
    %516 = vector.shape_cast %515 : vector<1x64x64xf32> to vector<64x64xf32>
    %cst_478 = arith.constant dense<0.000000e+00> : vector<8x64xf32>
    %517 = tpu.matmul %438, %516, %cst_478 {dimension_numbers = #tpu.dot_dimension_numbers<[1], [0], [0], [1], [0, 0, 1, 1], [], []>} : vector<8x64xf32>, vector<64x64xf32>, vector<8x64xf32> -> vector<8x64xf32>
    %c3_479 = arith.constant 3 : index
    %c0_480 = arith.constant 0 : index
    %c0_481 = arith.constant 0 : index
    %518 = vector.load %arg5[%c3_479, %c0_480, %c0_481] : memref<8x1x64xf32, #tpu.memory_space<vmem>>, vector<1x1x64xf32>
    %519 = vector.shape_cast %518 : vector<1x1x64xf32> to vector<1x64xf32>
    %520 = vector.broadcast %519 : vector<1x64xf32> to vector<8x64xf32>
    %521 = arith.addf %517, %520 : vector<8x64xf32>
    %c3_482 = arith.constant 3 : index
    %c0_483 = arith.constant 0 : index
    %c0_484 = arith.constant 0 : index
    %522 = vector.load %arg4[%c3_482, %c0_483, %c0_484] : memref<8x64x64xf32, #tpu.memory_space<vmem>>, vector<1x64x64xf32>
    %523 = vector.shape_cast %522 : vector<1x64x64xf32> to vector<64x64xf32>
    %cst_485 = arith.constant dense<0.000000e+00> : vector<8x64xf32>
    %524 = tpu.matmul %450, %523, %cst_485 {dimension_numbers = #tpu.dot_dimension_numbers<[1], [0], [0], [1], [0, 0, 1, 1], [], []>} : vector<8x64xf32>, vector<64x64xf32>, vector<8x64xf32> -> vector<8x64xf32>
    %525 = arith.addf %521, %524 : vector<8x64xf32>
    %526 = math.tanh %525 : vector<8x64xf32>
    %c3_486 = arith.constant 3 : index
    %c0_487 = arith.constant 0 : index
    %c0_488 = arith.constant 0 : index
    %527 = vector.load %arg3[%c3_486, %c0_487, %c0_488] : memref<7x64x64xf32, #tpu.memory_space<vmem>>, vector<1x64x64xf32>
    %528 = vector.shape_cast %527 : vector<1x64x64xf32> to vector<64x64xf32>
    %cst_489 = arith.constant dense<0.000000e+00> : vector<8x64xf32>
    %529 = tpu.matmul %450, %528, %cst_489 {dimension_numbers = #tpu.dot_dimension_numbers<[1], [0], [0], [1], [0, 0, 1, 1], [], []>} : vector<8x64xf32>, vector<64x64xf32>, vector<8x64xf32> -> vector<8x64xf32>
    %c4_490 = arith.constant 4 : index
    %c0_491 = arith.constant 0 : index
    %c0_492 = arith.constant 0 : index
    %530 = vector.load %arg5[%c4_490, %c0_491, %c0_492] : memref<8x1x64xf32, #tpu.memory_space<vmem>>, vector<1x1x64xf32>
    %531 = vector.shape_cast %530 : vector<1x1x64xf32> to vector<1x64xf32>
    %532 = vector.broadcast %531 : vector<1x64xf32> to vector<8x64xf32>
    %533 = arith.addf %529, %532 : vector<8x64xf32>
    %c4_493 = arith.constant 4 : index
    %c0_494 = arith.constant 0 : index
    %c0_495 = arith.constant 0 : index
    %534 = vector.load %arg4[%c4_493, %c0_494, %c0_495] : memref<8x64x64xf32, #tpu.memory_space<vmem>>, vector<1x64x64xf32>
    %535 = vector.shape_cast %534 : vector<1x64x64xf32> to vector<64x64xf32>
    %cst_496 = arith.constant dense<0.000000e+00> : vector<8x64xf32>
    %536 = tpu.matmul %462, %535, %cst_496 {dimension_numbers = #tpu.dot_dimension_numbers<[1], [0], [0], [1], [0, 0, 1, 1], [], []>} : vector<8x64xf32>, vector<64x64xf32>, vector<8x64xf32> -> vector<8x64xf32>
    %537 = arith.addf %533, %536 : vector<8x64xf32>
    %538 = math.tanh %537 : vector<8x64xf32>
    %c4_497 = arith.constant 4 : index
    %c0_498 = arith.constant 0 : index
    %c0_499 = arith.constant 0 : index
    %539 = vector.load %arg3[%c4_497, %c0_498, %c0_499] : memref<7x64x64xf32, #tpu.memory_space<vmem>>, vector<1x64x64xf32>
    %540 = vector.shape_cast %539 : vector<1x64x64xf32> to vector<64x64xf32>
    %cst_500 = arith.constant dense<0.000000e+00> : vector<8x64xf32>
    %541 = tpu.matmul %462, %540, %cst_500 {dimension_numbers = #tpu.dot_dimension_numbers<[1], [0], [0], [1], [0, 0, 1, 1], [], []>} : vector<8x64xf32>, vector<64x64xf32>, vector<8x64xf32> -> vector<8x64xf32>
    %c5_501 = arith.constant 5 : index
    %c0_502 = arith.constant 0 : index
    %c0_503 = arith.constant 0 : index
    %542 = vector.load %arg5[%c5_501, %c0_502, %c0_503] : memref<8x1x64xf32, #tpu.memory_space<vmem>>, vector<1x1x64xf32>
    %543 = vector.shape_cast %542 : vector<1x1x64xf32> to vector<1x64xf32>
    %544 = vector.broadcast %543 : vector<1x64xf32> to vector<8x64xf32>
    %545 = arith.addf %541, %544 : vector<8x64xf32>
    %c5_504 = arith.constant 5 : index
    %c0_505 = arith.constant 0 : index
    %c0_506 = arith.constant 0 : index
    %546 = vector.load %arg4[%c5_504, %c0_505, %c0_506] : memref<8x64x64xf32, #tpu.memory_space<vmem>>, vector<1x64x64xf32>
    %547 = vector.shape_cast %546 : vector<1x64x64xf32> to vector<64x64xf32>
    %cst_507 = arith.constant dense<0.000000e+00> : vector<8x64xf32>
    %548 = tpu.matmul %474, %547, %cst_507 {dimension_numbers = #tpu.dot_dimension_numbers<[1], [0], [0], [1], [0, 0, 1, 1], [], []>} : vector<8x64xf32>, vector<64x64xf32>, vector<8x64xf32> -> vector<8x64xf32>
    %549 = arith.addf %545, %548 : vector<8x64xf32>
    %550 = math.tanh %549 : vector<8x64xf32>
    %c5_508 = arith.constant 5 : index
    %c0_509 = arith.constant 0 : index
    %c0_510 = arith.constant 0 : index
    %551 = vector.load %arg3[%c5_508, %c0_509, %c0_510] : memref<7x64x64xf32, #tpu.memory_space<vmem>>, vector<1x64x64xf32>
    %552 = vector.shape_cast %551 : vector<1x64x64xf32> to vector<64x64xf32>
    %cst_511 = arith.constant dense<0.000000e+00> : vector<8x64xf32>
    %553 = tpu.matmul %474, %552, %cst_511 {dimension_numbers = #tpu.dot_dimension_numbers<[1], [0], [0], [1], [0, 0, 1, 1], [], []>} : vector<8x64xf32>, vector<64x64xf32>, vector<8x64xf32> -> vector<8x64xf32>
    %c6_512 = arith.constant 6 : index
    %c0_513 = arith.constant 0 : index
    %c0_514 = arith.constant 0 : index
    %554 = vector.load %arg5[%c6_512, %c0_513, %c0_514] : memref<8x1x64xf32, #tpu.memory_space<vmem>>, vector<1x1x64xf32>
    %555 = vector.shape_cast %554 : vector<1x1x64xf32> to vector<1x64xf32>
    %556 = vector.broadcast %555 : vector<1x64xf32> to vector<8x64xf32>
    %557 = arith.addf %553, %556 : vector<8x64xf32>
    %c6_515 = arith.constant 6 : index
    %c0_516 = arith.constant 0 : index
    %c0_517 = arith.constant 0 : index
    %558 = vector.load %arg4[%c6_515, %c0_516, %c0_517] : memref<8x64x64xf32, #tpu.memory_space<vmem>>, vector<1x64x64xf32>
    %559 = vector.shape_cast %558 : vector<1x64x64xf32> to vector<64x64xf32>
    %cst_518 = arith.constant dense<0.000000e+00> : vector<8x64xf32>
    %560 = tpu.matmul %486, %559, %cst_518 {dimension_numbers = #tpu.dot_dimension_numbers<[1], [0], [0], [1], [0, 0, 1, 1], [], []>} : vector<8x64xf32>, vector<64x64xf32>, vector<8x64xf32> -> vector<8x64xf32>
    %561 = arith.addf %557, %560 : vector<8x64xf32>
    %562 = math.tanh %561 : vector<8x64xf32>
    %c6_519 = arith.constant 6 : index
    %c0_520 = arith.constant 0 : index
    %c0_521 = arith.constant 0 : index
    %563 = vector.load %arg3[%c6_519, %c0_520, %c0_521] : memref<7x64x64xf32, #tpu.memory_space<vmem>>, vector<1x64x64xf32>
    %564 = vector.shape_cast %563 : vector<1x64x64xf32> to vector<64x64xf32>
    %cst_522 = arith.constant dense<0.000000e+00> : vector<8x64xf32>
    %565 = tpu.matmul %486, %564, %cst_522 {dimension_numbers = #tpu.dot_dimension_numbers<[1], [0], [0], [1], [0, 0, 1, 1], [], []>} : vector<8x64xf32>, vector<64x64xf32>, vector<8x64xf32> -> vector<8x64xf32>
    %c7_523 = arith.constant 7 : index
    %c0_524 = arith.constant 0 : index
    %c0_525 = arith.constant 0 : index
    %566 = vector.load %arg5[%c7_523, %c0_524, %c0_525] : memref<8x1x64xf32, #tpu.memory_space<vmem>>, vector<1x1x64xf32>
    %567 = vector.shape_cast %566 : vector<1x1x64xf32> to vector<1x64xf32>
    %568 = vector.broadcast %567 : vector<1x64xf32> to vector<8x64xf32>
    %569 = arith.addf %565, %568 : vector<8x64xf32>
    %c7_526 = arith.constant 7 : index
    %c0_527 = arith.constant 0 : index
    %c0_528 = arith.constant 0 : index
    %570 = vector.load %arg4[%c7_526, %c0_527, %c0_528] : memref<8x64x64xf32, #tpu.memory_space<vmem>>, vector<1x64x64xf32>
    %571 = vector.shape_cast %570 : vector<1x64x64xf32> to vector<64x64xf32>
    %cst_529 = arith.constant dense<0.000000e+00> : vector<8x64xf32>
    %572 = tpu.matmul %498, %571, %cst_529 {dimension_numbers = #tpu.dot_dimension_numbers<[1], [0], [0], [1], [0, 0, 1, 1], [], []>} : vector<8x64xf32>, vector<64x64xf32>, vector<8x64xf32> -> vector<8x64xf32>
    %573 = arith.addf %569, %572 : vector<8x64xf32>
    %574 = math.tanh %573 : vector<8x64xf32>
    %c16_530 = arith.constant 16 : index
    %c0_531 = arith.constant 0 : index
    %575 = vector.load %arg6[%c16_530, %c0_531] : memref<64x64xf32, #tpu.memory_space<vmem>>, vector<8x64xf32>
    tpu.vector_store %arg6[%c16_530, %c0_531], %574 {strides = array<i32>} : memref<64x64xf32, #tpu.memory_space<vmem>>, vector<8x64xf32>,
    %c2_532 = arith.constant 2 : index
    %c0_533 = arith.constant 0 : index
    %c0_534 = arith.constant 0 : index
    %576 = vector.load %arg3[%c2_532, %c0_533, %c0_534] : memref<7x64x64xf32, #tpu.memory_space<vmem>>, vector<1x64x64xf32>
    %577 = vector.shape_cast %576 : vector<1x64x64xf32> to vector<64x64xf32>
    %cst_535 = arith.constant dense<0.000000e+00> : vector<8x64xf32>
    %578 = tpu.matmul %511, %577, %cst_535 {dimension_numbers = #tpu.dot_dimension_numbers<[1], [0], [0], [1], [0, 0, 1, 1], [], []>} : vector<8x64xf32>, vector<64x64xf32>, vector<8x64xf32> -> vector<8x64xf32>
    %c3_536 = arith.constant 3 : index
    %c0_537 = arith.constant 0 : index
    %c0_538 = arith.constant 0 : index
    %579 = vector.load %arg5[%c3_536, %c0_537, %c0_538] : memref<8x1x64xf32, #tpu.memory_space<vmem>>, vector<1x1x64xf32>
    %580 = vector.shape_cast %579 : vector<1x1x64xf32> to vector<1x64xf32>
    %581 = vector.broadcast %580 : vector<1x64xf32> to vector<8x64xf32>
    %582 = arith.addf %578, %581 : vector<8x64xf32>
    %c3_539 = arith.constant 3 : index
    %c0_540 = arith.constant 0 : index
    %c0_541 = arith.constant 0 : index
    %583 = vector.load %arg4[%c3_539, %c0_540, %c0_541] : memref<8x64x64xf32, #tpu.memory_space<vmem>>, vector<1x64x64xf32>
    %584 = vector.shape_cast %583 : vector<1x64x64xf32> to vector<64x64xf32>
    %cst_542 = arith.constant dense<0.000000e+00> : vector<8x64xf32>
    %585 = tpu.matmul %526, %584, %cst_542 {dimension_numbers = #tpu.dot_dimension_numbers<[1], [0], [0], [1], [0, 0, 1, 1], [], []>} : vector<8x64xf32>, vector<64x64xf32>, vector<8x64xf32> -> vector<8x64xf32>
    %586 = arith.addf %582, %585 : vector<8x64xf32>
    %587 = math.tanh %586 : vector<8x64xf32>
    %c3_543 = arith.constant 3 : index
    %c0_544 = arith.constant 0 : index
    %c0_545 = arith.constant 0 : index
    %588 = vector.load %arg7[%c3_543, %c0_544, %c0_545] : memref<8x8x64xf32, #tpu.memory_space<vmem>>, vector<1x8x64xf32>
    %589 = vector.shape_cast %588 : vector<1x8x64xf32> to vector<8x64xf32>
    %590 = vector.shape_cast %587 : vector<8x64xf32> to vector<1x8x64xf32>
    tpu.vector_store %arg7[%c3_543, %c0_544, %c0_545], %590 {strides = array<i32>} : memref<8x8x64xf32, #tpu.memory_space<vmem>>, vector<1x8x64xf32>,
    %c3_546 = arith.constant 3 : index
    %c0_547 = arith.constant 0 : index
    %c0_548 = arith.constant 0 : index
    %591 = vector.load %arg3[%c3_546, %c0_547, %c0_548] : memref<7x64x64xf32, #tpu.memory_space<vmem>>, vector<1x64x64xf32>
    %592 = vector.shape_cast %591 : vector<1x64x64xf32> to vector<64x64xf32>
    %cst_549 = arith.constant dense<0.000000e+00> : vector<8x64xf32>
    %593 = tpu.matmul %526, %592, %cst_549 {dimension_numbers = #tpu.dot_dimension_numbers<[1], [0], [0], [1], [0, 0, 1, 1], [], []>} : vector<8x64xf32>, vector<64x64xf32>, vector<8x64xf32> -> vector<8x64xf32>
    %c4_550 = arith.constant 4 : index
    %c0_551 = arith.constant 0 : index
    %c0_552 = arith.constant 0 : index
    %594 = vector.load %arg5[%c4_550, %c0_551, %c0_552] : memref<8x1x64xf32, #tpu.memory_space<vmem>>, vector<1x1x64xf32>
    %595 = vector.shape_cast %594 : vector<1x1x64xf32> to vector<1x64xf32>
    %596 = vector.broadcast %595 : vector<1x64xf32> to vector<8x64xf32>
    %597 = arith.addf %593, %596 : vector<8x64xf32>
    %c4_553 = arith.constant 4 : index
    %c0_554 = arith.constant 0 : index
    %c0_555 = arith.constant 0 : index
    %598 = vector.load %arg4[%c4_553, %c0_554, %c0_555] : memref<8x64x64xf32, #tpu.memory_space<vmem>>, vector<1x64x64xf32>
    %599 = vector.shape_cast %598 : vector<1x64x64xf32> to vector<64x64xf32>
    %cst_556 = arith.constant dense<0.000000e+00> : vector<8x64xf32>
    %600 = tpu.matmul %538, %599, %cst_556 {dimension_numbers = #tpu.dot_dimension_numbers<[1], [0], [0], [1], [0, 0, 1, 1], [], []>} : vector<8x64xf32>, vector<64x64xf32>, vector<8x64xf32> -> vector<8x64xf32>
    %601 = arith.addf %597, %600 : vector<8x64xf32>
    %602 = math.tanh %601 : vector<8x64xf32>
    %c4_557 = arith.constant 4 : index
    %c0_558 = arith.constant 0 : index
    %c0_559 = arith.constant 0 : index
    %603 = vector.load %arg3[%c4_557, %c0_558, %c0_559] : memref<7x64x64xf32, #tpu.memory_space<vmem>>, vector<1x64x64xf32>
    %604 = vector.shape_cast %603 : vector<1x64x64xf32> to vector<64x64xf32>
    %cst_560 = arith.constant dense<0.000000e+00> : vector<8x64xf32>
    %605 = tpu.matmul %538, %604, %cst_560 {dimension_numbers = #tpu.dot_dimension_numbers<[1], [0], [0], [1], [0, 0, 1, 1], [], []>} : vector<8x64xf32>, vector<64x64xf32>, vector<8x64xf32> -> vector<8x64xf32>
    %c5_561 = arith.constant 5 : index
    %c0_562 = arith.constant 0 : index
    %c0_563 = arith.constant 0 : index
    %606 = vector.load %arg5[%c5_561, %c0_562, %c0_563] : memref<8x1x64xf32, #tpu.memory_space<vmem>>, vector<1x1x64xf32>
    %607 = vector.shape_cast %606 : vector<1x1x64xf32> to vector<1x64xf32>
    %608 = vector.broadcast %607 : vector<1x64xf32> to vector<8x64xf32>
    %609 = arith.addf %605, %608 : vector<8x64xf32>
    %c5_564 = arith.constant 5 : index
    %c0_565 = arith.constant 0 : index
    %c0_566 = arith.constant 0 : index
    %610 = vector.load %arg4[%c5_564, %c0_565, %c0_566] : memref<8x64x64xf32, #tpu.memory_space<vmem>>, vector<1x64x64xf32>
    %611 = vector.shape_cast %610 : vector<1x64x64xf32> to vector<64x64xf32>
    %cst_567 = arith.constant dense<0.000000e+00> : vector<8x64xf32>
    %612 = tpu.matmul %550, %611, %cst_567 {dimension_numbers = #tpu.dot_dimension_numbers<[1], [0], [0], [1], [0, 0, 1, 1], [], []>} : vector<8x64xf32>, vector<64x64xf32>, vector<8x64xf32> -> vector<8x64xf32>
    %613 = arith.addf %609, %612 : vector<8x64xf32>
    %614 = math.tanh %613 : vector<8x64xf32>
    %c5_568 = arith.constant 5 : index
    %c0_569 = arith.constant 0 : index
    %c0_570 = arith.constant 0 : index
    %615 = vector.load %arg3[%c5_568, %c0_569, %c0_570] : memref<7x64x64xf32, #tpu.memory_space<vmem>>, vector<1x64x64xf32>
    %616 = vector.shape_cast %615 : vector<1x64x64xf32> to vector<64x64xf32>
    %cst_571 = arith.constant dense<0.000000e+00> : vector<8x64xf32>
    %617 = tpu.matmul %550, %616, %cst_571 {dimension_numbers = #tpu.dot_dimension_numbers<[1], [0], [0], [1], [0, 0, 1, 1], [], []>} : vector<8x64xf32>, vector<64x64xf32>, vector<8x64xf32> -> vector<8x64xf32>
    %c6_572 = arith.constant 6 : index
    %c0_573 = arith.constant 0 : index
    %c0_574 = arith.constant 0 : index
    %618 = vector.load %arg5[%c6_572, %c0_573, %c0_574] : memref<8x1x64xf32, #tpu.memory_space<vmem>>, vector<1x1x64xf32>
    %619 = vector.shape_cast %618 : vector<1x1x64xf32> to vector<1x64xf32>
    %620 = vector.broadcast %619 : vector<1x64xf32> to vector<8x64xf32>
    %621 = arith.addf %617, %620 : vector<8x64xf32>
    %c6_575 = arith.constant 6 : index
    %c0_576 = arith.constant 0 : index
    %c0_577 = arith.constant 0 : index
    %622 = vector.load %arg4[%c6_575, %c0_576, %c0_577] : memref<8x64x64xf32, #tpu.memory_space<vmem>>, vector<1x64x64xf32>
    %623 = vector.shape_cast %622 : vector<1x64x64xf32> to vector<64x64xf32>
    %cst_578 = arith.constant dense<0.000000e+00> : vector<8x64xf32>
    %624 = tpu.matmul %562, %623, %cst_578 {dimension_numbers = #tpu.dot_dimension_numbers<[1], [0], [0], [1], [0, 0, 1, 1], [], []>} : vector<8x64xf32>, vector<64x64xf32>, vector<8x64xf32> -> vector<8x64xf32>
    %625 = arith.addf %621, %624 : vector<8x64xf32>
    %626 = math.tanh %625 : vector<8x64xf32>
    %c6_579 = arith.constant 6 : index
    %c0_580 = arith.constant 0 : index
    %c0_581 = arith.constant 0 : index
    %627 = vector.load %arg3[%c6_579, %c0_580, %c0_581] : memref<7x64x64xf32, #tpu.memory_space<vmem>>, vector<1x64x64xf32>
    %628 = vector.shape_cast %627 : vector<1x64x64xf32> to vector<64x64xf32>
    %cst_582 = arith.constant dense<0.000000e+00> : vector<8x64xf32>
    %629 = tpu.matmul %562, %628, %cst_582 {dimension_numbers = #tpu.dot_dimension_numbers<[1], [0], [0], [1], [0, 0, 1, 1], [], []>} : vector<8x64xf32>, vector<64x64xf32>, vector<8x64xf32> -> vector<8x64xf32>
    %c7_583 = arith.constant 7 : index
    %c0_584 = arith.constant 0 : index
    %c0_585 = arith.constant 0 : index
    %630 = vector.load %arg5[%c7_583, %c0_584, %c0_585] : memref<8x1x64xf32, #tpu.memory_space<vmem>>, vector<1x1x64xf32>
    %631 = vector.shape_cast %630 : vector<1x1x64xf32> to vector<1x64xf32>
    %632 = vector.broadcast %631 : vector<1x64xf32> to vector<8x64xf32>
    %633 = arith.addf %629, %632 : vector<8x64xf32>
    %c7_586 = arith.constant 7 : index
    %c0_587 = arith.constant 0 : index
    %c0_588 = arith.constant 0 : index
    %634 = vector.load %arg4[%c7_586, %c0_587, %c0_588] : memref<8x64x64xf32, #tpu.memory_space<vmem>>, vector<1x64x64xf32>
    %635 = vector.shape_cast %634 : vector<1x64x64xf32> to vector<64x64xf32>
    %cst_589 = arith.constant dense<0.000000e+00> : vector<8x64xf32>
    %636 = tpu.matmul %574, %635, %cst_589 {dimension_numbers = #tpu.dot_dimension_numbers<[1], [0], [0], [1], [0, 0, 1, 1], [], []>} : vector<8x64xf32>, vector<64x64xf32>, vector<8x64xf32> -> vector<8x64xf32>
    %637 = arith.addf %633, %636 : vector<8x64xf32>
    %638 = math.tanh %637 : vector<8x64xf32>
    %c24_590 = arith.constant 24 : index
    %c0_591 = arith.constant 0 : index
    %639 = vector.load %arg6[%c24_590, %c0_591] : memref<64x64xf32, #tpu.memory_space<vmem>>, vector<8x64xf32>
    tpu.vector_store %arg6[%c24_590, %c0_591], %638 {strides = array<i32>} : memref<64x64xf32, #tpu.memory_space<vmem>>, vector<8x64xf32>,
    %c3_592 = arith.constant 3 : index
    %c0_593 = arith.constant 0 : index
    %c0_594 = arith.constant 0 : index
    %640 = vector.load %arg3[%c3_592, %c0_593, %c0_594] : memref<7x64x64xf32, #tpu.memory_space<vmem>>, vector<1x64x64xf32>
    %641 = vector.shape_cast %640 : vector<1x64x64xf32> to vector<64x64xf32>
    %cst_595 = arith.constant dense<0.000000e+00> : vector<8x64xf32>
    %642 = tpu.matmul %587, %641, %cst_595 {dimension_numbers = #tpu.dot_dimension_numbers<[1], [0], [0], [1], [0, 0, 1, 1], [], []>} : vector<8x64xf32>, vector<64x64xf32>, vector<8x64xf32> -> vector<8x64xf32>
    %c4_596 = arith.constant 4 : index
    %c0_597 = arith.constant 0 : index
    %c0_598 = arith.constant 0 : index
    %643 = vector.load %arg5[%c4_596, %c0_597, %c0_598] : memref<8x1x64xf32, #tpu.memory_space<vmem>>, vector<1x1x64xf32>
    %644 = vector.shape_cast %643 : vector<1x1x64xf32> to vector<1x64xf32>
    %645 = vector.broadcast %644 : vector<1x64xf32> to vector<8x64xf32>
    %646 = arith.addf %642, %645 : vector<8x64xf32>
    %c4_599 = arith.constant 4 : index
    %c0_600 = arith.constant 0 : index
    %c0_601 = arith.constant 0 : index
    %647 = vector.load %arg4[%c4_599, %c0_600, %c0_601] : memref<8x64x64xf32, #tpu.memory_space<vmem>>, vector<1x64x64xf32>
    %648 = vector.shape_cast %647 : vector<1x64x64xf32> to vector<64x64xf32>
    %cst_602 = arith.constant dense<0.000000e+00> : vector<8x64xf32>
    %649 = tpu.matmul %602, %648, %cst_602 {dimension_numbers = #tpu.dot_dimension_numbers<[1], [0], [0], [1], [0, 0, 1, 1], [], []>} : vector<8x64xf32>, vector<64x64xf32>, vector<8x64xf32> -> vector<8x64xf32>
    %650 = arith.addf %646, %649 : vector<8x64xf32>
    %651 = math.tanh %650 : vector<8x64xf32>
    %c4_603 = arith.constant 4 : index
    %c0_604 = arith.constant 0 : index
    %c0_605 = arith.constant 0 : index
    %652 = vector.load %arg7[%c4_603, %c0_604, %c0_605] : memref<8x8x64xf32, #tpu.memory_space<vmem>>, vector<1x8x64xf32>
    %653 = vector.shape_cast %652 : vector<1x8x64xf32> to vector<8x64xf32>
    %654 = vector.shape_cast %651 : vector<8x64xf32> to vector<1x8x64xf32>
    tpu.vector_store %arg7[%c4_603, %c0_604, %c0_605], %654 {strides = array<i32>} : memref<8x8x64xf32, #tpu.memory_space<vmem>>, vector<1x8x64xf32>,
    %c4_606 = arith.constant 4 : index
    %c0_607 = arith.constant 0 : index
    %c0_608 = arith.constant 0 : index
    %655 = vector.load %arg3[%c4_606, %c0_607, %c0_608] : memref<7x64x64xf32, #tpu.memory_space<vmem>>, vector<1x64x64xf32>
    %656 = vector.shape_cast %655 : vector<1x64x64xf32> to vector<64x64xf32>
    %cst_609 = arith.constant dense<0.000000e+00> : vector<8x64xf32>
    %657 = tpu.matmul %602, %656, %cst_609 {dimension_numbers = #tpu.dot_dimension_numbers<[1], [0], [0], [1], [0, 0, 1, 1], [], []>} : vector<8x64xf32>, vector<64x64xf32>, vector<8x64xf32> -> vector<8x64xf32>
    %c5_610 = arith.constant 5 : index
    %c0_611 = arith.constant 0 : index
    %c0_612 = arith.constant 0 : index
    %658 = vector.load %arg5[%c5_610, %c0_611, %c0_612] : memref<8x1x64xf32, #tpu.memory_space<vmem>>, vector<1x1x64xf32>
    %659 = vector.shape_cast %658 : vector<1x1x64xf32> to vector<1x64xf32>
    %660 = vector.broadcast %659 : vector<1x64xf32> to vector<8x64xf32>
    %661 = arith.addf %657, %660 : vector<8x64xf32>
    %c5_613 = arith.constant 5 : index
    %c0_614 = arith.constant 0 : index
    %c0_615 = arith.constant 0 : index
    %662 = vector.load %arg4[%c5_613, %c0_614, %c0_615] : memref<8x64x64xf32, #tpu.memory_space<vmem>>, vector<1x64x64xf32>
    %663 = vector.shape_cast %662 : vector<1x64x64xf32> to vector<64x64xf32>
    %cst_616 = arith.constant dense<0.000000e+00> : vector<8x64xf32>
    %664 = tpu.matmul %614, %663, %cst_616 {dimension_numbers = #tpu.dot_dimension_numbers<[1], [0], [0], [1], [0, 0, 1, 1], [], []>} : vector<8x64xf32>, vector<64x64xf32>, vector<8x64xf32> -> vector<8x64xf32>
    %665 = arith.addf %661, %664 : vector<8x64xf32>
    %666 = math.tanh %665 : vector<8x64xf32>
    %c5_617 = arith.constant 5 : index
    %c0_618 = arith.constant 0 : index
    %c0_619 = arith.constant 0 : index
    %667 = vector.load %arg3[%c5_617, %c0_618, %c0_619] : memref<7x64x64xf32, #tpu.memory_space<vmem>>, vector<1x64x64xf32>
    %668 = vector.shape_cast %667 : vector<1x64x64xf32> to vector<64x64xf32>
    %cst_620 = arith.constant dense<0.000000e+00> : vector<8x64xf32>
    %669 = tpu.matmul %614, %668, %cst_620 {dimension_numbers = #tpu.dot_dimension_numbers<[1], [0], [0], [1], [0, 0, 1, 1], [], []>} : vector<8x64xf32>, vector<64x64xf32>, vector<8x64xf32> -> vector<8x64xf32>
    %c6_621 = arith.constant 6 : index
    %c0_622 = arith.constant 0 : index
    %c0_623 = arith.constant 0 : index
    %670 = vector.load %arg5[%c6_621, %c0_622, %c0_623] : memref<8x1x64xf32, #tpu.memory_space<vmem>>, vector<1x1x64xf32>
    %671 = vector.shape_cast %670 : vector<1x1x64xf32> to vector<1x64xf32>
    %672 = vector.broadcast %671 : vector<1x64xf32> to vector<8x64xf32>
    %673 = arith.addf %669, %672 : vector<8x64xf32>
    %c6_624 = arith.constant 6 : index
    %c0_625 = arith.constant 0 : index
    %c0_626 = arith.constant 0 : index
    %674 = vector.load %arg4[%c6_624, %c0_625, %c0_626] : memref<8x64x64xf32, #tpu.memory_space<vmem>>, vector<1x64x64xf32>
    %675 = vector.shape_cast %674 : vector<1x64x64xf32> to vector<64x64xf32>
    %cst_627 = arith.constant dense<0.000000e+00> : vector<8x64xf32>
    %676 = tpu.matmul %626, %675, %cst_627 {dimension_numbers = #tpu.dot_dimension_numbers<[1], [0], [0], [1], [0, 0, 1, 1], [], []>} : vector<8x64xf32>, vector<64x64xf32>, vector<8x64xf32> -> vector<8x64xf32>
    %677 = arith.addf %673, %676 : vector<8x64xf32>
    %678 = math.tanh %677 : vector<8x64xf32>
    %c6_628 = arith.constant 6 : index
    %c0_629 = arith.constant 0 : index
    %c0_630 = arith.constant 0 : index
    %679 = vector.load %arg3[%c6_628, %c0_629, %c0_630] : memref<7x64x64xf32, #tpu.memory_space<vmem>>, vector<1x64x64xf32>
    %680 = vector.shape_cast %679 : vector<1x64x64xf32> to vector<64x64xf32>
    %cst_631 = arith.constant dense<0.000000e+00> : vector<8x64xf32>
    %681 = tpu.matmul %626, %680, %cst_631 {dimension_numbers = #tpu.dot_dimension_numbers<[1], [0], [0], [1], [0, 0, 1, 1], [], []>} : vector<8x64xf32>, vector<64x64xf32>, vector<8x64xf32> -> vector<8x64xf32>
    %c7_632 = arith.constant 7 : index
    %c0_633 = arith.constant 0 : index
    %c0_634 = arith.constant 0 : index
    %682 = vector.load %arg5[%c7_632, %c0_633, %c0_634] : memref<8x1x64xf32, #tpu.memory_space<vmem>>, vector<1x1x64xf32>
    %683 = vector.shape_cast %682 : vector<1x1x64xf32> to vector<1x64xf32>
    %684 = vector.broadcast %683 : vector<1x64xf32> to vector<8x64xf32>
    %685 = arith.addf %681, %684 : vector<8x64xf32>
    %c7_635 = arith.constant 7 : index
    %c0_636 = arith.constant 0 : index
    %c0_637 = arith.constant 0 : index
    %686 = vector.load %arg4[%c7_635, %c0_636, %c0_637] : memref<8x64x64xf32, #tpu.memory_space<vmem>>, vector<1x64x64xf32>
    %687 = vector.shape_cast %686 : vector<1x64x64xf32> to vector<64x64xf32>
    %cst_638 = arith.constant dense<0.000000e+00> : vector<8x64xf32>
    %688 = tpu.matmul %638, %687, %cst_638 {dimension_numbers = #tpu.dot_dimension_numbers<[1], [0], [0], [1], [0, 0, 1, 1], [], []>} : vector<8x64xf32>, vector<64x64xf32>, vector<8x64xf32> -> vector<8x64xf32>
    %689 = arith.addf %685, %688 : vector<8x64xf32>
    %690 = math.tanh %689 : vector<8x64xf32>
    %c32_639 = arith.constant 32 : index
    %c0_640 = arith.constant 0 : index
    %691 = vector.load %arg6[%c32_639, %c0_640] : memref<64x64xf32, #tpu.memory_space<vmem>>, vector<8x64xf32>
    tpu.vector_store %arg6[%c32_639, %c0_640], %690 {strides = array<i32>} : memref<64x64xf32, #tpu.memory_space<vmem>>, vector<8x64xf32>,
    %c4_641 = arith.constant 4 : index
    %c0_642 = arith.constant 0 : index
    %c0_643 = arith.constant 0 : index
    %692 = vector.load %arg3[%c4_641, %c0_642, %c0_643] : memref<7x64x64xf32, #tpu.memory_space<vmem>>, vector<1x64x64xf32>
    %693 = vector.shape_cast %692 : vector<1x64x64xf32> to vector<64x64xf32>
    %cst_644 = arith.constant dense<0.000000e+00> : vector<8x64xf32>
    %694 = tpu.matmul %651, %693, %cst_644 {dimension_numbers = #tpu.dot_dimension_numbers<[1], [0], [0], [1], [0, 0, 1, 1], [], []>} : vector<8x64xf32>, vector<64x64xf32>, vector<8x64xf32> -> vector<8x64xf32>
    %c5_645 = arith.constant 5 : index
    %c0_646 = arith.constant 0 : index
    %c0_647 = arith.constant 0 : index
    %695 = vector.load %arg5[%c5_645, %c0_646, %c0_647] : memref<8x1x64xf32, #tpu.memory_space<vmem>>, vector<1x1x64xf32>
    %696 = vector.shape_cast %695 : vector<1x1x64xf32> to vector<1x64xf32>
    %697 = vector.broadcast %696 : vector<1x64xf32> to vector<8x64xf32>
    %698 = arith.addf %694, %697 : vector<8x64xf32>
    %c5_648 = arith.constant 5 : index
    %c0_649 = arith.constant 0 : index
    %c0_650 = arith.constant 0 : index
    %699 = vector.load %arg4[%c5_648, %c0_649, %c0_650] : memref<8x64x64xf32, #tpu.memory_space<vmem>>, vector<1x64x64xf32>
    %700 = vector.shape_cast %699 : vector<1x64x64xf32> to vector<64x64xf32>
    %cst_651 = arith.constant dense<0.000000e+00> : vector<8x64xf32>
    %701 = tpu.matmul %666, %700, %cst_651 {dimension_numbers = #tpu.dot_dimension_numbers<[1], [0], [0], [1], [0, 0, 1, 1], [], []>} : vector<8x64xf32>, vector<64x64xf32>, vector<8x64xf32> -> vector<8x64xf32>
    %702 = arith.addf %698, %701 : vector<8x64xf32>
    %703 = math.tanh %702 : vector<8x64xf32>
    %c5_652 = arith.constant 5 : index
    %c0_653 = arith.constant 0 : index
    %c0_654 = arith.constant 0 : index
    %704 = vector.load %arg7[%c5_652, %c0_653, %c0_654] : memref<8x8x64xf32, #tpu.memory_space<vmem>>, vector<1x8x64xf32>
    %705 = vector.shape_cast %704 : vector<1x8x64xf32> to vector<8x64xf32>
    %706 = vector.shape_cast %703 : vector<8x64xf32> to vector<1x8x64xf32>
    tpu.vector_store %arg7[%c5_652, %c0_653, %c0_654], %706 {strides = array<i32>} : memref<8x8x64xf32, #tpu.memory_space<vmem>>, vector<1x8x64xf32>,
    %c5_655 = arith.constant 5 : index
    %c0_656 = arith.constant 0 : index
    %c0_657 = arith.constant 0 : index
    %707 = vector.load %arg3[%c5_655, %c0_656, %c0_657] : memref<7x64x64xf32, #tpu.memory_space<vmem>>, vector<1x64x64xf32>
    %708 = vector.shape_cast %707 : vector<1x64x64xf32> to vector<64x64xf32>
    %cst_658 = arith.constant dense<0.000000e+00> : vector<8x64xf32>
    %709 = tpu.matmul %666, %708, %cst_658 {dimension_numbers = #tpu.dot_dimension_numbers<[1], [0], [0], [1], [0, 0, 1, 1], [], []>} : vector<8x64xf32>, vector<64x64xf32>, vector<8x64xf32> -> vector<8x64xf32>
    %c6_659 = arith.constant 6 : index
    %c0_660 = arith.constant 0 : index
    %c0_661 = arith.constant 0 : index
    %710 = vector.load %arg5[%c6_659, %c0_660, %c0_661] : memref<8x1x64xf32, #tpu.memory_space<vmem>>, vector<1x1x64xf32>
    %711 = vector.shape_cast %710 : vector<1x1x64xf32> to vector<1x64xf32>
    %712 = vector.broadcast %711 : vector<1x64xf32> to vector<8x64xf32>
    %713 = arith.addf %709, %712 : vector<8x64xf32>
    %c6_662 = arith.constant 6 : index
    %c0_663 = arith.constant 0 : index
    %c0_664 = arith.constant 0 : index
    %714 = vector.load %arg4[%c6_662, %c0_663, %c0_664] : memref<8x64x64xf32, #tpu.memory_space<vmem>>, vector<1x64x64xf32>
    %715 = vector.shape_cast %714 : vector<1x64x64xf32> to vector<64x64xf32>
    %cst_665 = arith.constant dense<0.000000e+00> : vector<8x64xf32>
    %716 = tpu.matmul %678, %715, %cst_665 {dimension_numbers = #tpu.dot_dimension_numbers<[1], [0], [0], [1], [0, 0, 1, 1], [], []>} : vector<8x64xf32>, vector<64x64xf32>, vector<8x64xf32> -> vector<8x64xf32>
    %717 = arith.addf %713, %716 : vector<8x64xf32>
    %718 = math.tanh %717 : vector<8x64xf32>
    %c6_666 = arith.constant 6 : index
    %c0_667 = arith.constant 0 : index
    %c0_668 = arith.constant 0 : index
    %719 = vector.load %arg3[%c6_666, %c0_667, %c0_668] : memref<7x64x64xf32, #tpu.memory_space<vmem>>, vector<1x64x64xf32>
    %720 = vector.shape_cast %719 : vector<1x64x64xf32> to vector<64x64xf32>
    %cst_669 = arith.constant dense<0.000000e+00> : vector<8x64xf32>
    %721 = tpu.matmul %678, %720, %cst_669 {dimension_numbers = #tpu.dot_dimension_numbers<[1], [0], [0], [1], [0, 0, 1, 1], [], []>} : vector<8x64xf32>, vector<64x64xf32>, vector<8x64xf32> -> vector<8x64xf32>
    %c7_670 = arith.constant 7 : index
    %c0_671 = arith.constant 0 : index
    %c0_672 = arith.constant 0 : index
    %722 = vector.load %arg5[%c7_670, %c0_671, %c0_672] : memref<8x1x64xf32, #tpu.memory_space<vmem>>, vector<1x1x64xf32>
    %723 = vector.shape_cast %722 : vector<1x1x64xf32> to vector<1x64xf32>
    %724 = vector.broadcast %723 : vector<1x64xf32> to vector<8x64xf32>
    %725 = arith.addf %721, %724 : vector<8x64xf32>
    %c7_673 = arith.constant 7 : index
    %c0_674 = arith.constant 0 : index
    %c0_675 = arith.constant 0 : index
    %726 = vector.load %arg4[%c7_673, %c0_674, %c0_675] : memref<8x64x64xf32, #tpu.memory_space<vmem>>, vector<1x64x64xf32>
    %727 = vector.shape_cast %726 : vector<1x64x64xf32> to vector<64x64xf32>
    %cst_676 = arith.constant dense<0.000000e+00> : vector<8x64xf32>
    %728 = tpu.matmul %690, %727, %cst_676 {dimension_numbers = #tpu.dot_dimension_numbers<[1], [0], [0], [1], [0, 0, 1, 1], [], []>} : vector<8x64xf32>, vector<64x64xf32>, vector<8x64xf32> -> vector<8x64xf32>
    %729 = arith.addf %725, %728 : vector<8x64xf32>
    %730 = math.tanh %729 : vector<8x64xf32>
    %c40_677 = arith.constant 40 : index
    %c0_678 = arith.constant 0 : index
    %731 = vector.load %arg6[%c40_677, %c0_678] : memref<64x64xf32, #tpu.memory_space<vmem>>, vector<8x64xf32>
    tpu.vector_store %arg6[%c40_677, %c0_678], %730 {strides = array<i32>} : memref<64x64xf32, #tpu.memory_space<vmem>>, vector<8x64xf32>,
    %c5_679 = arith.constant 5 : index
    %c0_680 = arith.constant 0 : index
    %c0_681 = arith.constant 0 : index
    %732 = vector.load %arg3[%c5_679, %c0_680, %c0_681] : memref<7x64x64xf32, #tpu.memory_space<vmem>>, vector<1x64x64xf32>
    %733 = vector.shape_cast %732 : vector<1x64x64xf32> to vector<64x64xf32>
    %cst_682 = arith.constant dense<0.000000e+00> : vector<8x64xf32>
    %734 = tpu.matmul %703, %733, %cst_682 {dimension_numbers = #tpu.dot_dimension_numbers<[1], [0], [0], [1], [0, 0, 1, 1], [], []>} : vector<8x64xf32>, vector<64x64xf32>, vector<8x64xf32> -> vector<8x64xf32>
    %c6_683 = arith.constant 6 : index
    %c0_684 = arith.constant 0 : index
    %c0_685 = arith.constant 0 : index
    %735 = vector.load %arg5[%c6_683, %c0_684, %c0_685] : memref<8x1x64xf32, #tpu.memory_space<vmem>>, vector<1x1x64xf32>
    %736 = vector.shape_cast %735 : vector<1x1x64xf32> to vector<1x64xf32>
    %737 = vector.broadcast %736 : vector<1x64xf32> to vector<8x64xf32>
    %738 = arith.addf %734, %737 : vector<8x64xf32>
    %c6_686 = arith.constant 6 : index
    %c0_687 = arith.constant 0 : index
    %c0_688 = arith.constant 0 : index
    %739 = vector.load %arg4[%c6_686, %c0_687, %c0_688] : memref<8x64x64xf32, #tpu.memory_space<vmem>>, vector<1x64x64xf32>
    %740 = vector.shape_cast %739 : vector<1x64x64xf32> to vector<64x64xf32>
    %cst_689 = arith.constant dense<0.000000e+00> : vector<8x64xf32>
    %741 = tpu.matmul %718, %740, %cst_689 {dimension_numbers = #tpu.dot_dimension_numbers<[1], [0], [0], [1], [0, 0, 1, 1], [], []>} : vector<8x64xf32>, vector<64x64xf32>, vector<8x64xf32> -> vector<8x64xf32>
    %742 = arith.addf %738, %741 : vector<8x64xf32>
    %743 = math.tanh %742 : vector<8x64xf32>
    %c6_690 = arith.constant 6 : index
    %c0_691 = arith.constant 0 : index
    %c0_692 = arith.constant 0 : index
    %744 = vector.load %arg7[%c6_690, %c0_691, %c0_692] : memref<8x8x64xf32, #tpu.memory_space<vmem>>, vector<1x8x64xf32>
    %745 = vector.shape_cast %744 : vector<1x8x64xf32> to vector<8x64xf32>
    %746 = vector.shape_cast %743 : vector<8x64xf32> to vector<1x8x64xf32>
    tpu.vector_store %arg7[%c6_690, %c0_691, %c0_692], %746 {strides = array<i32>} : memref<8x8x64xf32, #tpu.memory_space<vmem>>, vector<1x8x64xf32>,
    %c6_693 = arith.constant 6 : index
    %c0_694 = arith.constant 0 : index
    %c0_695 = arith.constant 0 : index
    %747 = vector.load %arg3[%c6_693, %c0_694, %c0_695] : memref<7x64x64xf32, #tpu.memory_space<vmem>>, vector<1x64x64xf32>
    %748 = vector.shape_cast %747 : vector<1x64x64xf32> to vector<64x64xf32>
    %cst_696 = arith.constant dense<0.000000e+00> : vector<8x64xf32>
    %749 = tpu.matmul %718, %748, %cst_696 {dimension_numbers = #tpu.dot_dimension_numbers<[1], [0], [0], [1], [0, 0, 1, 1], [], []>} : vector<8x64xf32>, vector<64x64xf32>, vector<8x64xf32> -> vector<8x64xf32>
    %c7_697 = arith.constant 7 : index
    %c0_698 = arith.constant 0 : index
    %c0_699 = arith.constant 0 : index
    %750 = vector.load %arg5[%c7_697, %c0_698, %c0_699] : memref<8x1x64xf32, #tpu.memory_space<vmem>>, vector<1x1x64xf32>
    %751 = vector.shape_cast %750 : vector<1x1x64xf32> to vector<1x64xf32>
    %752 = vector.broadcast %751 : vector<1x64xf32> to vector<8x64xf32>
    %753 = arith.addf %749, %752 : vector<8x64xf32>
    %c7_700 = arith.constant 7 : index
    %c0_701 = arith.constant 0 : index
    %c0_702 = arith.constant 0 : index
    %754 = vector.load %arg4[%c7_700, %c0_701, %c0_702] : memref<8x64x64xf32, #tpu.memory_space<vmem>>, vector<1x64x64xf32>
    %755 = vector.shape_cast %754 : vector<1x64x64xf32> to vector<64x64xf32>
    %cst_703 = arith.constant dense<0.000000e+00> : vector<8x64xf32>
    %756 = tpu.matmul %730, %755, %cst_703 {dimension_numbers = #tpu.dot_dimension_numbers<[1], [0], [0], [1], [0, 0, 1, 1], [], []>} : vector<8x64xf32>, vector<64x64xf32>, vector<8x64xf32> -> vector<8x64xf32>
    %757 = arith.addf %753, %756 : vector<8x64xf32>
    %758 = math.tanh %757 : vector<8x64xf32>
    %c48_704 = arith.constant 48 : index
    %c0_705 = arith.constant 0 : index
    %759 = vector.load %arg6[%c48_704, %c0_705] : memref<64x64xf32, #tpu.memory_space<vmem>>, vector<8x64xf32>
    tpu.vector_store %arg6[%c48_704, %c0_705], %758 {strides = array<i32>} : memref<64x64xf32, #tpu.memory_space<vmem>>, vector<8x64xf32>,
    %c6_706 = arith.constant 6 : index
    %c0_707 = arith.constant 0 : index
    %c0_708 = arith.constant 0 : index
    %760 = vector.load %arg3[%c6_706, %c0_707, %c0_708] : memref<7x64x64xf32, #tpu.memory_space<vmem>>, vector<1x64x64xf32>
    %761 = vector.shape_cast %760 : vector<1x64x64xf32> to vector<64x64xf32>
    %cst_709 = arith.constant dense<0.000000e+00> : vector<8x64xf32>
    %762 = tpu.matmul %743, %761, %cst_709 {dimension_numbers = #tpu.dot_dimension_numbers<[1], [0], [0], [1], [0, 0, 1, 1], [], []>} : vector<8x64xf32>, vector<64x64xf32>, vector<8x64xf32> -> vector<8x64xf32>
    %c7_710 = arith.constant 7 : index
    %c0_711 = arith.constant 0 : index
    %c0_712 = arith.constant 0 : index
    %763 = vector.load %arg5[%c7_710, %c0_711, %c0_712] : memref<8x1x64xf32, #tpu.memory_space<vmem>>, vector<1x1x64xf32>
    %764 = vector.shape_cast %763 : vector<1x1x64xf32> to vector<1x64xf32>
    %765 = vector.broadcast %764 : vector<1x64xf32> to vector<8x64xf32>
    %766 = arith.addf %762, %765 : vector<8x64xf32>
    %c7_713 = arith.constant 7 : index
    %c0_714 = arith.constant 0 : index
    %c0_715 = arith.constant 0 : index
    %767 = vector.load %arg4[%c7_713, %c0_714, %c0_715] : memref<8x64x64xf32, #tpu.memory_space<vmem>>, vector<1x64x64xf32>
    %768 = vector.shape_cast %767 : vector<1x64x64xf32> to vector<64x64xf32>
    %cst_716 = arith.constant dense<0.000000e+00> : vector<8x64xf32>
    %769 = tpu.matmul %758, %768, %cst_716 {dimension_numbers = #tpu.dot_dimension_numbers<[1], [0], [0], [1], [0, 0, 1, 1], [], []>} : vector<8x64xf32>, vector<64x64xf32>, vector<8x64xf32> -> vector<8x64xf32>
    %770 = arith.addf %766, %769 : vector<8x64xf32>
    %771 = math.tanh %770 : vector<8x64xf32>
    %c56_717 = arith.constant 56 : index
    %c0_718 = arith.constant 0 : index
    %772 = vector.load %arg6[%c56_717, %c0_718] : memref<64x64xf32, #tpu.memory_space<vmem>>, vector<8x64xf32>
    tpu.vector_store %arg6[%c56_717, %c0_718], %771 {strides = array<i32>} : memref<64x64xf32, #tpu.memory_space<vmem>>, vector<8x64xf32>,
    %c7_719 = arith.constant 7 : index
    %c0_720 = arith.constant 0 : index
    %c0_721 = arith.constant 0 : index
    %773 = vector.load %arg7[%c7_719, %c0_720, %c0_721] : memref<8x8x64xf32, #tpu.memory_space<vmem>>, vector<1x8x64xf32>
    %774 = vector.shape_cast %773 : vector<1x8x64xf32> to vector<8x64xf32>
    %775 = vector.shape_cast %771 : vector<8x64xf32> to vector<1x8x64xf32>
    tpu.vector_store %arg7[%c7_719, %c0_720, %c0_721], %775 {strides = array<i32>} : memref<8x8x64xf32, #tpu.memory_space<vmem>>, vector<1x8x64xf32>,
    return
  }
}

</mosaic_0001>

<bundles_post_ra>
// kernel: radar_rnn5_forward.1
= control target key start
LH: loop header
LB: loop body
LE: loop exit
PB: predicated region body
PF: predicated region fallthrough
CT: control target
= control target key end

     0   :  { %13 = vsyncpa [#allocation3], 0  ;;  %s6251_s0 = inlined_call_operand.vmem [shape: f32[64,16], index: 0, kind: input, shape index: {}]   ;;  %s6252_s1 = inlined_call_operand.vmem [shape: f32[8,8,64], index: 1, kind: input, shape index: {}]   ;;  %s6253_s2 = inlined_call_operand.vmem [shape: f32[16,64], index: 2, kind: input, shape index: {}]   ;;  %s6254_s3 = inlined_call_operand.hbm [shape: f32[7,64,64], index: 3, kind: input, shape index: {}]   ;;  %s6255_s4 = inlined_call_operand.hbm [shape: f32[8,64,64], index: 4, kind: input, shape index: {}]   ;;  %s6256_s5 = inlined_call_operand.vmem [shape: f32[8,1,64], index: 5, kind: input, shape index: {}]   ;;  %s6257_s6 = inlined_call_operand.vmem [shape: f32[64,64], index: 6, kind: output, shape index: {0}]   ;;  %s6258_s7 = inlined_call_operand.vmem [shape: f32[8,8,64], index: 7, kind: output, shape index: {1}]  }
   0x1   :  { %s25_s26 = sshll.u32 %s6254_s3, 4  ;;  %s26_s26 = int_to_ptr.hbm [resolvable:$true] %s25_s26 }
   0x2   :  { %14 = vsyncpa [#allocation5], 0  ;;  %s4215_s27 = smov [#allocation2]   ;;  %s38_s8 = sshll.u32 %s6255_s4, 4  ;;  %s39_s8 = int_to_ptr.hbm [resolvable:$true] %s38_s8 }
   0x3   :  { %s27_s28 = sshll.u32 %s4215_s27, 4  ;;  %s4216_s9 = smov 128   ;;  %s28_s28 = int_to_ptr.vmem [resolvable:$true] %s27_s28 }
   0x4   :  { %s4217_s10 = smov 8   ;;  %s4218_s11 = smov [#allocation4]  }
   0x5   :  { %33 = dma.hbm_to_vmem [thread:$0]  %s26_s26, 7168, %s28_s28, [#allocation3], %s4216_s9, %s4216_s9, %s4217_s10  }
   0x6   :  { %s40_s12 = sshll.u32 %s4218_s11, 4  ;;  %s41_s12 = int_to_ptr.vmem [resolvable:$true] %s40_s12 }
   0x7   :  { %46 = dma.hbm_to_vmem [thread:$0]  %s39_s8, 8192, %s41_s12, [#allocation5], %s4216_s9, %s4216_s9, %s4217_s10  }
   0x8   :  { %4211 = dma.done.wait [#allocation3], 7168  }
   0x9   :  { %4212 = vsyncadd [#allocation3], 4294960128 }
   0xa   :  { %4213 = dma.done.wait [#allocation5], 8192  }
   0xb   :  { %4214 = vsyncadd [#allocation5], 4294959104  ;;  %v4265_v0 = vld [vmem:[#allocation4 + $0x38] sm:$0xff]  ;;  %v66_v1 = vld [vmem:[%s6253_s2 + $0x8] sm:$0xff]  ;;  %vm71_vm0 = vcmask 130048   ;;  %vm137_vm1 = vcmask 523264  }
   0xc   :  { %v4270_v2 = vld [vmem:[#allocation4 + $0x30] sm:$0xff]  ;;  %181 = vmatpush.msra.mxu1 %v4265_v0  ;;  %110 = vmatpush.msra.mxu0 %v66_v1  ;;  %v65_v3 = vld [vmem:[%s6253_s2] sm:$0xff]  ;;  %v4279_v5 = vld [vmem:[#allocation4 + $0x28] sm:$0xff] }
   0xd   :  { %6343 = vst [vmem:[#allocation8_spill] sm:$0xff] %v4270_v2  ;;  %v57_v4 = vld [vmem:[%s6251_s0] sm:$0xff]  ;;  %207 = vmatpush.msra.mxu2 %v4265_v0  ;;  %v4286_v7 = vld [vmem:[#allocation4 + $0x18] sm:$0xff]  ;;  %v4290_v8 = vld [vmem:[#allocation4 + $0x10] sm:$0xff] }
   0xe   :  { %6344 = vst [vmem:[#allocation9_spill] sm:$0xff] %v4279_v5  ;;  %182 = vmatpush.msra.mxu1 %v4270_v2  ;;  %111 = vmatpush.msra.mxu0 %v65_v3  ;;  %v4283_v6 = vld [vmem:[#allocation4 + $0x20] sm:$0xff]  ;;  %v4294_v9 = vld [vmem:[#allocation4 + $0x8] sm:$0xff]  ;;  %v4319_v12 = vld [vmem:[#allocation2 + $0x38] sm:$0xff] }
   0xf   :  { %6345 = vst [vmem:[#allocation10_spill] sm:$0xff] %v4283_v6  ;;  %3791 = vmatmul.msk.f32.vlgmr.msra.gmra.mxu0 %vm71_vm0, %v57_v4  ;;  %208 = vmatpush.msra.mxu2 %v4270_v2  ;;  %v4298_v10 = vld [vmem:[#allocation4] sm:$0xff]  ;;  %v4321_v13 = vld [vmem:[#allocation2 + $0x30] sm:$0xff]  ;;  %v4324_v14 = vld [vmem:[#allocation2 + $0x28] sm:$0xff] }
  0x10   :  { %6346 = vst [vmem:[#allocation11_spill] sm:$0xff] %v4286_v7  ;;  %183 = vmatpush.msra.mxu1 %v4279_v5  ;;  %v146_v11 = vld [vmem:[%s6252_s1] sm:$0xff]  ;;  %242 = vmatpush.msra.mxu3 %v4319_v12  ;;  %v4331_v16 = vld [vmem:[#allocation2 + $0x18] sm:$0xff]  ;;  %v4337_v18 = vld [vmem:[#allocation2 + $0x10] sm:$0xff] }
  0x11   :  { %6347 = vst [vmem:[#allocation12_spill] sm:$0xff] %v4290_v8  ;;  %209 = vmatpush.msra.mxu2 %v4279_v5  ;;  %v4328_v15 = vld [vmem:[#allocation2 + $0x20] sm:$0xff]  ;;  %v4333_v17 = vld [vmem:[#allocation4 + $0x78] sm:$0xff]  ;;  %v4339_v19 = vld [vmem:[#allocation4 + $0x70] sm:$0xff] }
  0x12   :  { %184 = vmatpush.msra.mxu1 %v4283_v6  ;;  %6348 = vst [vmem:[#allocation13_spill] sm:$0xff] %v4294_v9  ;;  %243 = vmatpush.msra.mxu3 %v4321_v13  ;;  %v58_v20 = vld [vmem:[%s6251_s0 + $0x8] sm:$0xff]  ;;  %v4351_v23 = vld [vmem:[#allocation2] sm:$0xff]  ;;  %v4359_v25 = vld [vmem:[#allocation4 + $0x58] sm:$0xff] }
  0x13   :  { %210 = vmatpush.msra.mxu2 %v4283_v6  ;;  %6349 = vst [vmem:[#allocation14_spill] sm:$0xff] %v4298_v10  ;;  %v4345_v21 = vld [vmem:[#allocation2 + $0x8] sm:$0xff]  ;;  %v4353_v24 = vld [vmem:[#allocation4 + $0x60] sm:$0xff]  ;;  %v4361_v26 = vld [vmem:[#allocation4 + $0x50] sm:$0xff] }
  0x14   :  { %185 = vmatpush.msra.mxu1 %v4286_v7  ;;  %244 = vmatpush.msra.mxu3 %v4324_v14  ;;  %v4347_v22 = vld [vmem:[#allocation4 + $0x68] sm:$0xff]  ;;  %v4369_v28 = vld [vmem:[#allocation4 + $0x40] sm:$0xff]  ;;  %v4419_v39 = vld [vmem:[#allocation2 + $0x78] sm:$0xff] }
  0x15   :  { %211 = vmatpush.msra.mxu2 %v4286_v7  ;;  %v4365_v27 = vld [vmem:[#allocation4 + $0x48] sm:$0xff]  ;;  %v4380_v30 = vld [vmem:[%s6256_s5] ss:$0 sm:$0xff]  ;;  %506 = vmatpush.msrb.mxu0 %v4419_v39  ;;  %v4423_v40 = vld [vmem:[#allocation2 + $0x70] sm:$0xff] }
  0x16   :  { %186 = vmatpush.msra.mxu1 %v4290_v8  ;;  %245 = vmatpush.msra.mxu3 %v4328_v15  ;;  %v3799_v29 = vld [vmem:[%s6252_s1 + $0x8] sm:$0xff]  ;;  %v4425_v41 = vld [vmem:[#allocation4 + $0xb8] sm:$0xff]  ;;  %v59_v42 = vld [vmem:[%s6251_s0 + $0x10] sm:$0xff] }
  0x17   :  { %212 = vmatpush.msra.mxu2 %v4290_v8  ;;  %3792 = vmatmul.msk.f32.gmra.mxu0 %vm71_vm0, %v58_v20  ;;  %v4432_v43 = vld [vmem:[#allocation2 + $0x68] sm:$0xff]  ;;  %v4434_v44 = vld [vmem:[#allocation4 + $0xb0] sm:$0xff]  ;;  %v4437_v45 = vld [vmem:[#allocation2 + $0x60] sm:$0xff] }
  0x18   :  { %187 = vmatpush.msra.mxu1 %v4294_v9  ;;  %246 = vmatpush.msra.mxu3 %v4331_v16  ;;  %v4439_v46 = vld [vmem:[#allocation4 + $0xa8] sm:$0xff]  ;;  %v4446_v47 = vld [vmem:[#allocation2 + $0x58] sm:$0xff]  ;;  %v4448_v48 = vld [vmem:[#allocation4 + $0xa0] sm:$0xff] }
  0x19   :  { %213 = vmatpush.msra.mxu2 %v4294_v9  ;;  %507 = vmatpush.msrb.mxu0 %v4423_v40  ;;  %v4453_v49 = vld [vmem:[#allocation2 + $0x50] sm:$0xff]  ;;  %v4455_v50 = vld [vmem:[#allocation4 + $0x98] sm:$0xff]  ;;  %v4457_v51 = vld [vmem:[#allocation2 + $0x48] sm:$0xff] }
  0x1a   :  { %188 = vmatpush.msra.mxu1 %v4298_v10  ;;  %247 = vmatpush.msra.mxu3 %v4337_v18  ;;  %v4462_v52 = vld [vmem:[#allocation4 + $0x90] sm:$0xff]  ;;  %v4464_v53 = vld [vmem:[#allocation2 + $0x40] sm:$0xff]  ;;  %v4466_v54 = vld [vmem:[#allocation4 + $0x88] sm:$0xff] }
  0x1b   :  { %3806 = vmatmul.msk.f32.vlgmr.msra.gmra.mxu1 %vm137_vm1, %v146_v11  ;;  %214 = vmatpush.msra.mxu2 %v4298_v10  ;;  %v4474_v55 = vld [vmem:[#allocation4 + $0x80] sm:$0xff]  ;;  %v60_v56 = vld [vmem:[%s6251_s0 + $0x18] sm:$0xff]  ;;  %v62_v63 = vld [vmem:[%s6251_s0 + $0x28] sm:$0xff] }
  0x1c   :  { %274 = vmatpush.msrb.mxu1 %v4333_v17  ;;  %248 = vmatpush.msra.mxu3 %v4345_v21  ;;  %v61_v57 = vld [vmem:[%s6251_s0 + $0x20] sm:$0xff] }
  0x1d   :  { %300 = vmatpush.msrb.mxu2 %v4265_v0  ;;  %508 = vmatpush.msrb.mxu0 %v4432_v43  ;;  %v4494_v58 = vld [vmem:[%s6256_s5 + $0x1] ss:$0 sm:$0xff] }
  0x1e   :  { %275 = vmatpush.msrb.mxu1 %v4339_v19  ;;  %249 = vmatpush.msra.mxu3 %v4351_v23  ;;  %6350 = vst [vmem:[#allocation15_spill] sm:$0xff] %v4494_v58 }
  0x1f   :  { %301 = vmatpush.msrb.mxu2 %v4270_v2  ;;  %3793 = vmatmul.msk.f32.gmra.mxu0 %vm71_vm0, %v59_v42  ;;  %v4564_v42 = vld [vmem:[#allocation4 + $0xf0] sm:$0xff] }
  0x20   :  { %276 = vmatpush.msrb.mxu1 %v4347_v22  ;;  %322 = vmatpush.msrb.mxu3 %v4319_v12 }
  0x21   :  { %302 = vmatpush.msrb.mxu2 %v4279_v5  ;;  %509 = vmatpush.msrb.mxu0 %v4437_v45 }
  0x22   :  { %277 = vmatpush.msrb.mxu1 %v4353_v24  ;;  %323 = vmatpush.msrb.mxu3 %v4321_v13 }
  0x23   :  { %303 = vmatpush.msrb.mxu2 %v4283_v6  ;;  %510 = vmatpush.msrb.mxu0 %v4446_v47 }
  0x24   :  { %278 = vmatpush.msrb.mxu1 %v4359_v25  ;;  %324 = vmatpush.msrb.mxu3 %v4324_v14 }
  0x25   :  { %304 = vmatpush.msrb.mxu2 %v4286_v7  ;;  %511 = vmatpush.msrb.mxu0 %v4453_v49 }
  0x26   :  { %279 = vmatpush.msrb.mxu1 %v4361_v26  ;;  %325 = vmatpush.msrb.mxu3 %v4328_v15 }
  0x27   :  { %305 = vmatpush.msrb.mxu2 %v4290_v8  ;;  %512 = vmatpush.msrb.mxu0 %v4457_v51 }
  0x28   :  { %280 = vmatpush.msrb.mxu1 %v4365_v27  ;;  %326 = vmatpush.msrb.mxu3 %v4331_v16 }
  0x29   :  { %306 = vmatpush.msrb.mxu2 %v4294_v9  ;;  %3794 = vmatmul.msk.f32.gmra.mxu0 %vm71_vm0, %v60_v56  ;;  %v4568_v56 = vld [vmem:[#allocation2 + $0xa0] sm:$0xff] }
  0x2a   :  { %281 = vmatpush.msrb.mxu1 %v4369_v28  ;;  %327 = vmatpush.msrb.mxu3 %v4337_v18 }
  0x2b   :  { %307 = vmatpush.msrb.mxu2 %v4298_v10  ;;  %3810 = vmatmul.msk.f32.vlgmr.msrb.gmra.mxu1 %vm137_vm1, %v3799_v29  ;;  %v3800_v29 = vld [vmem:[%s6252_s1 + $0x10] sm:$0xff] }
  0x2c   :  { %345 = vmatpush.msra.mxu1 %v4333_v17  ;;  %328 = vmatpush.msrb.mxu3 %v4345_v21 }
  0x2d   :  { %513 = vmatpush.msrb.mxu0 %v4464_v53 }
  0x2e   :  { %346 = vmatpush.msra.mxu1 %v4339_v19  ;;  %329 = vmatpush.msrb.mxu3 %v4351_v23 }
  0x2f   :  { %623 = vmatpush.msra.mxu0 %v4265_v0 }
  0x30   :  { %347 = vmatpush.msra.mxu1 %v4347_v22 }
  0x31   :  { %624 = vmatpush.msra.mxu0 %v4270_v2 }
  0x32   :  { %348 = vmatpush.msra.mxu1 %v4353_v24  ;;  %3795 = vmatmul.msk.f32.gmra.mxu0 %vm71_vm0, %v61_v57  ;;  %v4570_v57 = vld [vmem:[#allocation4 + $0xe8] sm:$0xff] }
  0x33   :  { %625 = vmatpush.msra.mxu0 %v4279_v5 }
  0x34   :  { %349 = vmatpush.msra.mxu1 %v4359_v25 }
  0x35   :  { %626 = vmatpush.msra.mxu0 %v4283_v6 }
  0x36   :  { %350 = vmatpush.msra.mxu1 %v4361_v26 }
  0x37   :  { %627 = vmatpush.msra.mxu0 %v4286_v7 }
  0x38   :  { %351 = vmatpush.msra.mxu1 %v4365_v27 }
  0x39   :  { %628 = vmatpush.msra.mxu0 %v4290_v8 }
  0x3a   :  { %352 = vmatpush.msra.mxu1 %v4369_v28  ;;  %3796 = vmatmul.msk.f32.gmra.mxu0 %vm71_vm0, %v62_v63  ;;  %v4584_v63 = vld [vmem:[#allocation2 + $0x88] sm:$0xff] }
  0x3b   :  { %629 = vmatpush.msra.mxu0 %v4294_v9 }
  0x3c   :  { %439 = vmatpush.msrb.mxu1 %v4265_v0 }
  0x3d   :  { %630 = vmatpush.msra.mxu0 %v4298_v10 }
  0x3e   :  { %440 = vmatpush.msrb.mxu1 %v4270_v2 }
  0x40   :  { %441 = vmatpush.msrb.mxu1 %v4279_v5 }
  0x42   :  { %442 = vmatpush.msrb.mxu1 %v4283_v6 }
  0x44   :  { %443 = vmatpush.msrb.mxu1 %v4286_v7  ;;  %v4618_v7 = vld [vmem:[%s6256_s5 + $0x2] ss:$0 sm:$0xff] }
  0x46   :  { %444 = vmatpush.msrb.mxu1 %v4290_v8 }
  0x48   :  { %445 = vmatpush.msrb.mxu1 %v4294_v9 }
  0x4a   :  { %446 = vmatpush.msrb.mxu1 %v4298_v10 }
  0x8c   :  { %v113_v31 = vpop.f32.mrf.mxu0 }
  0x8d   :  { %v114_v32 = vadd.f32 %v4380_v30, %v113_v31  ;;  %v63_v31 = vld [vmem:[%s6251_s0 + $0x30] sm:$0xff] }
  0x8e   :  { %3797 = vmatmul.msk.f32.gmra.mxu0 %vm71_vm0, %v63_v31 }
  0x8f   :  { %138 = vst.msk [vmem:[%s6257_s6] sm:$0xff] %vm137_vm1, %v114_v32 }
  0x94   :  { %v116_v37 = vpop.f32.mrf.mxu0 }
  0x95   :  { %v117_v38 = vadd.f32 %v4380_v30, %v116_v37  ;;  %v4558_v37 = vld [vmem:[#allocation4 + $0xf8] sm:$0xff] }
  0x96   :  { %v161_v33 = vld [vmem:[%s6257_s6] sm:$0xff] }
  0x97   :  { %139 = vst.msk [vmem:[%s6257_s6 + $0x8] sm:$0xff] %vm137_vm1, %v117_v38  ;;  %v4562_v38 = vld [vmem:[#allocation2 + $0xa8] sm:$0xff] }
  0x98   :  { %v190_v34 = vpop.f32.mrf.mxu1 }
  0x99   :  { %v193_v35 = vadd.f32 %v190_v34, %v161_v33  ;;  %v64_v34 = vld [vmem:[%s6251_s0 + $0x38] sm:$0xff] }
  0x9a   :  { %3798 = vmatmul.msk.f32.gmra.mxu0 %vm71_vm0, %v64_v34 }
  0x9b   :  { %4020 = vtanh.f32 %v193_v35  ;;  %v4553_v35 = vld [vmem:[#allocation2 + $0xb8] sm:$0xff] }
  0x9c   :  { %v119_v32 = vpop.f32.mrf.mxu0 }
  0x9d   :  { %v120_v33 = vadd.f32 %v4380_v30, %v119_v32 }
  0x9e   :  { %v195_v59 = vld [vmem:[%s6257_s6 + $0x8] sm:$0xff] }
  0x9f   :  { %140 = vst.msk [vmem:[%s6257_s6 + $0x10] sm:$0xff] %vm137_vm1, %v120_v33 }
  0xa1   :  { %v4021_v36 = vpop.eup %4020 }
  0xa2   :  { %3807 = vmatmul.msk.f32.vlgmr.msra.gmra.mxu2 %vm137_vm1, %v4021_v36  ;;  %3809 = vmatmul.msk.f32.vlgmr.msra.gmra.mxu3 %vm137_vm1, %v4021_v36  ;;  %v4556_v36 = vld [vmem:[#allocation2 + $0xb0] sm:$0xff] }
  0xa3   :  { %381 = vmatpush.msra.mxu2 %v4419_v39  ;;  %413 = vmatpush.msra.mxu3 %v4425_v41 }
  0xa5   :  { %382 = vmatpush.msra.mxu2 %v4423_v40  ;;  %414 = vmatpush.msra.mxu3 %v4434_v44 }
  0xa6   :  { %v288_v32 = vld [vmem:[%s6257_s6 + $0x10] sm:$0xff] }
  0xa7   :  { %383 = vmatpush.msra.mxu2 %v4432_v43  ;;  %415 = vmatpush.msra.mxu3 %v4439_v46 }
  0xa8   :  { %v283_v60 = vpop.f32.mrf.mxu1 }
  0xa9   :  { %384 = vmatpush.msra.mxu2 %v4437_v45  ;;  %416 = vmatpush.msra.mxu3 %v4448_v48 }
  0xab   :  { %385 = vmatpush.msra.mxu2 %v4446_v47  ;;  %417 = vmatpush.msra.mxu3 %v4455_v50 }
  0xad   :  { %386 = vmatpush.msra.mxu2 %v4453_v49  ;;  %418 = vmatpush.msra.mxu3 %v4462_v52 }
  0xaf   :  { %387 = vmatpush.msra.mxu2 %v4457_v51  ;;  %419 = vmatpush.msra.mxu3 %v4466_v54 }
  0xb1   :  { %388 = vmatpush.msra.mxu2 %v4464_v53  ;;  %420 = vmatpush.msra.mxu3 %v4474_v55 }
 0x125   :  { %v216_v61 = vpop.f32.mrf.mxu2  ;;  %v251_v62 = vpop.f32.mrf.mxu3 }
 0x126   :  { %v219_v1 = vadd.f32 %v216_v61, %v195_v59  ;;  %v252_v3 = vadd.f32 %v4494_v58, %v251_v62  ;;  %v4574_v59 = vld [vmem:[#allocation2 + $0x98] sm:$0xff]  ;;  %v4580_v61 = vld [vmem:[#allocation2 + $0x90] sm:$0xff] }
 0x127   :  { %v4582_v62 = vld [vmem:[#allocation4 + $0xd8] sm:$0xff] }
 0x128   :  { %4022 = vtanh.f32 %v219_v1  ;;  %v286_v4 = vadd.f32 %v283_v60, %v252_v3  ;;  %v4576_v60 = vld [vmem:[#allocation4 + $0xe0] sm:$0xff]  ;;  %v4586_v1 = vld [vmem:[#allocation4 + $0xd0] sm:$0xff] }
 0x129   :  { %6351 = vst [vmem:[#allocation16_spill] sm:$0xff] %v4586_v1  ;;  %v4590_v3 = vld [vmem:[#allocation2 + $0x80] sm:$0xff] }
 0x12a   :  { %4024 = vtanh.f32 %v286_v4  ;;  %v4592_v4 = vld [vmem:[#allocation4 + $0xc8] sm:$0xff] }
 0x12b   :  { %6352 = vst [vmem:[#allocation17_spill] sm:$0xff] %v4592_v4 }
 0x12e   :  { %v4023_v11 = vpop.eup %4022 }
 0x12f   :  { %3811 = vmatmul.msk.f32.vlgmr.msrb.gmra.mxu2 %vm137_vm1, %v4023_v11  ;;  %3812 = vmatmul.msk.f32.vlgmr.msrb.gmra.mxu3 %vm137_vm1, %v4023_v11  ;;  %v4598_v11 = vld [vmem:[#allocation4 + $0xc0] sm:$0xff] }
 0x130   :  { %v4025_v20 = vpop.eup %4024  ;;  %461 = vmatpush.msrb.mxu2 %v4319_v12  ;;  %484 = vmatpush.msrb.mxu3 %v4333_v17  ;;  %6353 = vst [vmem:[#allocation18_spill] sm:$0xff] %v4598_v11 }
 0x131   :  { %3813 = vmatmul.msk.f32.vlgmr.msra.gmra.mxu1 %vm137_vm1, %v4025_v20 }
 0x132   :  { %462 = vmatpush.msrb.mxu2 %v4321_v13  ;;  %485 = vmatpush.msrb.mxu3 %v4339_v19 }
 0x133   :  { %529 = vmatpush.msra.mxu1 %v4425_v41 }
 0x134   :  { %463 = vmatpush.msrb.mxu2 %v4324_v14  ;;  %486 = vmatpush.msrb.mxu3 %v4347_v22 }
 0x135   :  { %530 = vmatpush.msra.mxu1 %v4434_v44 }
 0x136   :  { %464 = vmatpush.msrb.mxu2 %v4328_v15  ;;  %487 = vmatpush.msrb.mxu3 %v4353_v24 }
 0x137   :  { %3815 = vmatmul.msk.f32.vlgmr.msra.gmra.mxu2 %vm137_vm1, %v4025_v20  ;;  %3816 = vmatmul.msk.f32.vlgmr.msra.gmra.mxu3 %vm137_vm1, %v3800_v29  ;;  %v122_v20 = vpop.f32.mrf.mxu0 }
 0x138   :  { %465 = vmatpush.msrb.mxu2 %v4331_v16  ;;  %488 = vmatpush.msrb.mxu3 %v4359_v25  ;;  %v123_v29 = vadd.f32 %v4380_v30, %v122_v20 }
 0x139   :  { %531 = vmatpush.msra.mxu1 %v4439_v46 }
 0x13a   :  { %466 = vmatpush.msrb.mxu2 %v4337_v18  ;;  %489 = vmatpush.msrb.mxu3 %v4361_v26  ;;  %141 = vst.msk [vmem:[%s6257_s6 + $0x18] sm:$0xff] %vm137_vm1, %v123_v29 }
 0x13b   :  { %532 = vmatpush.msra.mxu1 %v4448_v48 }
 0x13c   :  { %467 = vmatpush.msrb.mxu2 %v4345_v21  ;;  %490 = vmatpush.msrb.mxu3 %v4365_v27 }
 0x13d   :  { %533 = vmatpush.msra.mxu1 %v4455_v50 }
 0x13e   :  { %468 = vmatpush.msrb.mxu2 %v4351_v23  ;;  %491 = vmatpush.msrb.mxu3 %v4369_v28 }
 0x13f   :  { %534 = vmatpush.msra.mxu1 %v4462_v52  ;;  %v125_v31 = vpop.f32.mrf.mxu0 }
 0x140   :  { %565 = vmatpush.msra.mxu2 %v4553_v35  ;;  %597 = vmatpush.msra.mxu3 %v4558_v37  ;;  %v126_v33 = vadd.f32 %v4380_v30, %v125_v31 }
 0x141   :  { %535 = vmatpush.msra.mxu1 %v4466_v54 }
 0x142   :  { %566 = vmatpush.msra.mxu2 %v4556_v36  ;;  %598 = vmatpush.msra.mxu3 %v4564_v42  ;;  %142 = vst.msk [vmem:[%s6257_s6 + $0x20] sm:$0xff] %vm137_vm1, %v126_v33 }
 0x143   :  { %536 = vmatpush.msra.mxu1 %v4474_v55 }
 0x144   :  { %567 = vmatpush.msra.mxu2 %v4562_v38  ;;  %599 = vmatpush.msra.mxu3 %v4570_v57 }
 0x146   :  { %568 = vmatpush.msra.mxu2 %v4568_v56  ;;  %600 = vmatpush.msra.mxu3 %v4576_v60 }
 0x147   :  { %v128_v31 = vpop.f32.mrf.mxu0 }
 0x148   :  { %569 = vmatpush.msra.mxu2 %v4574_v59  ;;  %601 = vmatpush.msra.mxu3 %v4582_v62  ;;  %v129_v6 = vadd.f32 %v4380_v30, %v128_v31  ;;  %v4697_v31 = vld [vmem:[#allocation2 + $0xf0] sm:$0xff] }
 0x14a   :  { %570 = vmatpush.msra.mxu2 %v4580_v61  ;;  %602 = vmatpush.msra.mxu3 %v4586_v1  ;;  %143 = vst.msk [vmem:[%s6257_s6 + $0x28] sm:$0xff] %vm137_vm1, %v129_v6 }
 0x14c   :  { %571 = vmatpush.msra.mxu2 %v4584_v63  ;;  %603 = vmatpush.msra.mxu3 %v4592_v4 }
 0x14e   :  { %572 = vmatpush.msra.mxu2 %v4590_v3  ;;  %604 = vmatpush.msra.mxu3 %v4598_v11 }
 0x14f   :  { %v131_v6 = vpop.f32.mrf.mxu0 }
 0x150   :  { %v132_v33 = vadd.f32 %v4380_v30, %v131_v6 }
 0x152   :  { %144 = vst.msk [vmem:[%s6257_s6 + $0x30] sm:$0xff] %vm137_vm1, %v132_v33 }
 0x1ae   :  { %v354_v8 = vpop.f32.mrf.mxu1 }
 0x1b2   :  { %v309_v34 = vpop.f32.mrf.mxu2  ;;  %v331_v10 = vpop.f32.mrf.mxu3 }
 0x1b3   :  { %v312_v20 = vadd.f32 %v309_v34, %v288_v32  ;;  %v332_v9 = vadd.f32 %v4494_v58, %v331_v10  ;;  %v134_v34 = vpop.f32.mrf.mxu0 }
 0x1b5   :  { %4026 = vtanh.f32 %v312_v20  ;;  %v357_v29 = vadd.f32 %v354_v8, %v332_v9  ;;  %v135_v20 = vadd.f32 %v4380_v30, %v134_v34  ;;  %v4706_v30 = vld [vmem:[#allocation2 + $0xd8] sm:$0xff] }
 0x1b6   :  { %6356 = vst [vmem:[#allocation21_spill] sm:$0xff] %v4706_v30 }
 0x1b7   :  { %4028 = vtanh.f32 %v357_v29  ;;  %145 = vst.msk [vmem:[%s6257_s6 + $0x38] sm:$0xff] %vm137_vm1, %v135_v20  ;;  %v4694_v29 = vld [vmem:[#allocation2 + $0xf8] sm:$0xff] }
 0x1ba   :  { %v390_v5 = vpop.f32.mrf.mxu2  ;;  %v422_v2 = vpop.f32.mrf.mxu3 }
 0x1bb   :  { %v4027_v10 = vpop.eup %4026  ;;  %v391_v32 = vadd.f32 %v4618_v7, %v390_v5 }
 0x1bc   :  { %3817 = vmatmul.msk.f32.vlgmr.msrb.gmra.mxu1 %vm137_vm1, %v4027_v10  ;;  %3818 = vmatmul.msk.f32.vlgmr.msrb.gmra.mxu2 %vm137_vm1, %v4027_v10  ;;  %v4700_v10 = vld [vmem:[#allocation2 + $0xe8] sm:$0xff] }
 0x1bd   :  { %v4029_v8 = vpop.eup %4028  ;;  %v425_v9 = vadd.f32 %v422_v2, %v391_v32  ;;  %645 = vmatpush.msrb.mxu1 %v4319_v12  ;;  %668 = vmatpush.msrb.mxu2 %v4333_v17  ;;  %v3801_v2 = vld [vmem:[%s6252_s1 + $0x18] sm:$0xff]  ;;  %6354 = vst [vmem:[#allocation19_spill] sm:$0xff] %v4700_v10  ;;  %v4703_v32 = vld [vmem:[#allocation2 + $0xe0] sm:$0xff] }
 0x1be   :  { %3819 = vmatmul.msk.f32.vlgmr.msrb.gmra.mxu3 %vm137_vm1, %v4029_v8  ;;  %3820 = vmatmul.msk.f32.vlgmr.msrb.gmra.mxu0 %vm137_vm1, %v4029_v8  ;;  %6355 = vst [vmem:[#allocation20_spill] sm:$0xff] %v4703_v32  ;;  %v4709_v8 = vld [vmem:[#allocation2 + $0xd0] sm:$0xff] }
 0x1bf   :  { %4030 = vtanh.f32 %v425_v9  ;;  %646 = vmatpush.msrb.mxu1 %v4321_v13  ;;  %690 = vmatpush.msrb.mxu3 %v4419_v39  ;;  %6357 = vst [vmem:[#allocation22_spill] sm:$0xff] %v4709_v8  ;;  %v4711_v9 = vld [vmem:[#allocation2 + $0xc8] sm:$0xff] }
 0x1c0   :  { %669 = vmatpush.msrb.mxu2 %v4339_v19  ;;  %713 = vmatpush.msrb.mxu0 %v4425_v41  ;;  %6358 = vst [vmem:[#allocation23_spill] sm:$0xff] %v4711_v9 }
 0x1c1   :  { %647 = vmatpush.msrb.mxu1 %v4324_v14  ;;  %691 = vmatpush.msrb.mxu3 %v4423_v40 }
 0x1c2   :  { %670 = vmatpush.msrb.mxu2 %v4347_v22  ;;  %714 = vmatpush.msrb.mxu0 %v4434_v44 }
 0x1c3   :  { %648 = vmatpush.msrb.mxu1 %v4328_v15  ;;  %692 = vmatpush.msrb.mxu3 %v4432_v43 }
 0x1c4   :  { %671 = vmatpush.msrb.mxu2 %v4353_v24  ;;  %715 = vmatpush.msrb.mxu0 %v4439_v46 }
 0x1c5   :  { %v4031_v5 = vpop.eup %4030  ;;  %649 = vmatpush.msrb.mxu1 %v4331_v16  ;;  %693 = vmatpush.msrb.mxu3 %v4437_v45 }
 0x1c6   :  { %3821 = vmatmul.msk.f32.vlgmr.msra.gmra.mxu1 %vm137_vm1, %v4031_v5  ;;  %3823 = vmatmul.msk.f32.vlgmr.msra.gmra.mxu2 %vm137_vm1, %v4031_v5  ;;  %v427_v5 = vld [vmem:[%s6257_s6 + $0x18] sm:$0xff] }
 0x1c7   :  { %3824 = vmatmul.msk.f32.vlgmr.msra.gmra.mxu3 %vm137_vm1, %v3801_v2  ;;  %650 = vmatpush.msrb.mxu1 %v4337_v18  ;;  %v4714_v2 = vld [vmem:[#allocation2 + $0xc0] sm:$0xff] }
 0x1c8   :  { %672 = vmatpush.msrb.mxu2 %v4359_v25  ;;  %694 = vmatpush.msrb.mxu3 %v4446_v47  ;;  %6359 = vst [vmem:[#allocation24_spill] sm:$0xff] %v4714_v2 }
 0x1c9   :  { %651 = vmatpush.msrb.mxu1 %v4345_v21  ;;  %716 = vmatpush.msrb.mxu0 %v4448_v48 }
 0x1ca   :  { %673 = vmatpush.msrb.mxu2 %v4361_v26  ;;  %695 = vmatpush.msrb.mxu3 %v4453_v49 }
 0x1cb   :  { %652 = vmatpush.msrb.mxu1 %v4351_v23  ;;  %717 = vmatpush.msrb.mxu0 %v4455_v50 }
 0x1cc   :  { %674 = vmatpush.msrb.mxu2 %v4365_v27  ;;  %696 = vmatpush.msrb.mxu3 %v4457_v51 }
 0x1cd   :  { %735 = vmatpush.msra.mxu1 %v4553_v35  ;;  %718 = vmatpush.msrb.mxu0 %v4462_v52 }
 0x1ce   :  { %675 = vmatpush.msrb.mxu2 %v4369_v28  ;;  %697 = vmatpush.msrb.mxu3 %v4464_v53 }
 0x1cf   :  { %736 = vmatpush.msra.mxu1 %v4556_v36  ;;  %719 = vmatpush.msrb.mxu0 %v4466_v54 }
 0x1d0   :  { %758 = vmatpush.msra.mxu2 %v4558_v37  ;;  %794 = vmatpush.msra.mxu3 %v4694_v29 }
 0x1d1   :  { %737 = vmatpush.msra.mxu1 %v4562_v38  ;;  %720 = vmatpush.msrb.mxu0 %v4474_v55 }
 0x1d2   :  { %759 = vmatpush.msra.mxu2 %v4564_v42  ;;  %795 = vmatpush.msra.mxu3 %v4697_v31 }
 0x1d3   :  { %738 = vmatpush.msra.mxu1 %v4568_v56 }
 0x1d4   :  { %760 = vmatpush.msra.mxu2 %v4570_v57  ;;  %796 = vmatpush.msra.mxu3 %v4700_v10 }
 0x1d5   :  { %739 = vmatpush.msra.mxu1 %v4574_v59 }
 0x1d6   :  { %761 = vmatpush.msra.mxu2 %v4576_v60  ;;  %797 = vmatpush.msra.mxu3 %v4703_v32  ;;  %v4722_v32 = vld [vmem:[#allocation4 + $0x138] sm:$0xff] }
 0x1d7   :  { %740 = vmatpush.msra.mxu1 %v4580_v61 }
 0x1d8   :  { %762 = vmatpush.msra.mxu2 %v4582_v62  ;;  %798 = vmatpush.msra.mxu3 %v4706_v30 }
 0x1d9   :  { %741 = vmatpush.msra.mxu1 %v4584_v63 }
 0x1da   :  { %763 = vmatpush.msra.mxu2 %v4586_v1  ;;  %799 = vmatpush.msra.mxu3 %v4709_v8 }
 0x1db   :  { %742 = vmatpush.msra.mxu1 %v4590_v3 }
 0x1dc   :  { %764 = vmatpush.msra.mxu2 %v4592_v4  ;;  %800 = vmatpush.msra.mxu3 %v4711_v9 }
 0x1de   :  { %765 = vmatpush.msra.mxu2 %v4598_v11  ;;  %801 = vmatpush.msra.mxu3 %v4714_v2  ;;  %v4727_v2 = vld [vmem:[#allocation4 + $0x130] sm:$0xff] }
 0x239   :  { %v448_v6 = vpop.f32.mrf.mxu1 }
 0x23a   :  { %v451_v33 = vadd.f32 %v448_v6, %v427_v5  ;;  %v4731_v6 = vld [vmem:[#allocation4 + $0x128] sm:$0xff] }
 0x23b   :  { %v515_v34 = vpop.f32.mrf.mxu0  ;;  %6360 = vst [vmem:[#allocation25_spill] sm:$0xff] %v4731_v6 }
 0x23c   :  { %4032 = vtanh.f32 %v451_v33  ;;  %v516_v4 = vadd.f32 %v4618_v7, %v515_v34 }
 0x23f   :  { %v470_v20 = vpop.f32.mrf.mxu2 }
 0x240   :  { %v471_v30 = vadd.f32 %v4494_v58, %v470_v20  ;;  %v6366_v20 = vld [vmem:[#allocation10_spill] sm:$0xff] }
 0x241   :  { %v493_v11 = vpop.f32.mrf.mxu3 }
 0x242   :  { %v4033_v8 = vpop.eup %4032  ;;  %v496_v9 = vadd.f32 %v493_v11, %v471_v30  ;;  %v4736_v11 = vld [vmem:[%s6256_s5 + $0x3] ss:$0 sm:$0xff] }
 0x243   :  { %v538_v10 = vpop.f32.mrf.mxu1  ;;  %3825 = vmatmul.msk.f32.vlgmr.msra.gmra.mxu0 %vm137_vm1, %v4033_v8  ;;  %3826 = vmatmul.msk.f32.vlgmr.msrb.gmra.mxu1 %vm137_vm1, %v4033_v8  ;;  %6361 = vst [vmem:[#allocation26_spill] sm:$0xff] %v4736_v11  ;;  %v6362_v30 = vld [vmem:[#allocation8_spill] sm:$0xff] }
 0x244   :  { %4034 = vtanh.f32 %v496_v9  ;;  %v541_v5 = vadd.f32 %v538_v10, %v516_v4  ;;  %826 = vmatpush.msra.mxu0 %v4722_v32  ;;  %852 = vmatpush.msrb.mxu1 %v4265_v0  ;;  %v4740_v8 = vld [vmem:[#allocation4 + $0x120] sm:$0xff]  ;;  %v6364_v4 = vld [vmem:[#allocation9_spill] sm:$0xff]  ;;  %v4744_v0 = vld [vmem:[#allocation4 + $0x118] sm:$0xff] }
 0x245   :  { %6363 = vst [vmem:[#allocation8_spill] sm:$0xff] %v4740_v8 }
 0x246   :  { %4036 = vtanh.f32 %v541_v5  ;;  %827 = vmatpush.msra.mxu0 %v4727_v2  ;;  %853 = vmatpush.msrb.mxu1 %v6362_v30  ;;  %6365 = vst [vmem:[#allocation9_spill] sm:$0xff] %v4744_v0  ;;  %v4751_v5 = vld [vmem:[#allocation4 + $0x110] sm:$0xff] }
 0x247   :  { %6367 = vst [vmem:[#allocation10_spill] sm:$0xff] %v4751_v5 }
 0x248   :  { %828 = vmatpush.msra.mxu0 %v4731_v6  ;;  %854 = vmatpush.msrb.mxu1 %v6364_v4  ;;  %v4757_v4 = vld [vmem:[#allocation4 + $0x108] sm:$0xff] }
 0x249   :  { %v574_v10 = vpop.f32.mrf.mxu2 }
 0x24a   :  { %v4035_v9 = vpop.eup %4034  ;;  %v575_v33 = vadd.f32 %v4736_v11, %v574_v10  ;;  %v606_v34 = vpop.f32.mrf.mxu3  ;;  %829 = vmatpush.msra.mxu0 %v4740_v8  ;;  %855 = vmatpush.msrb.mxu1 %v6366_v20  ;;  %v4761_v10 = vld [vmem:[#allocation4 + $0x100] sm:$0xff] }
 0x24b   :  { %3827 = vmatmul.msk.f32.vlgmr.msrb.gmra.mxu2 %vm137_vm1, %v4035_v9  ;;  %3828 = vmatmul.msk.f32.vlgmr.msrb.gmra.mxu3 %vm137_vm1, %v4035_v9  ;;  %v6368_v9 = vld [vmem:[#allocation11_spill] sm:$0xff] }
 0x24c   :  { %v4037_v30 = vpop.eup %4036  ;;  %v609_v6 = vadd.f32 %v606_v34, %v575_v33  ;;  %830 = vmatpush.msra.mxu0 %v4744_v0  ;;  %874 = vmatpush.msrb.mxu2 %v4319_v12  ;;  %v6369_v33 = vld [vmem:[#allocation12_spill] sm:$0xff]  ;;  %v6370_v34 = vld [vmem:[#allocation13_spill] sm:$0xff] }
 0x24d   :  { %3829 = vmatmul.msk.f32.vlgmr.msrb.gmra.mxu0 %vm137_vm1, %v4037_v30  ;;  %3830 = vmatmul.msk.f32.vlgmr.msra.gmra.mxu1 %vm137_vm1, %v4037_v30  ;;  %v6376_v30 = vld [vmem:[#allocation21_spill] sm:$0xff] }
 0x24e   :  { %4038 = vtanh.f32 %v609_v6  ;;  %831 = vmatpush.msra.mxu0 %v4751_v5  ;;  %875 = vmatpush.msrb.mxu2 %v4321_v13  ;;  %v3802_v6 = vld [vmem:[%s6252_s1 + $0x20] sm:$0xff] }
 0x24f   :  { %897 = vmatpush.msrb.mxu3 %v4333_v17  ;;  %856 = vmatpush.msrb.mxu1 %v6368_v9  ;;  %v6377_v9 = vld [vmem:[#allocation22_spill] sm:$0xff] }
 0x250   :  { %832 = vmatpush.msra.mxu0 %v4757_v4  ;;  %876 = vmatpush.msrb.mxu2 %v4324_v14 }
 0x251   :  { %898 = vmatpush.msrb.mxu3 %v4339_v19  ;;  %857 = vmatpush.msrb.mxu1 %v6369_v33  ;;  %v6378_v33 = vld [vmem:[#allocation23_spill] sm:$0xff] }
 0x252   :  { %833 = vmatpush.msra.mxu0 %v4761_v10  ;;  %877 = vmatpush.msrb.mxu2 %v4328_v15  ;;  %v6371_v15 = vld [vmem:[#allocation14_spill] sm:$0xff] }
 0x253   :  { %899 = vmatpush.msrb.mxu3 %v4347_v22  ;;  %858 = vmatpush.msrb.mxu1 %v6370_v34  ;;  %v611_v34 = vld [vmem:[%s6257_s6 + $0x20] sm:$0xff] }
 0x254   :  { %v4039_v20 = vpop.eup %4038  ;;  %878 = vmatpush.msrb.mxu2 %v4331_v16  ;;  %919 = vmatpush.msrb.mxu0 %v4419_v39  ;;  %v6372_v16 = vld [vmem:[#allocation19_spill] sm:$0xff] }
 0x255   :  { %3831 = vmatmul.msk.f32.vlgmr.msra.gmra.mxu2 %vm137_vm1, %v4039_v20  ;;  %3833 = vmatmul.msk.f32.vlgmr.msra.gmra.mxu3 %vm137_vm1, %v4039_v20 }
 0x256   :  { %3834 = vmatmul.msk.f32.vlgmr.msra.gmra.mxu0 %vm137_vm1, %v3802_v6  ;;  %879 = vmatpush.msrb.mxu2 %v4337_v18  ;;  %v6373_v18 = vld [vmem:[#allocation17_spill] sm:$0xff]  ;;  %v6379_v6 = vld [vmem:[#allocation24_spill] sm:$0xff] }
 0x257   :  { %900 = vmatpush.msrb.mxu3 %v4353_v24  ;;  %859 = vmatpush.msrb.mxu1 %v6371_v15 }
 0x258   :  { %880 = vmatpush.msrb.mxu2 %v4345_v21  ;;  %920 = vmatpush.msrb.mxu0 %v4423_v40  ;;  %v6374_v21 = vld [vmem:[#allocation20_spill] sm:$0xff] }
 0x259   :  { %901 = vmatpush.msrb.mxu3 %v4359_v25  ;;  %942 = vmatpush.msra.mxu1 %v4425_v41 }
 0x25a   :  { %881 = vmatpush.msrb.mxu2 %v4351_v23  ;;  %921 = vmatpush.msrb.mxu0 %v4432_v43  ;;  %v6375_v23 = vld [vmem:[#allocation18_spill] sm:$0xff] }
 0x25b   :  { %902 = vmatpush.msrb.mxu3 %v4361_v26  ;;  %943 = vmatpush.msra.mxu1 %v4434_v44 }
 0x25c   :  { %964 = vmatpush.msra.mxu2 %v4553_v35  ;;  %922 = vmatpush.msrb.mxu0 %v4437_v45 }
 0x25d   :  { %903 = vmatpush.msrb.mxu3 %v4365_v27  ;;  %944 = vmatpush.msra.mxu1 %v4439_v46 }
 0x25e   :  { %965 = vmatpush.msra.mxu2 %v4556_v36  ;;  %923 = vmatpush.msrb.mxu0 %v4446_v47 }
 0x25f   :  { %904 = vmatpush.msrb.mxu3 %v4369_v28  ;;  %945 = vmatpush.msra.mxu1 %v4448_v48 }
 0x260   :  { %966 = vmatpush.msra.mxu2 %v4562_v38  ;;  %924 = vmatpush.msrb.mxu0 %v4453_v49 }
 0x261   :  { %987 = vmatpush.msra.mxu3 %v4558_v37  ;;  %946 = vmatpush.msra.mxu1 %v4455_v50 }
 0x262   :  { %967 = vmatpush.msra.mxu2 %v4568_v56  ;;  %925 = vmatpush.msrb.mxu0 %v4457_v51 }
 0x263   :  { %988 = vmatpush.msra.mxu3 %v4564_v42  ;;  %947 = vmatpush.msra.mxu1 %v4462_v52 }
 0x264   :  { %968 = vmatpush.msra.mxu2 %v4574_v59  ;;  %926 = vmatpush.msrb.mxu0 %v4464_v53 }
 0x265   :  { %989 = vmatpush.msra.mxu3 %v4570_v57  ;;  %948 = vmatpush.msra.mxu1 %v4466_v54 }
 0x266   :  { %969 = vmatpush.msra.mxu2 %v4580_v61  ;;  %1009 = vmatpush.msra.mxu0 %v4694_v29 }
 0x267   :  { %990 = vmatpush.msra.mxu3 %v4576_v60  ;;  %949 = vmatpush.msra.mxu1 %v4474_v55 }
 0x268   :  { %970 = vmatpush.msra.mxu2 %v4584_v63  ;;  %1010 = vmatpush.msra.mxu0 %v4697_v31 }
 0x269   :  { %991 = vmatpush.msra.mxu3 %v4582_v62 }
 0x26a   :  { %971 = vmatpush.msra.mxu2 %v4590_v3  ;;  %1011 = vmatpush.msra.mxu0 %v6372_v16  ;;  %v6383_v16 = vld [vmem:[#allocation25_spill] sm:$0xff] }
 0x26b   :  { %992 = vmatpush.msra.mxu3 %v4586_v1 }
 0x26c   :  { %1012 = vmatpush.msra.mxu0 %v6374_v21 }
 0x26d   :  { %993 = vmatpush.msra.mxu3 %v6373_v18  ;;  %v4832_v18 = vld [vmem:[#allocation2 + $0x138] sm:$0xff] }
 0x26e   :  { %1013 = vmatpush.msra.mxu0 %v6376_v30  ;;  %6380 = vst [vmem:[#allocation11_spill] sm:$0xff] %v4832_v18 }
 0x26f   :  { %994 = vmatpush.msra.mxu3 %v6375_v23 }
 0x270   :  { %1014 = vmatpush.msra.mxu0 %v6377_v9  ;;  %v4836_v9 = vld [vmem:[#allocation2 + $0x130] sm:$0xff] }
 0x272   :  { %1015 = vmatpush.msra.mxu0 %v6378_v33 }
 0x274   :  { %1016 = vmatpush.msra.mxu0 %v6379_v6  ;;  %v4840_v6 = vld [vmem:[#allocation2 + $0x128] sm:$0xff] }
 0x275   :  { %6381 = vst [vmem:[#allocation12_spill] sm:$0xff] %v4840_v6 }
 0x2c0   :  { %v632_v20 = vpop.f32.mrf.mxu0  ;;  %v654_v1 = vpop.f32.mrf.mxu1 }
 0x2c1   :  { %v635_v15 = vadd.f32 %v632_v20, %v611_v34  ;;  %v655_v33 = vadd.f32 %v4494_v58, %v654_v1  ;;  %v4854_v58 = vld [vmem:[#allocation2 + $0x110] sm:$0xff] }
 0x2c2   :  { %6385 = vst [vmem:[#allocation25_spill] sm:$0xff] %v4854_v58 }
 0x2c3   :  { %4040 = vtanh.f32 %v635_v15  ;;  %v4845_v15 = vld [vmem:[#allocation2 + $0x120] sm:$0xff] }
 0x2c4   :  { %6382 = vst [vmem:[#allocation13_spill] sm:$0xff] %v4845_v15 }
 0x2c9   :  { %v4041_v21 = vpop.eup %4040 }
 0x2ca   :  { %3835 = vmatmul.msk.f32.vlgmr.msrb.gmra.mxu1 %vm137_vm1, %v4041_v21  ;;  %3836 = vmatmul.msk.f32.vlgmr.msrb.gmra.mxu2 %vm137_vm1, %v4041_v21  ;;  %v722_v23 = vpop.f32.mrf.mxu0 }
 0x2cb   :  { %1032 = vmatpush.msrb.mxu1 %v4722_v32  ;;  %1068 = vmatpush.msrb.mxu2 %v4832_v18  ;;  %v4850_v18 = vld [vmem:[#allocation2 + $0x118] sm:$0xff] }
 0x2cc   :  { %6384 = vst [vmem:[#allocation14_spill] sm:$0xff] %v4850_v18 }
 0x2cd   :  { %1033 = vmatpush.msrb.mxu1 %v4727_v2  ;;  %1069 = vmatpush.msrb.mxu2 %v4836_v9 }
 0x2ce   :  { %v677_v34 = vpop.f32.mrf.mxu2  ;;  %v699_v20 = vpop.f32.mrf.mxu3 }
 0x2cf   :  { %v680_v21 = vadd.f32 %v677_v34, %v655_v33  ;;  %v700_v30 = vadd.f32 %v4618_v7, %v699_v20  ;;  %1034 = vmatpush.msrb.mxu1 %v6383_v16  ;;  %1070 = vmatpush.msrb.mxu2 %v4840_v6  ;;  %v744_v33 = vpop.f32.mrf.mxu1  ;;  %v4858_v34 = vld [vmem:[#allocation2 + $0x108] sm:$0xff]  ;;  %v4863_v20 = vld [vmem:[%s6256_s5 + $0x4] ss:$0 sm:$0xff] }
 0x2d1   :  { %4042 = vtanh.f32 %v680_v21  ;;  %v725_v1 = vadd.f32 %v722_v23, %v700_v30  ;;  %1035 = vmatpush.msrb.mxu1 %v4740_v8  ;;  %1071 = vmatpush.msrb.mxu2 %v4845_v15  ;;  %v4867_v23 = vld [vmem:[#allocation4 + $0x178] sm:$0xff]  ;;  %v745_v21 = vadd.f32 %v4736_v11, %v744_v33  ;;  %v4874_v15 = vld [vmem:[#allocation4 + $0x170] sm:$0xff]  ;;  %v4883_v33 = vld [vmem:[#allocation4 + $0x168] sm:$0xff] }
 0x2d2   :  { %v4887_v11 = vld [vmem:[#allocation4 + $0x160] sm:$0xff] }
 0x2d3   :  { %4044 = vtanh.f32 %v725_v1  ;;  %1036 = vmatpush.msrb.mxu1 %v4744_v0  ;;  %1072 = vmatpush.msrb.mxu2 %v4850_v18  ;;  %v835_v1 = vpop.f32.mrf.mxu0 }
 0x2d5   :  { %1037 = vmatpush.msrb.mxu1 %v4751_v5  ;;  %1073 = vmatpush.msrb.mxu2 %v4854_v58  ;;  %v4876_v5 = vld [vmem:[#allocation2 + $0x100] sm:$0xff] }
 0x2d7   :  { %v4043_v30 = vpop.eup %4042  ;;  %1038 = vmatpush.msrb.mxu1 %v4757_v4  ;;  %1074 = vmatpush.msrb.mxu2 %v4858_v34 }
 0x2d8   :  { %v767_v18 = vpop.f32.mrf.mxu2  ;;  %v803_v0 = vpop.f32.mrf.mxu3  ;;  %3837 = vmatmul.msk.f32.vlgmr.msrb.gmra.mxu3 %vm137_vm1, %v4043_v30  ;;  %3838 = vmatmul.msk.f32.vlgmr.msrb.gmra.mxu0 %vm137_vm1, %v4043_v30 }
 0x2d9   :  { %v4045_v58 = vpop.eup %4044  ;;  %v770_v8 = vadd.f32 %v767_v18, %v745_v21  ;;  %v804_v6 = vadd.f32 %v4863_v20, %v803_v0  ;;  %1100 = vmatpush.msrb.mxu3 %v4867_v23  ;;  %1039 = vmatpush.msrb.mxu1 %v4761_v10  ;;  %v4889_v18 = vld [vmem:[#allocation4 + $0x38] sm:$0xff]  ;;  %v4903_v0 = vld [vmem:[#allocation4 + $0x150] sm:$0xff] }
 0x2da   :  { %3839 = vmatmul.msk.f32.vlgmr.msra.gmra.mxu1 %vm137_vm1, %v4045_v58  ;;  %3840 = vmatmul.msk.f32.vlgmr.msra.gmra.mxu2 %vm137_vm1, %v4045_v58  ;;  %v4895_v58 = vld [vmem:[#allocation4 + $0x158] sm:$0xff] }
 0x2db   :  { %4046 = vtanh.f32 %v770_v8  ;;  %v838_v30 = vadd.f32 %v835_v1, %v804_v6  ;;  %1101 = vmatpush.msrb.mxu3 %v4874_v15  ;;  %1075 = vmatpush.msrb.mxu2 %v4876_v5  ;;  %v4897_v8 = vld [vmem:[#allocation4 + $0x30] sm:$0xff]  ;;  %v4916_v6 = vld [vmem:[#allocation4 + $0x20] sm:$0xff]  ;;  %v4924_v21 = vld [vmem:[#allocation4 + $0x18] sm:$0xff] }
 0x2dc   :  { %1126 = vmatpush.msrb.mxu0 %v4889_v18  ;;  %1148 = vmatpush.msra.mxu1 %v4319_v12  ;;  %v4905_v12 = vld [vmem:[#allocation4 + $0x28] sm:$0xff] }
 0x2dd   :  { %4048 = vtanh.f32 %v838_v30  ;;  %1102 = vmatpush.msrb.mxu3 %v4883_v33  ;;  %1171 = vmatpush.msra.mxu2 %v4333_v17  ;;  %v3803_v1 = vld [vmem:[%s6252_s1 + $0x28] sm:$0xff]  ;;  %v4154_v30 = vld [vmem:[#allocation2 + $0x18] sm:$0xff] }
 0x2de   :  { %1127 = vmatpush.msrb.mxu0 %v4897_v8  ;;  %1149 = vmatpush.msra.mxu1 %v4321_v13  ;;  %v4913_v13 = vld [vmem:[#allocation4 + $0x148] sm:$0xff] }
 0x2df   :  { %1103 = vmatpush.msrb.mxu3 %v4887_v11  ;;  %1172 = vmatpush.msra.mxu2 %v4339_v19 }
 0x2e0   :  { %1128 = vmatpush.msrb.mxu0 %v4905_v12  ;;  %1150 = vmatpush.msra.mxu1 %v4324_v14  ;;  %v4921_v14 = vld [vmem:[#allocation4 + $0x140] sm:$0xff] }
 0x2e1   :  { %v4047_v17 = vpop.eup %4046  ;;  %1104 = vmatpush.msrb.mxu3 %v4895_v58  ;;  %1173 = vmatpush.msra.mxu2 %v4347_v22  ;;  %v4152_v22 = vld [vmem:[#allocation2 + $0x20] sm:$0xff] }
 0x2e2   :  { %3841 = vmatmul.msk.f32.vlgmr.msra.gmra.mxu3 %vm137_vm1, %v4047_v17  ;;  %3842 = vmatmul.msk.f32.vlgmr.msra.gmra.mxu0 %vm137_vm1, %v4047_v17  ;;  %v4932_v17 = vld [vmem:[#allocation4 + $0x10] sm:$0xff] }
 0x2e3   :  { %v4049_v19 = vpop.eup %4048  ;;  %1105 = vmatpush.msrb.mxu3 %v4903_v0  ;;  %1129 = vmatpush.msrb.mxu0 %v4916_v6 }
 0x2e4   :  { %3843 = vmatmul.msk.f32.vlgmr.msrb.gmra.mxu1 %vm137_vm1, %v4049_v19  ;;  %3845 = vmatmul.msk.f32.vlgmr.msrb.gmra.mxu2 %vm137_vm1, %v4049_v19  ;;  %v4156_v19 = vld [vmem:[#allocation2 + $0x10] sm:$0xff] }
 0x2e5   :  { %1106 = vmatpush.msrb.mxu3 %v4913_v13  ;;  %1151 = vmatpush.msra.mxu1 %v4152_v22  ;;  %v4158_v22 = vld [vmem:[#allocation2 + $0x8] sm:$0xff] }
 0x2e6   :  { %1130 = vmatpush.msrb.mxu0 %v4924_v21  ;;  %1174 = vmatpush.msra.mxu2 %v4353_v24  ;;  %v4938_v24 = vld [vmem:[#allocation4 + $0x8] sm:$0xff] }
 0x2e7   :  { %1107 = vmatpush.msrb.mxu3 %v4921_v14  ;;  %1152 = vmatpush.msra.mxu1 %v4154_v30  ;;  %v4942_v30 = vld [vmem:[#allocation4] sm:$0xff] }
 0x2e8   :  { %1131 = vmatpush.msrb.mxu0 %v4932_v17  ;;  %1175 = vmatpush.msra.mxu2 %v4359_v25  ;;  %v6386_v25 = vld [vmem:[#allocation19_spill] sm:$0xff] }
 0x2e9   :  { %1193 = vmatpush.msra.mxu3 %v4419_v39  ;;  %1153 = vmatpush.msra.mxu1 %v4156_v19  ;;  %v4160_v39 = vld [vmem:[#allocation2] sm:$0xff] }
 0x2ea   :  { %3846 = vmatmul.msk.f32.vlgmr.msrb.gmra.mxu3 %vm137_vm1, %v3803_v1  ;;  %1132 = vmatpush.msrb.mxu0 %v4938_v24 }
 0x2eb   :  { %1154 = vmatpush.msra.mxu1 %v4158_v22  ;;  %1194 = vmatpush.msra.mxu3 %v4423_v40  ;;  %v6390_v40 = vld [vmem:[#allocation21_spill] sm:$0xff] }
 0x2ec   :  { %1133 = vmatpush.msrb.mxu0 %v4942_v30  ;;  %1176 = vmatpush.msra.mxu2 %v4361_v26  ;;  %v6387_v26 = vld [vmem:[#allocation16_spill] sm:$0xff] }
 0x2ed   :  { %1155 = vmatpush.msra.mxu1 %v4160_v39  ;;  %1195 = vmatpush.msra.mxu3 %v4432_v43  ;;  %v6392_v43 = vld [vmem:[#allocation22_spill] sm:$0xff] }
 0x2ee   :  { %1216 = vmatpush.msra.mxu0 %v4425_v41  ;;  %1177 = vmatpush.msra.mxu2 %v4365_v27  ;;  %v6388_v27 = vld [vmem:[#allocation20_spill] sm:$0xff]  ;;  %v6391_v41 = vld [vmem:[#allocation18_spill] sm:$0xff] }
 0x2ef   :  { %1238 = vmatpush.msrb.mxu1 %v4553_v35  ;;  %1196 = vmatpush.msra.mxu3 %v4437_v45  ;;  %v6394_v45 = vld [vmem:[#allocation24_spill] sm:$0xff]  ;;  %v5014_v39 = vld [vmem:[#allocation4 + $0x1b0] sm:$0xff] }
 0x2f0   :  { %1217 = vmatpush.msra.mxu0 %v4434_v44  ;;  %1178 = vmatpush.msra.mxu2 %v4369_v28  ;;  %v6389_v28 = vld [vmem:[#allocation17_spill] sm:$0xff]  ;;  %v6393_v44 = vld [vmem:[#allocation23_spill] sm:$0xff] }
 0x2f1   :  { %1239 = vmatpush.msrb.mxu1 %v4556_v36  ;;  %1197 = vmatpush.msra.mxu3 %v4446_v47  ;;  %v6397_v36 = vld [vmem:[#allocation8_spill] sm:$0xff] }
 0x2f2   :  { %1218 = vmatpush.msra.mxu0 %v4439_v46  ;;  %1261 = vmatpush.msrb.mxu2 %v4558_v37  ;;  %v840_v46 = vld [vmem:[%s6257_s6 + $0x28] sm:$0xff] }
 0x2f3   :  { %1240 = vmatpush.msrb.mxu1 %v4562_v38  ;;  %1198 = vmatpush.msra.mxu3 %v4453_v49  ;;  %v6398_v37 = vld [vmem:[#allocation13_spill] sm:$0xff]  ;;  %v6399_v38 = vld [vmem:[#allocation15_spill] sm:$0xff] }
 0x2f4   :  { %1219 = vmatpush.msra.mxu0 %v4448_v48  ;;  %1262 = vmatpush.msrb.mxu2 %v4564_v42 }
 0x2f5   :  { %1241 = vmatpush.msrb.mxu1 %v4568_v56  ;;  %1199 = vmatpush.msra.mxu3 %v4457_v51  ;;  %v6400_v56 = vld [vmem:[#allocation9_spill] sm:$0xff] }
 0x2f6   :  { %1220 = vmatpush.msra.mxu0 %v4455_v50  ;;  %1263 = vmatpush.msrb.mxu2 %v4570_v57  ;;  %v6395_v50 = vld [vmem:[#allocation11_spill] sm:$0xff]  ;;  %v6401_v57 = vld [vmem:[#allocation14_spill] sm:$0xff] }
 0x2f7   :  { %1242 = vmatpush.msrb.mxu1 %v4574_v59  ;;  %1200 = vmatpush.msra.mxu3 %v4464_v53  ;;  %v6396_v53 = vld [vmem:[#allocation12_spill] sm:$0xff] }
 0x2f8   :  { %1221 = vmatpush.msra.mxu0 %v4462_v52  ;;  %1264 = vmatpush.msrb.mxu2 %v4576_v60  ;;  %v6402_v60 = vld [vmem:[#allocation10_spill] sm:$0xff] }
 0x2f9   :  { %1243 = vmatpush.msrb.mxu1 %v4580_v61  ;;  %1283 = vmatpush.msrb.mxu3 %v4694_v29  ;;  %v6403_v61 = vld [vmem:[#allocation25_spill] sm:$0xff] }
 0x2fa   :  { %1222 = vmatpush.msra.mxu0 %v4466_v54  ;;  %1265 = vmatpush.msrb.mxu2 %v4582_v62 }
 0x2fb   :  { %1244 = vmatpush.msrb.mxu1 %v4584_v63  ;;  %1284 = vmatpush.msrb.mxu3 %v4697_v31  ;;  %v5007_v63 = vld [vmem:[#allocation4 + $0x1b8] sm:$0xff] }
 0x2fc   :  { %1223 = vmatpush.msra.mxu0 %v4474_v55  ;;  %1266 = vmatpush.msrb.mxu2 %v6387_v26 }
 0x2fd   :  { %1245 = vmatpush.msrb.mxu1 %v4590_v3  ;;  %1285 = vmatpush.msrb.mxu3 %v6386_v25 }
 0x2fe   :  { %1267 = vmatpush.msrb.mxu2 %v6389_v28  ;;  %v5018_v28 = vld [vmem:[#allocation2 + $0x178] sm:$0xff] }
 0x2ff   :  { %1286 = vmatpush.msrb.mxu3 %v6388_v27 }
 0x300   :  { %1268 = vmatpush.msrb.mxu2 %v6391_v41 }
 0x301   :  { %1287 = vmatpush.msrb.mxu3 %v6390_v40 }
 0x303   :  { %1288 = vmatpush.msrb.mxu3 %v6392_v43 }
 0x305   :  { %1289 = vmatpush.msrb.mxu3 %v6393_v44 }
 0x307   :  { %1290 = vmatpush.msrb.mxu3 %v6394_v45 }
 0x347   :  { %v861_v47 = vpop.f32.mrf.mxu1 }
 0x348   :  { %v864_v48 = vadd.f32 %v861_v47, %v840_v46  ;;  %v6404_v46 = vld [vmem:[#allocation26_spill] sm:$0xff] }
 0x34a   :  { %4050 = vtanh.f32 %v864_v48  ;;  %v5022_v48 = vld [vmem:[#allocation4 + $0x1a8] sm:$0xff] }
 0x34d   :  { %v883_v54 = vpop.f32.mrf.mxu2 }
 0x34e   :  { %v884_v42 = vadd.f32 %v6399_v38, %v883_v54  ;;  %v5033_v54 = vld [vmem:[#allocation2 + $0x168] sm:$0xff] }
 0x350   :  { %v4051_v49 = vpop.eup %4050 }
 0x351   :  { %3847 = vmatmul.msk.f32.vlgmr.msrb.gmra.mxu0 %vm137_vm1, %v4051_v49  ;;  %3848 = vmatmul.msk.f32.vlgmr.msra.gmra.mxu1 %vm137_vm1, %v4051_v49 }
 0x352   :  { %1306 = vmatpush.msrb.mxu0 %v4722_v32  ;;  %1328 = vmatpush.msra.mxu1 %v6395_v50 }
 0x354   :  { %1307 = vmatpush.msrb.mxu0 %v4727_v2  ;;  %1329 = vmatpush.msra.mxu1 %v4836_v9 }
 0x355   :  { %v928_v51 = vpop.f32.mrf.mxu0 }
 0x356   :  { %v929_v52 = vadd.f32 %v4618_v7, %v928_v51  ;;  %1308 = vmatpush.msrb.mxu0 %v6383_v16  ;;  %1330 = vmatpush.msra.mxu1 %v6396_v53  ;;  %v5027_v51 = vld [vmem:[#allocation2 + $0x170] sm:$0xff] }
 0x357   :  { %v951_v55 = vpop.f32.mrf.mxu1 }
 0x358   :  { %v954_v35 = vadd.f32 %v951_v55, %v929_v52  ;;  %1309 = vmatpush.msrb.mxu0 %v6397_v36  ;;  %1331 = vmatpush.msra.mxu1 %v6398_v37  ;;  %v5031_v52 = vld [vmem:[#allocation4 + $0x1a0] sm:$0xff] }
 0x35a   :  { %4052 = vtanh.f32 %v954_v35  ;;  %1310 = vmatpush.msrb.mxu0 %v6400_v56  ;;  %1332 = vmatpush.msra.mxu1 %v6401_v57  ;;  %v5044_v35 = vld [vmem:[#allocation2 + $0x160] sm:$0xff] }
 0x35b   :  { %v906_v59 = vpop.f32.mrf.mxu3 }
 0x35c   :  { %v909_v7 = vadd.f32 %v906_v59, %v884_v42  ;;  %1311 = vmatpush.msrb.mxu0 %v6402_v60  ;;  %1333 = vmatpush.msra.mxu1 %v6403_v61  ;;  %v5054_v42 = vld [vmem:[#allocation2 + $0x158] sm:$0xff] }
 0x35d   :  { %v973_v19 = vpop.f32.mrf.mxu2 }
 0x35e   :  { %4054 = vtanh.f32 %v909_v7  ;;  %1312 = vmatpush.msrb.mxu0 %v4757_v4  ;;  %1334 = vmatpush.msra.mxu1 %v4858_v34  ;;  %v974_v47 = vadd.f32 %v6404_v46, %v973_v19  ;;  %v5059_v7 = vld [vmem:[#allocation2 + $0x150] sm:$0xff]  ;;  %v5069_v19 = vld [vmem:[#allocation2 + $0x148] sm:$0xff] }
 0x35f   :  { %v1018_v62 = vpop.f32.mrf.mxu0 }
 0x360   :  { %v4053_v3 = vpop.eup %4052  ;;  %v1019_v1 = vadd.f32 %v4863_v20, %v1018_v62  ;;  %1313 = vmatpush.msrb.mxu0 %v4761_v10  ;;  %1335 = vmatpush.msra.mxu1 %v4876_v5 }
 0x361   :  { %v1041_v22 = vpop.f32.mrf.mxu1  ;;  %3851 = vmatmul.msk.f32.vlgmr.msra.gmra.mxu0 %vm137_vm1, %v4053_v3  ;;  %3852 = vmatmul.msk.f32.vlgmr.msrb.gmra.mxu1 %vm137_vm1, %v4053_v3 }
 0x362   :  { %v1044_v26 = vadd.f32 %v1041_v22, %v1019_v1  ;;  %1419 = vmatpush.msra.mxu0 %v5007_v63  ;;  %1445 = vmatpush.msrb.mxu1 %v4889_v18  ;;  %v5065_v1 = vld [vmem:[#allocation4 + $0x190] sm:$0xff]  ;;  %v5075_v22 = vld [vmem:[#allocation2 + $0x140] sm:$0xff] }
 0x364   :  { %v4055_v41 = vpop.eup %4054  ;;  %4056 = vtanh.f32 %v1044_v26  ;;  %1420 = vmatpush.msra.mxu0 %v5014_v39  ;;  %1446 = vmatpush.msrb.mxu1 %v4897_v8  ;;  %v5040_v8 = vld [vmem:[%s6256_s5 + $0x5] ss:$0 sm:$0xff] }
 0x365   :  { %v996_v49 = vpop.f32.mrf.mxu3  ;;  %3849 = vmatmul.msk.f32.vlgmr.msra.gmra.mxu2 %vm137_vm1, %v4055_v41  ;;  %3850 = vmatmul.msk.f32.vlgmr.msra.gmra.mxu3 %vm137_vm1, %v4055_v41  ;;  %v5081_v26 = vld [vmem:[#allocation4 + $0x180] sm:$0xff]  ;;  %v5083_v41 = vld [vmem:[#allocation2 + $0x38] sm:$0xff] }
 0x366   :  { %v999_v18 = vadd.f32 %v996_v49, %v974_v47  ;;  %1351 = vmatpush.msra.mxu2 %v4867_v23  ;;  %1387 = vmatpush.msra.mxu3 %v5018_v28  ;;  %v3804_v47 = vld [vmem:[%s6252_s1 + $0x30] sm:$0xff] }
 0x367   :  { %1421 = vmatpush.msra.mxu0 %v5022_v48  ;;  %1447 = vmatpush.msrb.mxu1 %v4905_v12  ;;  %v1077_v55 = vpop.f32.mrf.mxu2  ;;  %v5050_v12 = vld [vmem:[#allocation4 + $0x198] sm:$0xff] }
 0x368   :  { %4058 = vtanh.f32 %v999_v18  ;;  %1352 = vmatpush.msra.mxu2 %v4874_v15  ;;  %1388 = vmatpush.msra.mxu3 %v5027_v51  ;;  %v1078_v59 = vadd.f32 %v5040_v8, %v1077_v55  ;;  %v5104_v18 = vld [vmem:[#allocation2 + $0x20] sm:$0xff]  ;;  %v5107_v55 = vld [vmem:[#allocation2 + $0x18] sm:$0xff] }
 0x369   :  { %1422 = vmatpush.msra.mxu0 %v5031_v52  ;;  %1448 = vmatpush.msrb.mxu1 %v4916_v6  ;;  %6407 = vst [vmem:[#allocation20_spill] sm:$0xff] %v5104_v18 }
 0x36a   :  { %v4057_v38 = vpop.eup %4056  ;;  %1353 = vmatpush.msra.mxu2 %v4883_v33  ;;  %1389 = vmatpush.msra.mxu3 %v5033_v54  ;;  %6408 = vst [vmem:[#allocation17_spill] sm:$0xff] %v5107_v55 }
 0x36b   :  { %3855 = vmatmul.msk.f32.vlgmr.msrb.gmra.mxu0 %vm137_vm1, %v4057_v38  ;;  %3856 = vmatmul.msk.f32.vlgmr.msra.gmra.mxu1 %vm137_vm1, %v4057_v38  ;;  %v5110_v38 = vld [vmem:[#allocation2 + $0x10] sm:$0xff] }
 0x36c   :  { %1354 = vmatpush.msra.mxu2 %v4887_v11  ;;  %1390 = vmatpush.msra.mxu3 %v5044_v35  ;;  %6409 = vst [vmem:[#allocation21_spill] sm:$0xff] %v5110_v38 }
 0x36d   :  { %v1109_v6 = vpop.f32.mrf.mxu3  ;;  %1423 = vmatpush.msra.mxu0 %v5050_v12  ;;  %1449 = vmatpush.msrb.mxu1 %v4924_v21  ;;  %v5073_v21 = vld [vmem:[#allocation4 + $0x188] sm:$0xff] }
 0x36e   :  { %v4059_v62 = vpop.eup %4058  ;;  %v1112_v3 = vadd.f32 %v1109_v6, %v1078_v59  ;;  %1355 = vmatpush.msra.mxu2 %v4895_v58  ;;  %1391 = vmatpush.msra.mxu3 %v5054_v42  ;;  %v5115_v59 = vld [vmem:[#allocation2 + $0x8] sm:$0xff]  ;;  %v5117_v6 = vld [vmem:[#allocation4 + $0x70] sm:$0xff] }
 0x36f   :  { %3853 = vmatmul.msk.f32.vlgmr.msrb.gmra.mxu2 %vm137_vm1, %v4059_v62  ;;  %3854 = vmatmul.msk.f32.vlgmr.msrb.gmra.mxu3 %vm137_vm1, %v4059_v62  ;;  %6410 = vst [vmem:[#allocation18_spill] sm:$0xff] %v5115_v59  ;;  %v5119_v62 = vld [vmem:[#allocation2 + $0x78] sm:$0xff] }
 0x370   :  { %4060 = vtanh.f32 %v1112_v3  ;;  %1356 = vmatpush.msra.mxu2 %v4903_v0  ;;  %1392 = vmatpush.msra.mxu3 %v5059_v7  ;;  %6411 = vst [vmem:[#allocation22_spill] sm:$0xff] %v5117_v6  ;;  %v5124_v3 = vld [vmem:[#allocation2] sm:$0xff] }
 0x371   :  { %1424 = vmatpush.msra.mxu0 %v5065_v1  ;;  %1450 = vmatpush.msrb.mxu1 %v4932_v17  ;;  %v5094_v17 = vld [vmem:[#allocation2 + $0x30] sm:$0xff]  ;;  %6412 = vst [vmem:[#allocation23_spill] sm:$0xff] %v5119_v62 }
 0x372   :  { %1357 = vmatpush.msra.mxu2 %v4913_v13  ;;  %1393 = vmatpush.msra.mxu3 %v5069_v19  ;;  %6405 = vst [vmem:[#allocation19_spill] sm:$0xff] %v5094_v17 }
 0x373   :  { %1425 = vmatpush.msra.mxu0 %v5073_v21  ;;  %1451 = vmatpush.msrb.mxu1 %v4938_v24  ;;  %v5100_v24 = vld [vmem:[#allocation2 + $0x28] sm:$0xff]  ;;  %6413 = vst [vmem:[#allocation24_spill] sm:$0xff] %v5124_v3 }
 0x374   :  { %1358 = vmatpush.msra.mxu2 %v4921_v14  ;;  %1394 = vmatpush.msra.mxu3 %v5075_v22  ;;  %6406 = vst [vmem:[#allocation16_spill] sm:$0xff] %v5100_v24 }
 0x375   :  { %1426 = vmatpush.msra.mxu0 %v5081_v26  ;;  %1452 = vmatpush.msrb.mxu1 %v4942_v30  ;;  %v5112_v30 = vld [vmem:[#allocation4 + $0x78] sm:$0xff] }
 0x376   :  { %1480 = vmatpush.msrb.mxu2 %v5083_v41  ;;  %v4061_v49 = vpop.eup %4060  ;;  %3860 = vmatmul.msk.f32.vlgmr.msra.gmra.mxu0 %vm137_vm1, %v3804_v47  ;;  %v5128_v47 = vld [vmem:[#allocation4 + $0x68] sm:$0xff] }
 0x377   :  { %3857 = vmatmul.msk.f32.vlgmr.msra.gmra.mxu2 %vm137_vm1, %v4061_v49  ;;  %3859 = vmatmul.msk.f32.vlgmr.msra.gmra.mxu3 %vm137_vm1, %v4061_v49  ;;  %6414 = vst [vmem:[#allocation11_spill] sm:$0xff] %v5128_v47  ;;  %v5131_v49 = vld [vmem:[#allocation2 + $0x70] sm:$0xff] }
 0x378   :  { %1481 = vmatpush.msrb.mxu2 %v5094_v17  ;;  %1511 = vmatpush.msrb.mxu3 %v5112_v30  ;;  %6415 = vst [vmem:[#allocation12_spill] sm:$0xff] %v5131_v49  ;;  %v5211_v17 = vld [vmem:[#allocation4 + $0x80] sm:$0xff] }
 0x379   :  { %1545 = vmatpush.msrb.mxu0 %v5119_v62  ;;  %v5195_v62 = vld [vmem:[#allocation4 + $0xf8] sm:$0xff]  ;;  %6438 = vst [vmem:[#allocation41_spill] sm:$0xff] %v5211_v17 }
 0x37a   :  { %1482 = vmatpush.msrb.mxu2 %v5100_v24  ;;  %1512 = vmatpush.msrb.mxu3 %v5117_v6  ;;  %v5141_v24 = vld [vmem:[#allocation2 + $0x68] sm:$0xff]  ;;  %v5151_v6 = vld [vmem:[#allocation2 + $0x60] sm:$0xff] }
 0x37b   :  { %1546 = vmatpush.msrb.mxu0 %v5131_v49  ;;  %6419 = vst [vmem:[#allocation9_spill] sm:$0xff] %v5141_v24  ;;  %v5157_v49 = vld [vmem:[#allocation2 + $0xa8] sm:$0xff] }
 0x37c   :  { %1483 = vmatpush.msrb.mxu2 %v5104_v18  ;;  %1513 = vmatpush.msrb.mxu3 %v5128_v47  ;;  %v5135_v18 = vld [vmem:[#allocation2 + $0xb8] sm:$0xff]  ;;  %6423 = vst [vmem:[#allocation26_spill] sm:$0xff] %v5151_v6 }
 0x37d   :  { %6417 = vst [vmem:[#allocation13_spill] sm:$0xff] %v5135_v18  ;;  %v5149_v47 = vld [vmem:[#allocation4 + $0x58] sm:$0xff]  ;;  %1547 = vmatpush.msrb.mxu0 %v5141_v24  ;;  %v5171_v24 = vld [vmem:[#allocation2 + $0xa0] sm:$0xff] }
 0x37e   :  { %1484 = vmatpush.msrb.mxu2 %v5107_v55  ;;  %v5133_v55 = vld [vmem:[#allocation4 + $0xb8] sm:$0xff]  ;;  %6422 = vst [vmem:[#allocation25_spill] sm:$0xff] %v5149_v47 }
 0x37f   :  { %6416 = vst [vmem:[#allocation8_spill] sm:$0xff] %v5133_v55  ;;  %1576 = vmatpush.msra.mxu1 %v5133_v55  ;;  %v5155_v55 = vld [vmem:[#allocation4 + $0xa8] sm:$0xff]  ;;  %1548 = vmatpush.msrb.mxu0 %v5151_v6 }
 0x380   :  { %1485 = vmatpush.msrb.mxu2 %v5110_v38  ;;  %v5139_v38 = vld [vmem:[#allocation4 + $0x60] sm:$0xff]  ;;  %6424 = vst [vmem:[#allocation27_spill] sm:$0xff] %v5155_v55  ;;  %v5187_v6 = vld [vmem:[#allocation2 + $0x48] sm:$0xff] }
 0x381   :  { %6418 = vst [vmem:[#allocation15_spill] sm:$0xff] %v5139_v38  ;;  %1514 = vmatpush.msrb.mxu3 %v5139_v38  ;;  %v5167_v38 = vld [vmem:[#allocation2 + $0x58] sm:$0xff] }
 0x382   :  { %1486 = vmatpush.msrb.mxu2 %v5115_v59  ;;  %v5143_v59 = vld [vmem:[#allocation4 + $0xb0] sm:$0xff]  ;;  %6425 = vst [vmem:[#allocation28_spill] sm:$0xff] %v5157_v49  ;;  %1549 = vmatpush.msrb.mxu0 %v5167_v38 }
 0x383   :  { %6420 = vst [vmem:[#allocation14_spill] sm:$0xff] %v5143_v59  ;;  %1577 = vmatpush.msra.mxu1 %v5143_v59  ;;  %1515 = vmatpush.msrb.mxu3 %v5149_v47  ;;  %v5169_v59 = vld [vmem:[#allocation4 + $0xa0] sm:$0xff]  ;;  %v5177_v47 = vld [vmem:[#allocation2 + $0x50] sm:$0xff] }
 0x384   :  { %1487 = vmatpush.msrb.mxu2 %v5124_v3  ;;  %v5147_v3 = vld [vmem:[#allocation2 + $0xb0] sm:$0xff]  ;;  %6427 = vst [vmem:[#allocation30_spill] sm:$0xff] %v5167_v38  ;;  %1550 = vmatpush.msrb.mxu0 %v5177_v47 }
 0x385   :  { %6421 = vst [vmem:[#allocation10_spill] sm:$0xff] %v5147_v3  ;;  %1578 = vmatpush.msra.mxu1 %v5155_v55  ;;  %v5179_v55 = vld [vmem:[#allocation4 + $0x98] sm:$0xff]  ;;  %v5193_v38 = vld [vmem:[#allocation2 + $0x90] sm:$0xff] }
 0x386   :  { %1610 = vmatpush.msra.mxu2 %v5135_v18  ;;  %v5163_v18 = vld [vmem:[#allocation4 + $0x50] sm:$0xff]  ;;  %6428 = vst [vmem:[#allocation31_spill] sm:$0xff] %v5169_v59  ;;  %1551 = vmatpush.msrb.mxu0 %v5187_v6 }
 0x387   :  { %6426 = vst [vmem:[#allocation29_spill] sm:$0xff] %v5163_v18  ;;  %1516 = vmatpush.msrb.mxu3 %v5163_v18  ;;  %1579 = vmatpush.msra.mxu1 %v5169_v59  ;;  %v5185_v18 = vld [vmem:[#allocation4 + $0x40] sm:$0xff]  ;;  %v5191_v59 = vld [vmem:[#allocation4 + $0x90] sm:$0xff] }
 0x388   :  { %1611 = vmatpush.msra.mxu2 %v5147_v3  ;;  %6429 = vst [vmem:[#allocation32_spill] sm:$0xff] %v5171_v24  ;;  %v5175_v3 = vld [vmem:[#allocation4 + $0x48] sm:$0xff] }
 0x389   :  { %6430 = vst [vmem:[#allocation33_spill] sm:$0xff] %v5175_v3  ;;  %1517 = vmatpush.msrb.mxu3 %v5175_v3  ;;  %1580 = vmatpush.msra.mxu1 %v5179_v55  ;;  %v5201_v3 = vld [vmem:[#allocation4 + $0x88] sm:$0xff] }
 0x38a   :  { %1612 = vmatpush.msra.mxu2 %v5157_v49  ;;  %6431 = vst [vmem:[#allocation34_spill] sm:$0xff] %v5177_v47  ;;  %v5183_v49 = vld [vmem:[#allocation2 + $0x98] sm:$0xff]  ;;  %v5205_v47 = vld [vmem:[#allocation2 + $0x88] sm:$0xff] }
 0x38b   :  { %6432 = vst [vmem:[#allocation35_spill] sm:$0xff] %v5179_v55  ;;  %1518 = vmatpush.msrb.mxu3 %v5185_v18  ;;  %1581 = vmatpush.msra.mxu1 %v5191_v59  ;;  %v5207_v55 = vld [vmem:[#allocation4 + $0xf0] sm:$0xff] }
 0x38c   :  { %1613 = vmatpush.msra.mxu2 %v5171_v24  ;;  %6433 = vst [vmem:[#allocation36_spill] sm:$0xff] %v5183_v49  ;;  %v5199_v24 = vld [vmem:[#allocation2 + $0x40] sm:$0xff] }
 0x38d   :  { %6434 = vst [vmem:[#allocation37_spill] sm:$0xff] %v5185_v18  ;;  %1641 = vmatpush.msra.mxu3 %v5195_v62  ;;  %1552 = vmatpush.msrb.mxu0 %v5199_v24  ;;  %v5217_v18 = vld [vmem:[#allocation4 + $0xe8] sm:$0xff] }
 0x38e   :  { %6435 = vst [vmem:[#allocation38_spill] sm:$0xff] %v5193_v38  ;;  %1614 = vmatpush.msra.mxu2 %v5183_v49  ;;  %1582 = vmatpush.msra.mxu1 %v5201_v3  ;;  %v5215_v49 = vld [vmem:[#allocation2 + $0x80] sm:$0xff] }
 0x38f   :  { %6436 = vst [vmem:[#allocation39_spill] sm:$0xff] %v5201_v3  ;;  %1642 = vmatpush.msra.mxu3 %v5207_v55  ;;  %1675 = vmatpush.msra.mxu0 %v4694_v29  ;;  %v5230_v3 = vld [vmem:[#allocation4 + $0xd8] sm:$0xff]  ;;  %v5234_v29 = vld [vmem:[#allocation4 + $0xd0] sm:$0xff] }
 0x390   :  { %6437 = vst [vmem:[#allocation40_spill] sm:$0xff] %v5205_v47  ;;  %1615 = vmatpush.msra.mxu2 %v5193_v38  ;;  %1583 = vmatpush.msra.mxu1 %v5211_v17  ;;  %v5226_v38 = vld [vmem:[#allocation4 + $0xe0] sm:$0xff] }
 0x391   :  { %6439 = vst [vmem:[#allocation42_spill] sm:$0xff] %v5215_v49  ;;  %1643 = vmatpush.msra.mxu3 %v5217_v18  ;;  %1676 = vmatpush.msra.mxu0 %v4697_v31  ;;  %v1114_v31 = vld [vmem:[%s6257_s6 + $0x30] sm:$0xff] }
 0x392   :  { %1616 = vmatpush.msra.mxu2 %v5205_v47  ;;  %v5236_v47 = vld [vmem:[#allocation4 + $0xc8] sm:$0xff] }
 0x393   :  { %1644 = vmatpush.msra.mxu3 %v5226_v38  ;;  %1677 = vmatpush.msra.mxu0 %v6386_v25  ;;  %v5243_v25 = vld [vmem:[#allocation4 + $0xc0] sm:$0xff] }
 0x394   :  { %1617 = vmatpush.msra.mxu2 %v5215_v49 }
 0x395   :  { %1645 = vmatpush.msra.mxu3 %v5230_v3  ;;  %1678 = vmatpush.msra.mxu0 %v6388_v27 }
 0x397   :  { %1646 = vmatpush.msra.mxu3 %v5234_v29  ;;  %1679 = vmatpush.msra.mxu0 %v6390_v40 }
 0x399   :  { %1647 = vmatpush.msra.mxu3 %v5236_v47  ;;  %1680 = vmatpush.msra.mxu0 %v6392_v43 }
 0x39b   :  { %1648 = vmatpush.msra.mxu3 %v5243_v25  ;;  %1681 = vmatpush.msra.mxu0 %v6393_v44 }
 0x39d   :  { %1682 = vmatpush.msra.mxu0 %v6394_v45  ;;  %v4162_v45 = vld [vmem:[%s6256_s5 + $0x2] ss:$0 sm:$0xff] }
 0x3ce   :  { %v1135_v49 = vpop.f32.mrf.mxu0 }
 0x3cf   :  { %v1138_v17 = vadd.f32 %v1135_v49, %v1114_v31 }
 0x3d1   :  { %4062 = vtanh.f32 %v1138_v17  ;;  %v5286_v17 = vld [vmem:[#allocation2 + $0x1b0] sm:$0xff] }
 0x3d7   :  { %v4063_v27 = vpop.eup %4062 }
 0x3d8   :  { %3861 = vmatmul.msk.f32.vlgmr.msrb.gmra.mxu1 %vm137_vm1, %v4063_v27  ;;  %3863 = vmatmul.msk.f32.vlgmr.msrb.gmra.mxu2 %vm137_vm1, %v4063_v27 }
 0x3d9   :  { %1706 = vmatpush.msrb.mxu1 %v4722_v32  ;;  %1740 = vmatpush.msrb.mxu2 %v6395_v50  ;;  %v1157_v32 = vpop.f32.mrf.mxu1 }
 0x3db   :  { %1707 = vmatpush.msrb.mxu1 %v4727_v2  ;;  %1741 = vmatpush.msrb.mxu2 %v4836_v9  ;;  %v4161_v2 = vld [vmem:[%s6256_s5 + $0x1] ss:$0 sm:$0xff] }
 0x3dd   :  { %1708 = vmatpush.msrb.mxu1 %v6383_v16  ;;  %1742 = vmatpush.msrb.mxu2 %v6396_v53  ;;  %v1158_v16 = vadd.f32 %v4161_v2, %v1157_v32  ;;  %v5306_v32 = vld [vmem:[#allocation2 + $0x1a0] sm:$0xff]  ;;  %v6442_v2 = vld [vmem:[#allocation22_spill] sm:$0xff] }
 0x3de   :  { %v1225_v43 = vpop.f32.mrf.mxu0 }
 0x3df   :  { %1709 = vmatpush.msrb.mxu1 %v6397_v36  ;;  %1743 = vmatpush.msrb.mxu2 %v6398_v37 }
 0x3e1   :  { %1710 = vmatpush.msrb.mxu1 %v6400_v56  ;;  %1744 = vmatpush.msrb.mxu2 %v6401_v57  ;;  %v1247_v50 = vpop.f32.mrf.mxu1 }
 0x3e2   :  { %v1248_v36 = vadd.f32 %v6404_v46, %v1247_v50  ;;  %v6450_v50 = vld [vmem:[#allocation26_spill] sm:$0xff] }
 0x3e3   :  { %1711 = vmatpush.msrb.mxu1 %v6402_v60  ;;  %1745 = vmatpush.msrb.mxu2 %v6403_v61  ;;  %v5280_v61 = vld [vmem:[#allocation2 + $0x1b8] sm:$0xff] }
 0x3e5   :  { %1712 = vmatpush.msrb.mxu1 %v4757_v4  ;;  %1746 = vmatpush.msrb.mxu2 %v4858_v34 }
 0x3e7   :  { %1713 = vmatpush.msrb.mxu1 %v4761_v10  ;;  %1747 = vmatpush.msrb.mxu2 %v4876_v5 }
 0x3e8   :  { %v1180_v9 = vpop.f32.mrf.mxu2  ;;  %v1202_v40 = vpop.f32.mrf.mxu3 }
 0x3e9   :  { %v1183_v44 = vadd.f32 %v1180_v9, %v1158_v16  ;;  %v1203_v4 = vadd.f32 %v4162_v45, %v1202_v40  ;;  %v1315_v37 = vpop.f32.mrf.mxu0  ;;  %v1337_v49 = vpop.f32.mrf.mxu1  ;;  %v5362_v16 = vld [vmem:[#allocation4 + $0x1c8] sm:$0xff]  ;;  %v6443_v9 = vld [vmem:[#allocation16_spill] sm:$0xff]  ;;  %v3805_v45 = vld [vmem:[%s6252_s1 + $0x38] sm:$0xff] }
 0x3ea   :  { %v6444_v40 = vld [vmem:[#allocation12_spill] sm:$0xff] }
 0x3eb   :  { %4064 = vtanh.f32 %v1183_v44  ;;  %v1228_v34 = vadd.f32 %v1225_v43, %v1203_v4  ;;  %v6446_v43 = vld [vmem:[#allocation20_spill] sm:$0xff]  ;;  %v6447_v44 = vld [vmem:[#allocation9_spill] sm:$0xff]  ;;  %v6448_v4 = vld [vmem:[#allocation15_spill] sm:$0xff] }
 0x3ed   :  { %4066 = vtanh.f32 %v1228_v34  ;;  %v6449_v34 = vld [vmem:[#allocation17_spill] sm:$0xff] }
 0x3f1   :  { %v4065_v53 = vpop.eup %4064 }
 0x3f2   :  { %v1270_v10 = vpop.f32.mrf.mxu2  ;;  %v1292_v56 = vpop.f32.mrf.mxu3  ;;  %3864 = vmatmul.msk.f32.vlgmr.msrb.gmra.mxu3 %vm137_vm1, %v4065_v53  ;;  %3866 = vmatmul.msk.f32.vlgmr.msrb.gmra.mxu0 %vm137_vm1, %v4065_v53  ;;  %v6451_v53 = vld [vmem:[#allocation25_spill] sm:$0xff] }
 0x3f3   :  { %v4067_v5 = vpop.eup %4066  ;;  %v1273_v57 = vadd.f32 %v1270_v10, %v1248_v36  ;;  %v1293_v60 = vadd.f32 %v4863_v20, %v1292_v56  ;;  %1771 = vmatpush.msrb.mxu3 %v4867_v23  ;;  %1805 = vmatpush.msrb.mxu0 %v5018_v28  ;;  %v3984_v20 = vld [vmem:[%s6256_s5 + $0x6] ss:$0 sm:$0xff]  ;;  %v5295_v23 = vld [vmem:[#allocation2 + $0x1a8] sm:$0xff]  ;;  %v1428_v28 = vpop.f32.mrf.mxu0  ;;  %v6455_v56 = vld [vmem:[#allocation18_spill] sm:$0xff] }
 0x3f4   :  { %3867 = vmatmul.msk.f32.vlgmr.msra.gmra.mxu1 %vm137_vm1, %v4067_v5  ;;  %3869 = vmatmul.msk.f32.vlgmr.msra.gmra.mxu2 %vm137_vm1, %v4067_v5  ;;  %v6452_v36 = vld [vmem:[#allocation21_spill] sm:$0xff]  ;;  %v6456_v5 = vld [vmem:[#allocation30_spill] sm:$0xff] }
 0x3f5   :  { %4068 = vtanh.f32 %v1273_v57  ;;  %v1318_v46 = vadd.f32 %v1315_v37, %v1293_v60  ;;  %1772 = vmatpush.msrb.mxu3 %v4874_v15  ;;  %1806 = vmatpush.msrb.mxu0 %v5027_v51  ;;  %v1338_v15 = vadd.f32 %v5040_v8, %v1337_v49  ;;  %v6453_v37 = vld [vmem:[#allocation8_spill] sm:$0xff]  ;;  %v6454_v10 = vld [vmem:[#allocation29_spill] sm:$0xff]  ;;  %v6457_v57 = vld [vmem:[#allocation14_spill] sm:$0xff] }
 0x3f6   :  { %1836 = vmatpush.msra.mxu1 %v5007_v63  ;;  %1872 = vmatpush.msra.mxu2 %v5280_v61  ;;  %v6458_v60 = vld [vmem:[#allocation33_spill] sm:$0xff]  ;;  %v6460_v49 = vld [vmem:[#allocation34_spill] sm:$0xff] }
 0x3f7   :  { %4070 = vtanh.f32 %v1318_v46  ;;  %1773 = vmatpush.msrb.mxu3 %v4883_v33  ;;  %1807 = vmatpush.msrb.mxu0 %v5033_v54  ;;  %v6459_v46 = vld [vmem:[#allocation24_spill] sm:$0xff] }
 0x3f8   :  { %1837 = vmatpush.msra.mxu1 %v5014_v39  ;;  %1873 = vmatpush.msra.mxu2 %v5286_v17 }
 0x3f9   :  { %1774 = vmatpush.msrb.mxu3 %v4887_v11  ;;  %1808 = vmatpush.msrb.mxu0 %v5044_v35  ;;  %v5320_v35 = vld [vmem:[#allocation2 + $0x190] sm:$0xff] }
 0x3fa   :  { %v1360_v33 = vpop.f32.mrf.mxu2  ;;  %v1396_v51 = vpop.f32.mrf.mxu3  ;;  %1838 = vmatpush.msra.mxu1 %v5022_v48  ;;  %1874 = vmatpush.msra.mxu2 %v5295_v23 }
 0x3fb   :  { %v4069_v54 = vpop.eup %4068  ;;  %v1363_v31 = vadd.f32 %v1360_v33, %v1338_v15  ;;  %v1397_v27 = vadd.f32 %v3984_v20, %v1396_v51  ;;  %1775 = vmatpush.msrb.mxu3 %v4895_v58  ;;  %1809 = vmatpush.msrb.mxu0 %v5054_v42  ;;  %v5314_v58 = vld [vmem:[#allocation2 + $0x198] sm:$0xff]  ;;  %v5330_v42 = vld [vmem:[#allocation4 + $0x1f0] sm:$0xff]  ;;  %v6461_v20 = vld [vmem:[#allocation13_spill] sm:$0xff] }
 0x3fc   :  { %3870 = vmatmul.msk.f32.vlgmr.msra.gmra.mxu3 %vm137_vm1, %v4069_v54  ;;  %3872 = vmatmul.msk.f32.vlgmr.msra.gmra.mxu0 %vm137_vm1, %v4069_v54  ;;  %v6462_v15 = vld [vmem:[#allocation27_spill] sm:$0xff]  ;;  %v6464_v33 = vld [vmem:[#allocation10_spill] sm:$0xff]  ;;  %v6466_v54 = vld [vmem:[#allocation28_spill] sm:$0xff] }
 0x3fd   :  { %v4071_v11 = vpop.eup %4070  ;;  %4072 = vtanh.f32 %v1363_v31  ;;  %v1431_v8 = vadd.f32 %v1428_v28, %v1397_v27  ;;  %1776 = vmatpush.msrb.mxu3 %v4903_v0  ;;  %1839 = vmatpush.msra.mxu1 %v5031_v52  ;;  %v5322_v0 = vld [vmem:[#allocation4 + $0x1f8] sm:$0xff]  ;;  %v5328_v52 = vld [vmem:[#allocation2 + $0x188] sm:$0xff]  ;;  %v6468_v27 = vld [vmem:[#allocation32_spill] sm:$0xff] }
 0x3fe   :  { %1875 = vmatpush.msra.mxu2 %v5306_v32  ;;  %3873 = vmatmul.msk.f32.vlgmr.msrb.gmra.mxu1 %vm137_vm1, %v4071_v11  ;;  %v6463_v28 = vld [vmem:[#allocation37_spill] sm:$0xff]  ;;  %v6465_v51 = vld [vmem:[#allocation31_spill] sm:$0xff] }
 0x3ff   :  { %4074 = vtanh.f32 %v1431_v8  ;;  %3875 = vmatmul.msk.f32.vlgmr.msrb.gmra.mxu2 %vm137_vm1, %v4071_v11  ;;  %1777 = vmatpush.msrb.mxu3 %v4913_v13  ;;  %v6467_v31 = vld [vmem:[#allocation35_spill] sm:$0xff]  ;;  %v6473_v8 = vld [vmem:[#allocation40_spill] sm:$0xff] }
 0x400   :  { %1810 = vmatpush.msrb.mxu0 %v5059_v7  ;;  %1840 = vmatpush.msra.mxu1 %v5050_v12  ;;  %v5336_v12 = vld [vmem:[#allocation2 + $0x180] sm:$0xff]  ;;  %v5340_v7 = vld [vmem:[#allocation4 + $0x1e8] sm:$0xff]  ;;  %v6470_v11 = vld [vmem:[#allocation39_spill] sm:$0xff] }
 0x401   :  { %1876 = vmatpush.msra.mxu2 %v5314_v58  ;;  %1778 = vmatpush.msrb.mxu3 %v4921_v14 }
 0x402   :  { %1811 = vmatpush.msrb.mxu0 %v5069_v19  ;;  %1841 = vmatpush.msra.mxu1 %v5065_v1  ;;  %v5346_v1 = vld [vmem:[#allocation4 + $0x1e0] sm:$0xff]  ;;  %v5351_v19 = vld [vmem:[#allocation4 + $0x1d8] sm:$0xff] }
 0x403   :  { %v4073_v13 = vpop.eup %4072  ;;  %1877 = vmatpush.msra.mxu2 %v5320_v35  ;;  %1904 = vmatpush.msra.mxu3 %v5322_v0 }
 0x404   :  { %1812 = vmatpush.msrb.mxu0 %v5075_v22  ;;  %1842 = vmatpush.msra.mxu1 %v5073_v21  ;;  %v5356_v21 = vld [vmem:[#allocation4 + $0x1d0] sm:$0xff]  ;;  %v6440_v22 = vld [vmem:[#allocation19_spill] sm:$0xff] }
 0x405   :  { %v4075_v14 = vpop.eup %4074  ;;  %1878 = vmatpush.msra.mxu2 %v5328_v52  ;;  %1905 = vmatpush.msra.mxu3 %v5330_v42 }
 0x406   :  { %3876 = vmatmul.msk.f32.vlgmr.msrb.gmra.mxu3 %vm137_vm1, %v4073_v13  ;;  %3878 = vmatmul.msk.f32.vlgmr.msrb.gmra.mxu0 %vm137_vm1, %v4073_v13 }
 0x407   :  { %1843 = vmatpush.msra.mxu1 %v5081_v26  ;;  %1879 = vmatpush.msra.mxu2 %v5336_v12  ;;  %v6441_v26 = vld [vmem:[#allocation23_spill] sm:$0xff] }
 0x408   :  { %1906 = vmatpush.msra.mxu3 %v5340_v7  ;;  %3879 = vmatmul.msk.f32.vlgmr.msra.gmra.mxu1 %vm137_vm1, %v4075_v14 }
 0x409   :  { %3881 = vmatmul.msk.f32.vlgmr.msra.gmra.mxu2 %vm137_vm1, %v4075_v14  ;;  %1942 = vmatpush.msra.mxu0 %v5083_v41  ;;  %v6445_v41 = vld [vmem:[#allocation11_spill] sm:$0xff]  ;;  %v5433_v14 = vld [vmem:[#allocation4 + $0x120] sm:$0xff] }
 0x40a   :  { %1907 = vmatpush.msra.mxu3 %v5346_v1  ;;  %1973 = vmatpush.msrb.mxu1 %v5112_v30  ;;  %v5368_v30 = vld [vmem:[#allocation4 + $0x1c0] sm:$0xff] }
 0x40b   :  { %1943 = vmatpush.msra.mxu0 %v6440_v22  ;;  %2009 = vmatpush.msrb.mxu2 %v6441_v26  ;;  %v5437_v22 = vld [vmem:[#allocation2 + $0xe8] sm:$0xff]  ;;  %v5439_v26 = vld [vmem:[#allocation4 + $0x118] sm:$0xff] }
 0x40c   :  { %1908 = vmatpush.msra.mxu3 %v5351_v19  ;;  %1974 = vmatpush.msrb.mxu1 %v6442_v2  ;;  %v5443_v2 = vld [vmem:[#allocation2 + $0xe0] sm:$0xff] }
 0x40d   :  { %1944 = vmatpush.msra.mxu0 %v6443_v9  ;;  %2010 = vmatpush.msrb.mxu2 %v6444_v40  ;;  %v5445_v9 = vld [vmem:[#allocation4 + $0x110] sm:$0xff]  ;;  %v5449_v40 = vld [vmem:[#allocation2 + $0x138] sm:$0xff] }
 0x40e   :  { %1909 = vmatpush.msra.mxu3 %v5356_v21  ;;  %1975 = vmatpush.msrb.mxu1 %v6445_v41  ;;  %v5451_v41 = vld [vmem:[#allocation2 + $0xd8] sm:$0xff] }
 0x40f   :  { %1945 = vmatpush.msra.mxu0 %v6446_v43  ;;  %2011 = vmatpush.msrb.mxu2 %v6447_v44  ;;  %v5453_v43 = vld [vmem:[#allocation4 + $0x108] sm:$0xff] }
 0x410   :  { %1910 = vmatpush.msra.mxu3 %v5362_v16  ;;  %1976 = vmatpush.msrb.mxu1 %v6448_v4  ;;  %v5459_v4 = vld [vmem:[#allocation4 + $0x100] sm:$0xff] }
 0x411   :  { %1946 = vmatpush.msra.mxu0 %v6449_v34  ;;  %2012 = vmatpush.msrb.mxu2 %v6450_v50  ;;  %v5466_v34 = vld [vmem:[#allocation2 + $0x130] sm:$0xff]  ;;  %v5470_v50 = vld [vmem:[#allocation2 + $0x128] sm:$0xff] }
 0x412   :  { %1911 = vmatpush.msra.mxu3 %v5368_v30  ;;  %1977 = vmatpush.msrb.mxu1 %v6451_v53  ;;  %v5473_v53 = vld [vmem:[#allocation2 + $0xc8] sm:$0xff] }
 0x413   :  { %3882 = vmatmul.msk.f32.vlgmr.msra.gmra.mxu3 %vm137_vm1, %v3805_v45  ;;  %1947 = vmatpush.msra.mxu0 %v6452_v36  ;;  %v5457_v45 = vld [vmem:[#allocation2 + $0xd0] sm:$0xff]  ;;  %v5477_v36 = vld [vmem:[#allocation2 + $0x120] sm:$0xff] }
 0x414   :  { %2040 = vmatpush.msrb.mxu3 %v6453_v37  ;;  %1978 = vmatpush.msrb.mxu1 %v6454_v10  ;;  %v5479_v37 = vld [vmem:[#allocation2 + $0xc0] sm:$0xff]  ;;  %v5483_v10 = vld [vmem:[#allocation2 + $0x118] sm:$0xff] }
 0x415   :  { %1948 = vmatpush.msra.mxu0 %v6455_v56  ;;  %2013 = vmatpush.msrb.mxu2 %v6456_v5  ;;  %v5486_v56 = vld [vmem:[#allocation2 + $0x110] sm:$0xff]  ;;  %v5489_v5 = vld [vmem:[#allocation2 + $0x108] sm:$0xff] }
 0x416   :  { %2041 = vmatpush.msrb.mxu3 %v6457_v57  ;;  %1979 = vmatpush.msrb.mxu1 %v6458_v60  ;;  %v5492_v57 = vld [vmem:[#allocation2 + $0x100] sm:$0xff] }
 0x417   :  { %1949 = vmatpush.msra.mxu0 %v6459_v46  ;;  %2014 = vmatpush.msrb.mxu2 %v6460_v49  ;;  %v3986_v60 = vld [vmem:[%s6256_s5 + $0x2] ss:$0 sm:$0xff]  ;;  %v3985_v49 = vld [vmem:[%s6256_s5 + $0x1] ss:$0 sm:$0xff] }
 0x418   :  { %2042 = vmatpush.msrb.mxu3 %v6462_v15  ;;  %1980 = vmatpush.msrb.mxu1 %v6463_v28 }
 0x419   :  { %2074 = vmatpush.msrb.mxu0 %v6461_v20  ;;  %2015 = vmatpush.msrb.mxu2 %v5187_v6  ;;  %v6469_v6 = vld [vmem:[#allocation36_spill] sm:$0xff] }
 0x41a   :  { %2043 = vmatpush.msrb.mxu3 %v6465_v51  ;;  %2105 = vmatpush.msra.mxu1 %v5195_v62  ;;  %v6471_v62 = vld [vmem:[#allocation38_spill] sm:$0xff] }
 0x41b   :  { %2075 = vmatpush.msrb.mxu0 %v6464_v33  ;;  %2016 = vmatpush.msrb.mxu2 %v5199_v24  ;;  %v6472_v24 = vld [vmem:[#allocation41_spill] sm:$0xff] }
 0x41c   :  { %2044 = vmatpush.msrb.mxu3 %v6467_v31  ;;  %2106 = vmatpush.msra.mxu1 %v5207_v55  ;;  %v6474_v55 = vld [vmem:[#allocation42_spill] sm:$0xff] }
 0x41d   :  { %2076 = vmatpush.msrb.mxu0 %v6466_v54 }
 0x41e   :  { %2045 = vmatpush.msrb.mxu3 %v5191_v59  ;;  %2107 = vmatpush.msra.mxu1 %v5217_v18  ;;  %v5416_v18 = vld [vmem:[#allocation4 + $0x138] sm:$0xff] }
 0x41f   :  { %2077 = vmatpush.msrb.mxu0 %v6468_v27  ;;  %v5422_v59 = vld [vmem:[#allocation2 + $0xf8] sm:$0xff]  ;;  %v3988_v27 = vld [vmem:[%s6256_s5 + $0x4] ss:$0 sm:$0xff] }
 0x420   :  { %2046 = vmatpush.msrb.mxu3 %v6470_v11  ;;  %2108 = vmatpush.msra.mxu1 %v5226_v38  ;;  %v5419_v38 = vld [vmem:[#allocation4 + $0x130] sm:$0xff] }
 0x421   :  { %2078 = vmatpush.msrb.mxu0 %v6469_v6  ;;  %2139 = vmatpush.msra.mxu2 %v5422_v59 }
 0x422   :  { %2047 = vmatpush.msrb.mxu3 %v6472_v24  ;;  %2109 = vmatpush.msra.mxu1 %v5230_v3  ;;  %v5424_v3 = vld [vmem:[#allocation4 + $0x128] sm:$0xff] }
 0x423   :  { %2079 = vmatpush.msrb.mxu0 %v6471_v62  ;;  %v3987_v62 = vld [vmem:[%s6256_s5 + $0x3] ss:$0 sm:$0xff] }
 0x424   :  { %2110 = vmatpush.msra.mxu1 %v5234_v29  ;;  %2170 = vmatpush.msra.mxu3 %v5416_v18  ;;  %v1433_v29 = vld [vmem:[%s6257_s6 + $0x38] sm:$0xff] }
 0x425   :  { %2080 = vmatpush.msrb.mxu0 %v6473_v8 }
 0x426   :  { %2111 = vmatpush.msra.mxu1 %v5236_v47  ;;  %2171 = vmatpush.msra.mxu3 %v5419_v38 }
 0x427   :  { %2081 = vmatpush.msrb.mxu0 %v6474_v55 }
 0x428   :  { %2112 = vmatpush.msra.mxu1 %v5243_v25  ;;  %2172 = vmatpush.msra.mxu3 %v5424_v3  ;;  %v5431_v25 = vld [vmem:[#allocation2 + $0xf0] sm:$0xff] }
 0x429   :  { %2140 = vmatpush.msra.mxu2 %v5431_v25 }
 0x42a   :  { %2173 = vmatpush.msra.mxu3 %v5433_v14 }
 0x42b   :  { %2141 = vmatpush.msra.mxu2 %v5437_v22 }
 0x42c   :  { %2174 = vmatpush.msra.mxu3 %v5439_v26 }
 0x42d   :  { %2142 = vmatpush.msra.mxu2 %v5443_v2 }
 0x42e   :  { %2175 = vmatpush.msra.mxu3 %v5445_v9 }
 0x42f   :  { %2143 = vmatpush.msra.mxu2 %v5451_v41 }
 0x430   :  { %2176 = vmatpush.msra.mxu3 %v5453_v43 }
 0x431   :  { %2144 = vmatpush.msra.mxu2 %v5457_v45 }
 0x432   :  { %2177 = vmatpush.msra.mxu3 %v5459_v4 }
 0x433   :  { %2145 = vmatpush.msra.mxu2 %v5473_v53 }
 0x435   :  { %2146 = vmatpush.msra.mxu2 %v5479_v37 }
 0x455   :  { %v1454_v13 = vpop.f32.mrf.mxu1 }
 0x456   :  { %v1457_v47 = vadd.f32 %v1454_v13, %v1433_v29  ;;  %v5512_v13 = vld [vmem:[#allocation4 + $0x178] sm:$0xff] }
 0x458   :  { %4076 = vtanh.f32 %v1457_v47  ;;  %v5514_v47 = vld [vmem:[#allocation2 + $0x178] sm:$0xff] }
 0x45b   :  { %v1489_v15 = vpop.f32.mrf.mxu2 }
 0x45c   :  { %v1490_v51 = vadd.f32 %v3985_v49, %v1489_v15  ;;  %v5520_v49 = vld [vmem:[#allocation4 + $0x170] sm:$0xff]  ;;  %v5535_v15 = vld [vmem:[#allocation2 + $0x168] sm:$0xff] }
 0x45e   :  { %v4077_v44 = vpop.eup %4076 }
 0x45f   :  { %1459 = vst.msk [vmem:[%s6258_s7] sm:$0xff] %vm137_vm1, %v4077_v44  ;;  %3884 = vmatmul.msk.f32.vlgmr.msra.gmra.mxu0 %vm137_vm1, %v4077_v44 }
 0x460   :  { %2204 = vmatpush.msra.mxu0 %v5449_v40 }
 0x462   :  { %2205 = vmatpush.msra.mxu0 %v5466_v34 }
 0x464   :  { %2206 = vmatpush.msra.mxu0 %v5470_v50 }
 0x466   :  { %2207 = vmatpush.msra.mxu0 %v5477_v36 }
 0x468   :  { %2208 = vmatpush.msra.mxu0 %v5483_v10 }
 0x46a   :  { %2209 = vmatpush.msra.mxu0 %v5486_v56 }
 0x46c   :  { %2210 = vmatpush.msra.mxu0 %v5489_v5 }
 0x46e   :  { %2211 = vmatpush.msra.mxu0 %v5492_v57 }
 0x46f   :  { %v1554_v46 = vpop.f32.mrf.mxu0 }
 0x470   :  { %v1555_v20 = vadd.f32 %v3986_v60, %v1554_v46 }
 0x471   :  { %v1585_v28 = vpop.f32.mrf.mxu1 }
 0x472   :  { %v1588_v33 = vadd.f32 %v1585_v28, %v1555_v20  ;;  %v3990_v20 = vld [vmem:[%s6256_s5 + $0x6] ss:$0 sm:$0xff] }
 0x474   :  { %4078 = vtanh.f32 %v1588_v33  ;;  %v5541_v33 = vld [vmem:[#allocation4 + $0x160] sm:$0xff] }
 0x475   :  { %v1520_v54 = vpop.f32.mrf.mxu3 }
 0x476   :  { %v1523_v31 = vadd.f32 %v1520_v54, %v1490_v51  ;;  %v5543_v51 = vld [vmem:[#allocation4 + $0x198] sm:$0xff] }
 0x477   :  { %v1619_v8 = vpop.f32.mrf.mxu2 }
 0x478   :  { %4080 = vtanh.f32 %v1523_v31  ;;  %v1620_v60 = vadd.f32 %v3987_v62, %v1619_v8  ;;  %v5550_v31 = vld [vmem:[#allocation2 + $0x160] sm:$0xff] }
 0x479   :  { %v1684_v6 = vpop.f32.mrf.mxu0 }
 0x47a   :  { %v4079_v11 = vpop.eup %4078  ;;  %v1685_v24 = vadd.f32 %v3988_v27, %v1684_v6 }
 0x47b   :  { %v1715_v55 = vpop.f32.mrf.mxu1  ;;  %3889 = vmatmul.msk.f32.vlgmr.msrb.gmra.mxu3 %vm137_vm1, %v4079_v11  ;;  %3891 = vmatmul.msk.f32.vlgmr.msrb.gmra.mxu0 %vm137_vm1, %v4079_v11  ;;  %v5556_v11 = vld [vmem:[#allocation4 + $0x190] sm:$0xff] }
 0x47c   :  { %v1718_v29 = vadd.f32 %v1715_v55, %v1685_v24  ;;  %2300 = vmatpush.msrb.mxu3 %v5007_v63  ;;  %2334 = vmatpush.msrb.mxu0 %v5280_v61  ;;  %v5522_v63 = vld [vmem:[#allocation2 + $0x170] sm:$0xff] }
 0x47d   :  { %v5562_v24 = vld [vmem:[#allocation4 + $0x150] sm:$0xff] }
 0x47e   :  { %v4081_v44 = vpop.eup %4080  ;;  %4082 = vtanh.f32 %v1718_v29  ;;  %2301 = vmatpush.msrb.mxu3 %v5014_v39  ;;  %2335 = vmatpush.msrb.mxu0 %v5286_v17  ;;  %v5529_v39 = vld [vmem:[#allocation4 + $0x1a0] sm:$0xff]  ;;  %v5533_v17 = vld [vmem:[#allocation4 + $0x168] sm:$0xff]  ;;  %v5566_v29 = vld [vmem:[#allocation2 + $0x158] sm:$0xff] }
 0x47f   :  { %v1650_v46 = vpop.f32.mrf.mxu3  ;;  %3885 = vmatmul.msk.f32.vlgmr.msrb.gmra.mxu1 %vm137_vm1, %v4081_v44  ;;  %3888 = vmatmul.msk.f32.vlgmr.msrb.gmra.mxu2 %vm137_vm1, %v4081_v44  ;;  %v5568_v44 = vld [vmem:[#allocation4 + $0x188] sm:$0xff] }
 0x480   :  { %v1653_v61 = vadd.f32 %v1650_v46, %v1620_v60  ;;  %2235 = vmatpush.msrb.mxu1 %v5512_v13  ;;  %2269 = vmatpush.msrb.mxu2 %v5514_v47 }
 0x481   :  { %2302 = vmatpush.msrb.mxu3 %v5022_v48  ;;  %2336 = vmatpush.msrb.mxu0 %v5295_v23  ;;  %v3989_v23 = vld [vmem:[%s6256_s5 + $0x5] ss:$0 sm:$0xff] }
 0x482   :  { %4084 = vtanh.f32 %v1653_v61  ;;  %2236 = vmatpush.msrb.mxu1 %v5520_v49  ;;  %2270 = vmatpush.msrb.mxu2 %v5522_v63  ;;  %v1749_v27 = vpop.f32.mrf.mxu2  ;;  %v5576_v61 = vld [vmem:[#allocation2 + $0x150] sm:$0xff] }
 0x483   :  { %v1814_v28 = vpop.f32.mrf.mxu0  ;;  %2303 = vmatpush.msrb.mxu3 %v5529_v39  ;;  %2337 = vmatpush.msrb.mxu0 %v5306_v32  ;;  %v5554_v32 = vld [vmem:[#allocation4 + $0x158] sm:$0xff]  ;;  %v1750_v55 = vadd.f32 %v3989_v23, %v1749_v27  ;;  %v5594_v23 = vld [vmem:[#allocation2 + $0x140] sm:$0xff] }
 0x484   :  { %v4083_v48 = vpop.eup %4082  ;;  %v1815_v54 = vadd.f32 %v3990_v20, %v1814_v28  ;;  %2237 = vmatpush.msrb.mxu1 %v5533_v17  ;;  %2271 = vmatpush.msrb.mxu2 %v5535_v15  ;;  %v5578_v20 = vld [vmem:[#allocation4 + $0x180] sm:$0xff] }
 0x485   :  { %v1845_v6 = vpop.f32.mrf.mxu1  ;;  %3895 = vmatmul.msk.f32.vlgmr.msra.gmra.mxu3 %vm137_vm1, %v4083_v48  ;;  %3897 = vmatmul.msk.f32.vlgmr.msra.gmra.mxu0 %vm137_vm1, %v4083_v48  ;;  %v5582_v28 = vld [vmem:[#allocation4 + $0x140] sm:$0xff] }
 0x486   :  { %v1848_v62 = vadd.f32 %v1845_v6, %v1815_v54  ;;  %2238 = vmatpush.msrb.mxu1 %v5541_v33  ;;  %2304 = vmatpush.msrb.mxu3 %v5543_v51 }
 0x487   :  { %2338 = vmatpush.msrb.mxu0 %v5314_v58  ;;  %2272 = vmatpush.msrb.mxu2 %v5550_v31  ;;  %v5572_v58 = vld [vmem:[#allocation4 + $0x148] sm:$0xff] }
 0x488   :  { %v4085_v8 = vpop.eup %4084  ;;  %4086 = vtanh.f32 %v1848_v62  ;;  %2239 = vmatpush.msrb.mxu1 %v5554_v32  ;;  %2305 = vmatpush.msrb.mxu3 %v5556_v11  ;;  %v2422_v62 = vld [vmem:[#allocation4 + $0xb8] sm:$0xff] }
 0x489   :  { %v1780_v60 = vpop.f32.mrf.mxu3  ;;  %2339 = vmatpush.msrb.mxu0 %v5320_v35  ;;  %3892 = vmatmul.msk.f32.vlgmr.msra.gmra.mxu1 %vm137_vm1, %v4085_v8  ;;  %v5588_v35 = vld [vmem:[#allocation2 + $0x148] sm:$0xff] }
 0x48a   :  { %v1783_v46 = vadd.f32 %v1780_v60, %v1750_v55  ;;  %3894 = vmatmul.msk.f32.vlgmr.msra.gmra.mxu2 %vm137_vm1, %v4085_v8  ;;  %2240 = vmatpush.msrb.mxu1 %v5562_v24  ;;  %v5616_v8 = vld [vmem:[#allocation2 + $0xb8] sm:$0xff]  ;;  %v2384_v55 = vld [vmem:[#allocation2 + $0x60] sm:$0xff]  ;;  %v5621_v60 = vld [vmem:[#allocation2 + $0xa8] sm:$0xff] }
 0x48b   :  { %2273 = vmatpush.msrb.mxu2 %v5566_v29  ;;  %2306 = vmatpush.msrb.mxu3 %v5568_v44 }
 0x48c   :  { %4088 = vtanh.f32 %v1783_v46  ;;  %2340 = vmatpush.msrb.mxu0 %v5328_v52  ;;  %2241 = vmatpush.msrb.mxu1 %v5572_v58  ;;  %v3991_v52 = vld [vmem:[%s6256_s5 + $0x7] ss:$0 sm:$0xff]  ;;  %v1881_v27 = vpop.f32.mrf.mxu2  ;;  %v5623_v46 = vld [vmem:[#allocation4 + $0xf8] sm:$0xff] }
 0x48d   :  { %2274 = vmatpush.msrb.mxu2 %v5576_v61  ;;  %2307 = vmatpush.msrb.mxu3 %v5578_v20 }
 0x48e   :  { %v4087_v48 = vpop.eup %4086  ;;  %2341 = vmatpush.msrb.mxu0 %v5336_v12  ;;  %2242 = vmatpush.msrb.mxu1 %v5582_v28  ;;  %v1882_v12 = vadd.f32 %v3991_v52, %v1881_v27  ;;  %v2382_v52 = vld [vmem:[#allocation2 + $0x50] sm:$0xff]  ;;  %v2380_v27 = vld [vmem:[#allocation2 + $0x40] sm:$0xff] }
 0x48f   :  { %3901 = vmatmul.msk.f32.vlgmr.msrb.gmra.mxu3 %vm137_vm1, %v4087_v48  ;;  %3903 = vmatmul.msk.f32.vlgmr.msrb.gmra.mxu0 %vm137_vm1, %v4087_v48  ;;  %v2383_v48 = vld [vmem:[#allocation2 + $0x58] sm:$0xff] }
 0x490   :  { %2275 = vmatpush.msrb.mxu2 %v5588_v35  ;;  %2365 = vmatpush.msra.mxu1 %v5322_v0 }
 0x491   :  { %2434 = vmatpush.msra.mxu3 %v2422_v62  ;;  %2470 = vmatpush.msra.mxu0 %v5616_v8  ;;  %v2417_v62 = vld [vmem:[#allocation4 + $0x90] sm:$0xff] }
 0x492   :  { %v4089_v54 = vpop.eup %4088  ;;  %2276 = vmatpush.msrb.mxu2 %v5594_v23  ;;  %2366 = vmatpush.msra.mxu1 %v5330_v42 }
 0x493   :  { %3898 = vmatmul.msk.f32.vlgmr.msrb.gmra.mxu1 %vm137_vm1, %v4089_v54  ;;  %3900 = vmatmul.msk.f32.vlgmr.msrb.gmra.mxu2 %vm137_vm1, %v4089_v54  ;;  %v2381_v54 = vld [vmem:[#allocation2 + $0x48] sm:$0xff] }
 0x494   :  { %2367 = vmatpush.msra.mxu1 %v5340_v7  ;;  %v2387_v7 = vld [vmem:[#allocation2 + $0x78] sm:$0xff] }
 0x495   :  { %2403 = vmatpush.msra.mxu2 %v2387_v7  ;;  %v5632_v7 = vld [vmem:[#allocation2 + $0x98] sm:$0xff] }
 0x496   :  { %v1913_v6 = vpop.f32.mrf.mxu3  ;;  %2368 = vmatpush.msra.mxu1 %v5346_v1  ;;  %v2386_v1 = vld [vmem:[#allocation2 + $0x70] sm:$0xff] }
 0x497   :  { %v1916_v0 = vadd.f32 %v1913_v6, %v1882_v12  ;;  %2404 = vmatpush.msra.mxu2 %v2386_v1  ;;  %v2419_v12 = vld [vmem:[#allocation4 + $0xa0] sm:$0xff]  ;;  %v5636_v1 = vld [vmem:[#allocation4 + $0xe8] sm:$0xff] }
 0x498   :  { %2369 = vmatpush.msra.mxu1 %v5351_v19  ;;  %v2385_v19 = vld [vmem:[#allocation2 + $0x68] sm:$0xff]  ;;  %v5628_v6 = vld [vmem:[#allocation2 + $0xa0] sm:$0xff] }
 0x499   :  { %4090 = vtanh.f32 %v1916_v0  ;;  %2405 = vmatpush.msra.mxu2 %v2385_v19  ;;  %v5630_v0 = vld [vmem:[#allocation4 + $0xf0] sm:$0xff] }
 0x49a   :  { %2370 = vmatpush.msra.mxu1 %v5356_v21  ;;  %v2421_v21 = vld [vmem:[#allocation4 + $0xb0] sm:$0xff] }
 0x49b   :  { %2435 = vmatpush.msra.mxu3 %v2421_v21  ;;  %2406 = vmatpush.msra.mxu2 %v2384_v55  ;;  %v5642_v19 = vld [vmem:[#allocation2 + $0x90] sm:$0xff]  ;;  %v5644_v21 = vld [vmem:[#allocation4 + $0xe0] sm:$0xff]  ;;  %v5649_v55 = vld [vmem:[#allocation2 + $0x88] sm:$0xff] }
 0x49c   :  { %2371 = vmatpush.msra.mxu1 %v5362_v16  ;;  %v5619_v16 = vld [vmem:[#allocation2 + $0xb0] sm:$0xff] }
 0x49d   :  { %2471 = vmatpush.msra.mxu0 %v5619_v16  ;;  %2407 = vmatpush.msra.mxu2 %v2383_v48  ;;  %v5651_v48 = vld [vmem:[#allocation4 + $0xd8] sm:$0xff] }
 0x49e   :  { %2372 = vmatpush.msra.mxu1 %v5368_v30  ;;  %v2420_v30 = vld [vmem:[#allocation4 + $0xa8] sm:$0xff] }
 0x49f   :  { %v4091_v42 = vpop.eup %4090  ;;  %2436 = vmatpush.msra.mxu3 %v2420_v30  ;;  %2472 = vmatpush.msra.mxu0 %v5621_v60  ;;  %v2416_v30 = vld [vmem:[#allocation4 + $0x88] sm:$0xff] }
 0x4a0   :  { %1918 = vst.msk [vmem:[%s6257_s6] sm:$0xff] %vm137_vm1, %v4091_v42  ;;  %3904 = vmatmul.msk.f32.vlgmr.msra.gmra.mxu1 %vm137_vm1, %v4091_v42  ;;  %2408 = vmatpush.msra.mxu2 %v2382_v52  ;;  %v2418_v42 = vld [vmem:[#allocation4 + $0x98] sm:$0xff]  ;;  %v2415_v52 = vld [vmem:[#allocation4 + $0x80] sm:$0xff] }
 0x4a1   :  { %2501 = vmatpush.msrb.mxu1 %v5623_v46  ;;  %2437 = vmatpush.msra.mxu3 %v2419_v12  ;;  %v5663_v12 = vld [vmem:[#allocation4 + $0xc8] sm:$0xff] }
 0x4a2   :  { %2409 = vmatpush.msra.mxu2 %v2381_v54  ;;  %2473 = vmatpush.msra.mxu0 %v5628_v6  ;;  %v5656_v54 = vld [vmem:[#allocation2 + $0x80] sm:$0xff] }
 0x4a3   :  { %2502 = vmatpush.msrb.mxu1 %v5630_v0  ;;  %2438 = vmatpush.msra.mxu3 %v2418_v42  ;;  %v5669_v42 = vld [vmem:[#allocation4 + $0xc0] sm:$0xff] }
 0x4a4   :  { %2410 = vmatpush.msra.mxu2 %v2380_v27  ;;  %2474 = vmatpush.msra.mxu0 %v5632_v7  ;;  %v5658_v27 = vld [vmem:[#allocation4 + $0xd0] sm:$0xff] }
 0x4a5   :  { %2503 = vmatpush.msrb.mxu1 %v5636_v1  ;;  %2439 = vmatpush.msra.mxu3 %v2417_v62  ;;  %v3997_v62 = vld [vmem:[%s6256_s5 + $0x4] ss:$0 sm:$0xff] }
 0x4a6   :  { %2535 = vmatpush.msrb.mxu2 %v5422_v59  ;;  %2475 = vmatpush.msra.mxu0 %v5642_v19 }
 0x4a7   :  { %2504 = vmatpush.msrb.mxu1 %v5644_v21  ;;  %2440 = vmatpush.msra.mxu3 %v2416_v30  ;;  %v3995_v30 = vld [vmem:[%s6256_s5 + $0x5] ss:$0 sm:$0xff] }
 0x4a8   :  { %2536 = vmatpush.msrb.mxu2 %v5431_v25  ;;  %2476 = vmatpush.msra.mxu0 %v5649_v55 }
 0x4a9   :  { %2505 = vmatpush.msrb.mxu1 %v5651_v48  ;;  %2441 = vmatpush.msra.mxu3 %v2415_v52 }
 0x4aa   :  { %2537 = vmatpush.msrb.mxu2 %v5437_v22  ;;  %2477 = vmatpush.msra.mxu0 %v5656_v54 }
 0x4ab   :  { %2506 = vmatpush.msrb.mxu1 %v5658_v27  ;;  %2566 = vmatpush.msrb.mxu3 %v5416_v18  ;;  %v3992_v18 = vld [vmem:[%s6256_s5 + $0x1] ss:$0 sm:$0xff] }
 0x4ac   :  { %2538 = vmatpush.msrb.mxu2 %v5443_v2  ;;  %2600 = vmatpush.msrb.mxu0 %v5449_v40  ;;  %v3993_v40 = vld [vmem:[%s6256_s5 + $0x3] ss:$0 sm:$0xff] }
 0x4ad   :  { %2507 = vmatpush.msrb.mxu1 %v5663_v12  ;;  %2567 = vmatpush.msrb.mxu3 %v5419_v38 }
 0x4ae   :  { %2539 = vmatpush.msrb.mxu2 %v5451_v41  ;;  %2601 = vmatpush.msrb.mxu0 %v5466_v34 }
 0x4af   :  { %2508 = vmatpush.msrb.mxu1 %v5669_v42  ;;  %2568 = vmatpush.msrb.mxu3 %v5424_v3 }
 0x4b0   :  { %2540 = vmatpush.msrb.mxu2 %v5457_v45  ;;  %2602 = vmatpush.msrb.mxu0 %v5470_v50 }
 0x4b1   :  { %2631 = vmatpush.msra.mxu1 %v5512_v13  ;;  %2569 = vmatpush.msrb.mxu3 %v5433_v14 }
 0x4b2   :  { %2541 = vmatpush.msrb.mxu2 %v5473_v53  ;;  %2603 = vmatpush.msrb.mxu0 %v5477_v36 }
 0x4b3   :  { %2632 = vmatpush.msra.mxu1 %v5520_v49  ;;  %2570 = vmatpush.msrb.mxu3 %v5439_v26 }
 0x4b4   :  { %2542 = vmatpush.msrb.mxu2 %v5479_v37  ;;  %2604 = vmatpush.msrb.mxu0 %v5483_v10 }
 0x4b5   :  { %2633 = vmatpush.msra.mxu1 %v5533_v17  ;;  %2571 = vmatpush.msrb.mxu3 %v5445_v9  ;;  %v3994_v9 = vld [vmem:[%s6256_s5 + $0x2] ss:$0 sm:$0xff] }
 0x4b6   :  { %2605 = vmatpush.msrb.mxu0 %v5486_v56 }
 0x4b7   :  { %2634 = vmatpush.msra.mxu1 %v5541_v33  ;;  %2572 = vmatpush.msrb.mxu3 %v5453_v43 }
 0x4b8   :  { %2606 = vmatpush.msrb.mxu0 %v5489_v5 }
 0x4b9   :  { %2635 = vmatpush.msra.mxu1 %v5554_v32  ;;  %2573 = vmatpush.msrb.mxu3 %v5459_v4 }
 0x4ba   :  { %2607 = vmatpush.msrb.mxu0 %v5492_v57 }
 0x4bb   :  { %2636 = vmatpush.msra.mxu1 %v5562_v24 }
 0x4bd   :  { %2637 = vmatpush.msra.mxu1 %v5572_v58 }
 0x4bf   :  { %2638 = vmatpush.msra.mxu1 %v5582_v28 }
 0x4dc   :  { %v1951_v38 = vpop.f32.mrf.mxu0 }
 0x4dd   :  { %v1952_v3 = vadd.f32 %v3992_v18, %v1951_v38  ;;  %v5719_v18 = vld [vmem:[#allocation4 + $0x1b8] sm:$0xff] }
 0x4f8   :  { %v2083_v43 = vpop.f32.mrf.mxu0 }
 0x4f9   :  { %v2084_v10 = vadd.f32 %v3993_v40, %v2083_v43 }
 0x4fc   :  { %v1982_v14 = vpop.f32.mrf.mxu1 }
 0x4fd   :  { %v1985_v26 = vadd.f32 %v1982_v14, %v1952_v3 }
 0x4fe   :  { %v2049_v50 = vpop.f32.mrf.mxu3 }
 0x4ff   :  { %4092 = vtanh.f32 %v1985_v26 }
 0x502   :  { %v2018_v4 = vpop.f32.mrf.mxu2  ;;  %v2213_v52 = vpop.f32.mrf.mxu0 }
 0x503   :  { %v2019_v34 = vadd.f32 %v3994_v9, %v2018_v4  ;;  %v5724_v9 = vld [vmem:[#allocation2 + $0x1b8] sm:$0xff]  ;;  %v2214_v43 = vadd.f32 %v3995_v30, %v2213_v52  ;;  %v5728_v4 = vld [vmem:[#allocation4 + $0x1b0] sm:$0xff]  ;;  %v3998_v30 = vld [vmem:[%s6256_s5 + $0x6] ss:$0 sm:$0xff] }
 0x504   :  { %v5751_v52 = vld [vmem:[#allocation4 + $0x1e8] sm:$0xff] }
 0x505   :  { %v4093_v36 = vpop.eup %4092  ;;  %v2052_v56 = vadd.f32 %v2049_v50, %v2019_v34  ;;  %v5730_v34 = vld [vmem:[#allocation4 + $0x1f8] sm:$0xff] }
 0x506   :  { %3886 = vst.msk [vmem:[%s6258_s7 + $0x8] sm:$0xff] %vm137_vm1, %v4093_v36  ;;  %v2114_v5 = vpop.f32.mrf.mxu1  ;;  %3906 = vmatmul.msk.f32.vlgmr.msra.gmra.mxu2 %vm137_vm1, %v4093_v36 }
 0x507   :  { %4094 = vtanh.f32 %v2052_v56  ;;  %v2117_v57 = vadd.f32 %v2114_v5, %v2084_v10  ;;  %2665 = vmatpush.msra.mxu2 %v5514_v47  ;;  %v5734_v10 = vld [vmem:[#allocation2 + $0x1b0] sm:$0xff]  ;;  %v5738_v5 = vld [vmem:[#allocation4 + $0x1a8] sm:$0xff] }
 0x508   :  { %v2179_v14 = vpop.f32.mrf.mxu3 }
 0x509   :  { %4096 = vtanh.f32 %v2117_v57  ;;  %2666 = vmatpush.msra.mxu2 %v5522_v63  ;;  %v5740_v57 = vld [vmem:[#allocation4 + $0x1f0] sm:$0xff] }
 0x50b   :  { %2667 = vmatpush.msra.mxu2 %v5535_v15 }
 0x50d   :  { %v4095_v38 = vpop.eup %4094  ;;  %v2148_v3 = vpop.f32.mrf.mxu2  ;;  %2668 = vmatpush.msra.mxu2 %v5550_v31 }
 0x50e   :  { %v2149_v26 = vadd.f32 %v3997_v62, %v2148_v3  ;;  %3907 = vmatmul.msk.f32.vlgmr.msra.gmra.mxu3 %vm137_vm1, %v4095_v38  ;;  %3910 = vmatmul.msk.f32.vlgmr.msra.gmra.mxu0 %vm137_vm1, %v4095_v38  ;;  %v5743_v62 = vld [vmem:[#allocation2 + $0x1a8] sm:$0xff]  ;;  %v5754_v38 = vld [vmem:[#allocation2 + $0x1a0] sm:$0xff] }
 0x50f   :  { %v4097_v40 = vpop.eup %4096  ;;  %2669 = vmatpush.msra.mxu2 %v5566_v29  ;;  %2696 = vmatpush.msra.mxu3 %v5719_v18  ;;  %6475 = vst [vmem:[#allocation19_spill] sm:$0xff] %v5743_v62  ;;  %v5759_v3 = vld [vmem:[#allocation4 + $0x1e0] sm:$0xff] }
 0x510   :  { %v2182_v50 = vadd.f32 %v2179_v14, %v2149_v26  ;;  %v2244_v36 = vpop.f32.mrf.mxu1  ;;  %3911 = vmatmul.msk.f32.vlgmr.msrb.gmra.mxu1 %vm137_vm1, %v4097_v40  ;;  %3913 = vmatmul.msk.f32.vlgmr.msrb.gmra.mxu2 %vm137_vm1, %v4097_v40 }
 0x511   :  { %v2247_v56 = vadd.f32 %v2244_v36, %v2214_v43  ;;  %2730 = vmatpush.msra.mxu0 %v5724_v9  ;;  %2670 = vmatpush.msra.mxu2 %v5576_v61  ;;  %v3996_v43 = vld [vmem:[%s6256_s5 + $0x7] ss:$0 sm:$0xff]  ;;  %v5769_v36 = vld [vmem:[#allocation2 + $0x198] sm:$0xff] }
 0x512   :  { %4098 = vtanh.f32 %v2182_v50  ;;  %2697 = vmatpush.msra.mxu3 %v5728_v4  ;;  %2761 = vmatpush.msrb.mxu1 %v5730_v34  ;;  %v2309_v50 = vpop.f32.mrf.mxu3  ;;  %6476 = vst [vmem:[#allocation23_spill] sm:$0xff] %v5769_v36 }
 0x513   :  { %4100 = vtanh.f32 %v2247_v56  ;;  %2731 = vmatpush.msra.mxu0 %v5734_v10  ;;  %2671 = vmatpush.msra.mxu2 %v5588_v35  ;;  %v2343_v56 = vpop.f32.mrf.mxu0 }
 0x514   :  { %2698 = vmatpush.msra.mxu3 %v5738_v5  ;;  %2762 = vmatpush.msrb.mxu1 %v5740_v57 }
 0x515   :  { %2732 = vmatpush.msra.mxu0 %v5743_v62  ;;  %2672 = vmatpush.msra.mxu2 %v5594_v23 }
 0x516   :  { %v2278_v14 = vpop.f32.mrf.mxu2  ;;  %2699 = vmatpush.msra.mxu3 %v5529_v39  ;;  %2763 = vmatpush.msrb.mxu1 %v5751_v52 }
 0x517   :  { %v2279_v26 = vadd.f32 %v3998_v30, %v2278_v14  ;;  %2733 = vmatpush.msra.mxu0 %v5754_v38  ;;  %2799 = vmatpush.msrb.mxu2 %v5616_v8  ;;  %v5774_v8 = vld [vmem:[#allocation4 + $0x1d8] sm:$0xff]  ;;  %v5778_v30 = vld [vmem:[#allocation2 + $0x190] sm:$0xff] }
 0x518   :  { %v4099_v40 = vpop.eup %4098  ;;  %2700 = vmatpush.msra.mxu3 %v5543_v51  ;;  %2764 = vmatpush.msrb.mxu1 %v5759_v3  ;;  %v5782_v14 = vld [vmem:[#allocation4 + $0x1d0] sm:$0xff] }
 0x519   :  { %v4101_v39 = vpop.eup %4100  ;;  %v2312_v62 = vadd.f32 %v2309_v50, %v2279_v26  ;;  %3914 = vmatmul.msk.f32.vlgmr.msrb.gmra.mxu3 %vm137_vm1, %v4099_v40  ;;  %3916 = vmatmul.msk.f32.vlgmr.msrb.gmra.mxu0 %vm137_vm1, %v4099_v40  ;;  %v2344_v26 = vadd.f32 %v3996_v43, %v2343_v56  ;;  %v5784_v50 = vld [vmem:[#allocation2 + $0x188] sm:$0xff] }
 0x51a   :  { %3917 = vmatmul.msk.f32.vlgmr.msra.gmra.mxu1 %vm137_vm1, %v4101_v39  ;;  %3919 = vmatmul.msk.f32.vlgmr.msra.gmra.mxu2 %vm137_vm1, %v4101_v39  ;;  %v5790_v39 = vld [vmem:[#allocation4 + $0x1c8] sm:$0xff] }
 0x51b   :  { %4102 = vtanh.f32 %v2312_v62  ;;  %2734 = vmatpush.msra.mxu0 %v5769_v36  ;;  %2701 = vmatpush.msra.mxu3 %v5556_v11  ;;  %v5792_v36 = vld [vmem:[#allocation2 + $0x180] sm:$0xff] }
 0x51c   :  { %2765 = vmatpush.msrb.mxu1 %v5774_v8  ;;  %2800 = vmatpush.msrb.mxu2 %v5619_v16  ;;  %v5799_v16 = vld [vmem:[#allocation4 + $0x1c0] sm:$0xff] }
 0x51d   :  { %v2374_v40 = vpop.f32.mrf.mxu1  ;;  %2735 = vmatpush.msra.mxu0 %v5778_v30  ;;  %2702 = vmatpush.msra.mxu3 %v5568_v44 }
 0x51e   :  { %v2377_v62 = vadd.f32 %v2374_v40, %v2344_v26  ;;  %2766 = vmatpush.msrb.mxu1 %v5782_v14  ;;  %2801 = vmatpush.msrb.mxu2 %v5621_v60  ;;  %v6477_v26 = vld [vmem:[#allocation19_spill] sm:$0xff] }
 0x51f   :  { %2736 = vmatpush.msra.mxu0 %v5784_v50  ;;  %2703 = vmatpush.msra.mxu3 %v5578_v20 }
 0x520   :  { %4104 = vtanh.f32 %v2377_v62  ;;  %2767 = vmatpush.msrb.mxu1 %v5790_v39  ;;  %2802 = vmatpush.msrb.mxu2 %v5628_v6 }
 0x521   :  { %2830 = vmatpush.msrb.mxu3 %v5623_v46  ;;  %v4103_v43 = vpop.eup %4102  ;;  %2737 = vmatpush.msra.mxu0 %v5792_v36 }
 0x522   :  { %3920 = vmatmul.msk.f32.vlgmr.msra.gmra.mxu3 %vm137_vm1, %v4103_v43  ;;  %3922 = vmatmul.msk.f32.vlgmr.msra.gmra.mxu0 %vm137_vm1, %v4103_v43 }
 0x523   :  { %2768 = vmatpush.msrb.mxu1 %v5799_v16  ;;  %2831 = vmatpush.msrb.mxu3 %v5630_v0 }
 0x524   :  { %2866 = vmatpush.msrb.mxu0 %v5422_v59  ;;  %2803 = vmatpush.msrb.mxu2 %v5632_v7  ;;  %v5847_v59 = vld [vmem:[#allocation4 + $0x138] sm:$0xff] }
 0x525   :  { %2832 = vmatpush.msrb.mxu3 %v5636_v1  ;;  %2897 = vmatpush.msra.mxu1 %v5847_v59  ;;  %v4001_v1 = vld [vmem:[%s6256_s5 + $0x4] ss:$0 sm:$0xff] }
 0x526   :  { %v4105_v60 = vpop.eup %4104  ;;  %2867 = vmatpush.msrb.mxu0 %v5431_v25  ;;  %2804 = vmatpush.msrb.mxu2 %v5642_v19  ;;  %v5849_v25 = vld [vmem:[#allocation2 + $0x138] sm:$0xff] }
 0x527   :  { %2379 = vst.msk [vmem:[%s6257_s6 + $0x8] sm:$0xff] %vm137_vm1, %v4105_v60  ;;  %3923 = vmatmul.msk.f32.vlgmr.msrb.gmra.mxu1 %vm137_vm1, %v4105_v60  ;;  %2833 = vmatpush.msrb.mxu3 %v5644_v21 }
 0x528   :  { %2868 = vmatpush.msrb.mxu0 %v5437_v22  ;;  %2805 = vmatpush.msrb.mxu2 %v5649_v55  ;;  %v5853_v22 = vld [vmem:[#allocation4 + $0x130] sm:$0xff] }
 0x529   :  { %2834 = vmatpush.msrb.mxu3 %v5651_v48  ;;  %2898 = vmatpush.msra.mxu1 %v5853_v22 }
 0x52a   :  { %2869 = vmatpush.msrb.mxu0 %v5443_v2  ;;  %2806 = vmatpush.msrb.mxu2 %v5656_v54  ;;  %v5855_v2 = vld [vmem:[#allocation2 + $0x130] sm:$0xff] }
 0x52b   :  { %2835 = vmatpush.msrb.mxu3 %v5658_v27 }
 0x52c   :  { %2870 = vmatpush.msrb.mxu0 %v5451_v41  ;;  %2931 = vmatpush.msra.mxu2 %v5849_v25  ;;  %v5859_v41 = vld [vmem:[#allocation4 + $0x128] sm:$0xff] }
 0x52d   :  { %2836 = vmatpush.msrb.mxu3 %v5663_v12  ;;  %2899 = vmatpush.msra.mxu1 %v5859_v41  ;;  %v4004_v12 = vld [vmem:[%s6256_s5 + $0x7] ss:$0 sm:$0xff] }
 0x52e   :  { %2871 = vmatpush.msrb.mxu0 %v5457_v45  ;;  %2932 = vmatpush.msra.mxu2 %v5855_v2  ;;  %v5861_v45 = vld [vmem:[#allocation2 + $0x128] sm:$0xff] }
 0x52f   :  { %2837 = vmatpush.msrb.mxu3 %v5669_v42  ;;  %v4003_v42 = vld [vmem:[%s6256_s5 + $0x6] ss:$0 sm:$0xff] }
 0x530   :  { %2872 = vmatpush.msrb.mxu0 %v5473_v53  ;;  %2933 = vmatpush.msra.mxu2 %v5861_v45  ;;  %v5865_v53 = vld [vmem:[#allocation4 + $0x120] sm:$0xff] }
 0x531   :  { %2962 = vmatpush.msra.mxu3 %v5512_v13  ;;  %2900 = vmatpush.msra.mxu1 %v5865_v53  ;;  %v5871_v13 = vld [vmem:[#allocation4 + $0x118] sm:$0xff] }
 0x532   :  { %2873 = vmatpush.msrb.mxu0 %v5479_v37  ;;  %v5867_v37 = vld [vmem:[#allocation2 + $0x120] sm:$0xff] }
 0x533   :  { %2963 = vmatpush.msra.mxu3 %v5520_v49  ;;  %2934 = vmatpush.msra.mxu2 %v5867_v37  ;;  %v5877_v49 = vld [vmem:[#allocation4 + $0x110] sm:$0xff] }
 0x534   :  { %2996 = vmatpush.msra.mxu0 %v5514_v47  ;;  %v5873_v47 = vld [vmem:[#allocation2 + $0x118] sm:$0xff]  ;;  %2901 = vmatpush.msra.mxu1 %v5871_v13 }
 0x535   :  { %2964 = vmatpush.msra.mxu3 %v5533_v17  ;;  %2935 = vmatpush.msra.mxu2 %v5873_v47  ;;  %v5883_v17 = vld [vmem:[#allocation4 + $0x108] sm:$0xff] }
 0x536   :  { %2997 = vmatpush.msra.mxu0 %v5522_v63  ;;  %v5879_v63 = vld [vmem:[#allocation2 + $0x110] sm:$0xff]  ;;  %2902 = vmatpush.msra.mxu1 %v5877_v49 }
 0x537   :  { %2965 = vmatpush.msra.mxu3 %v5541_v33  ;;  %2936 = vmatpush.msra.mxu2 %v5879_v63  ;;  %v5889_v33 = vld [vmem:[#allocation4 + $0x100] sm:$0xff] }
 0x538   :  { %2998 = vmatpush.msra.mxu0 %v5535_v15  ;;  %v5885_v15 = vld [vmem:[#allocation2 + $0x108] sm:$0xff]  ;;  %2903 = vmatpush.msra.mxu1 %v5883_v17 }
 0x539   :  { %2966 = vmatpush.msra.mxu3 %v5554_v32  ;;  %2937 = vmatpush.msra.mxu2 %v5885_v15  ;;  %v5898_v32 = vld [vmem:[#allocation4 + $0x1a0] sm:$0xff] }
 0x53a   :  { %2999 = vmatpush.msra.mxu0 %v5550_v31  ;;  %v5891_v31 = vld [vmem:[#allocation2 + $0x100] sm:$0xff]  ;;  %2904 = vmatpush.msra.mxu1 %v5889_v33 }
 0x53b   :  { %2967 = vmatpush.msra.mxu3 %v5562_v24  ;;  %2938 = vmatpush.msra.mxu2 %v5891_v31  ;;  %v4000_v24 = vld [vmem:[%s6256_s5 + $0x3] ss:$0 sm:$0xff] }
 0x53c   :  { %3000 = vmatpush.msra.mxu0 %v5566_v29  ;;  %3027 = vmatpush.msrb.mxu1 %v5719_v18 }
 0x53d   :  { %2968 = vmatpush.msra.mxu3 %v5572_v58  ;;  %v3999_v58 = vld [vmem:[%s6256_s5 + $0x2] ss:$0 sm:$0xff] }
 0x53e   :  { %3001 = vmatpush.msra.mxu0 %v5576_v61  ;;  %3028 = vmatpush.msrb.mxu1 %v5728_v4 }
 0x53f   :  { %2969 = vmatpush.msra.mxu3 %v5582_v28 }
 0x540   :  { %3002 = vmatpush.msra.mxu0 %v5588_v35  ;;  %3029 = vmatpush.msrb.mxu1 %v5738_v5 }
 0x542   :  { %3003 = vmatpush.msra.mxu0 %v5594_v23  ;;  %3030 = vmatpush.msrb.mxu1 %v5898_v32 }
 0x544   :  { %3031 = vmatpush.msrb.mxu1 %v5543_v51  ;;  %v4002_v51 = vld [vmem:[%s6256_s5 + $0x5] ss:$0 sm:$0xff] }
 0x546   :  { %3032 = vmatpush.msrb.mxu1 %v5556_v11 }
 0x548   :  { %3033 = vmatpush.msrb.mxu1 %v5568_v44 }
 0x54a   :  { %3034 = vmatpush.msrb.mxu1 %v5578_v20 }
 0x589   :  { %v2412_v28 = vpop.f32.mrf.mxu2 }
 0x58a   :  { %v2413_v46 = vadd.f32 %v3999_v58, %v2412_v28  ;;  %v6478_v28 = vld [vmem:[#allocation23_spill] sm:$0xff] }
 0x58b   :  { %v2479_v29 = vpop.f32.mrf.mxu0 }
 0x58c   :  { %v2480_v61 = vadd.f32 %v4000_v24, %v2479_v29 }
 0x58d   :  { %v2510_v35 = vpop.f32.mrf.mxu1 }
 0x58e   :  { %v2513_v23 = vadd.f32 %v2510_v35, %v2480_v61 }
 0x590   :  { %4106 = vtanh.f32 %v2513_v23 }
 0x591   :  { %v2443_v6 = vpop.f32.mrf.mxu3 }
 0x592   :  { %v2446_v0 = vadd.f32 %v2443_v6, %v2413_v46  ;;  %v3108_v6 = vld [vmem:[#allocation2 + $0xc8] sm:$0xff] }
 0x593   :  { %v2544_v19 = vpop.f32.mrf.mxu2 }
 0x594   :  { %4108 = vtanh.f32 %v2446_v0  ;;  %v2545_v48 = vadd.f32 %v4001_v1, %v2544_v19  ;;  %v5991_v0 = vld [vmem:[#allocation4 + $0x168] sm:$0xff]  ;;  %v6000_v1 = vld [vmem:[#allocation4 + $0x158] sm:$0xff]  ;;  %v6003_v19 = vld [vmem:[#allocation2 + $0x170] sm:$0xff] }
 0x596   :  { %v4107_v11 = vpop.eup %4106  ;;  %v2609_v7 = vpop.f32.mrf.mxu0 }
 0x597   :  { %v2610_v44 = vadd.f32 %v4002_v51, %v2609_v7  ;;  %3926 = vmatmul.msk.f32.vlgmr.msrb.gmra.mxu3 %vm137_vm1, %v4107_v11  ;;  %3929 = vmatmul.msk.f32.vlgmr.msrb.gmra.mxu0 %vm137_vm1, %v4107_v11  ;;  %v2640_v20 = vpop.f32.mrf.mxu1  ;;  %v3107_v51 = vld [vmem:[#allocation2 + $0xc0] sm:$0xff]  ;;  %v5997_v7 = vld [vmem:[#allocation2 + $0x178] sm:$0xff] }
 0x598   :  { %3092 = vmatpush.msrb.mxu3 %v5730_v34  ;;  %v5994_v11 = vld [vmem:[#allocation4 + $0x160] sm:$0xff] }
 0x599   :  { %v2643_v21 = vadd.f32 %v2640_v20, %v2610_v44  ;;  %v6006_v44 = vld [vmem:[#allocation4 + $0x150] sm:$0xff]  ;;  %v6009_v20 = vld [vmem:[#allocation2 + $0x168] sm:$0xff] }
 0x59a   :  { %v4109_v55 = vpop.eup %4108  ;;  %3093 = vmatpush.msrb.mxu3 %v5740_v57 }
 0x59b   :  { %3908 = vst.msk [vmem:[%s6258_s7 + $0x10] sm:$0xff] %vm137_vm1, %v4109_v55  ;;  %4110 = vtanh.f32 %v2643_v21  ;;  %3925 = vmatmul.msk.f32.vlgmr.msrb.gmra.mxu2 %vm137_vm1, %v4109_v55  ;;  %v6012_v21 = vld [vmem:[#allocation4 + $0x148] sm:$0xff]  ;;  %v6015_v55 = vld [vmem:[#allocation2 + $0x160] sm:$0xff] }
 0x59c   :  { %v2575_v54 = vpop.f32.mrf.mxu3  ;;  %3061 = vmatpush.msrb.mxu2 %v5724_v9  ;;  %3094 = vmatpush.msrb.mxu3 %v5751_v52 }
 0x59d   :  { %v2578_v27 = vadd.f32 %v2575_v54, %v2545_v48  ;;  %v2674_v62 = vpop.f32.mrf.mxu2  ;;  %v6018_v48 = vld [vmem:[#allocation4 + $0x140] sm:$0xff]  ;;  %v6021_v54 = vld [vmem:[#allocation2 + $0x158] sm:$0xff] }
 0x59e   :  { %3062 = vmatpush.msrb.mxu2 %v5734_v10  ;;  %3095 = vmatpush.msrb.mxu3 %v5759_v3  ;;  %v2675_v60 = vadd.f32 %v4003_v42, %v2674_v62  ;;  %v6030_v42 = vld [vmem:[#allocation4 + $0x190] sm:$0xff]  ;;  %v6044_v62 = vld [vmem:[#allocation4 + $0x180] sm:$0xff] }
 0x59f   :  { %4112 = vtanh.f32 %v2578_v27  ;;  %v2739_v56 = vpop.f32.mrf.mxu0  ;;  %v6023_v27 = vld [vmem:[#allocation4 + $0x198] sm:$0xff] }
 0x5a0   :  { %3063 = vmatpush.msrb.mxu2 %v6477_v26  ;;  %3096 = vmatpush.msrb.mxu3 %v5774_v8  ;;  %v2740_v43 = vadd.f32 %v4004_v12, %v2739_v56  ;;  %v6028_v12 = vld [vmem:[#allocation2 + $0x150] sm:$0xff]  ;;  %v6035_v56 = vld [vmem:[#allocation2 + $0x148] sm:$0xff] }
 0x5a1   :  { %v4111_v40 = vpop.eup %4110 }
 0x5a2   :  { %3933 = vmatmul.msk.f32.vlgmr.msra.gmra.mxu3 %vm137_vm1, %v4111_v40  ;;  %3935 = vmatmul.msk.f32.vlgmr.msra.gmra.mxu0 %vm137_vm1, %v4111_v40  ;;  %v6037_v40 = vld [vmem:[#allocation4 + $0x188] sm:$0xff] }
 0x5a3   :  { %3064 = vmatpush.msrb.mxu2 %v5754_v38  ;;  %3097 = vmatpush.msrb.mxu3 %v5782_v14 }
 0x5a4   :  { %v2770_v24 = vpop.f32.mrf.mxu1 }
 0x5a5   :  { %v4113_v29 = vpop.eup %4112  ;;  %v2773_v58 = vadd.f32 %v2770_v24, %v2740_v43  ;;  %v2705_v61 = vpop.f32.mrf.mxu3  ;;  %3065 = vmatpush.msrb.mxu2 %v6478_v28  ;;  %3098 = vmatpush.msrb.mxu3 %v5790_v39 }
 0x5a6   :  { %v2708_v35 = vadd.f32 %v2705_v61, %v2675_v60  ;;  %3930 = vmatmul.msk.f32.vlgmr.msra.gmra.mxu1 %vm137_vm1, %v4113_v29  ;;  %3932 = vmatmul.msk.f32.vlgmr.msra.gmra.mxu2 %vm137_vm1, %v4113_v29 }
 0x5a7   :  { %4114 = vtanh.f32 %v2773_v58  ;;  %3066 = vmatpush.msrb.mxu2 %v5778_v30  ;;  %3099 = vmatpush.msrb.mxu3 %v5799_v16 }
 0x5a8   :  { %4116 = vtanh.f32 %v2708_v35  ;;  %3161 = vmatpush.msra.mxu1 %v5847_v59  ;;  %v3114_v59 = vld [vmem:[#allocation2 + $0xf8] sm:$0xff] }
 0x5a9   :  { %3067 = vmatpush.msrb.mxu2 %v5784_v50  ;;  %3130 = vmatpush.msrb.mxu0 %v3114_v59 }
 0x5aa   :  { %3162 = vmatpush.msra.mxu1 %v5853_v22  ;;  %v3113_v22 = vld [vmem:[#allocation2 + $0xf0] sm:$0xff] }
 0x5ab   :  { %3068 = vmatpush.msrb.mxu2 %v5792_v36  ;;  %3131 = vmatpush.msrb.mxu0 %v3113_v22 }
 0x5ac   :  { %3163 = vmatpush.msra.mxu1 %v5859_v41  ;;  %v3112_v41 = vld [vmem:[#allocation2 + $0xe8] sm:$0xff] }
 0x5ad   :  { %3197 = vmatpush.msra.mxu2 %v5849_v25  ;;  %v4115_v23 = vpop.eup %4114  ;;  %3132 = vmatpush.msrb.mxu0 %v3112_v41 }
 0x5ae   :  { %v4117_v46 = vpop.eup %4116  ;;  %2775 = vst.msk [vmem:[%s6257_s6 + $0x10] sm:$0xff] %vm137_vm1, %v4115_v23  ;;  %3939 = vmatmul.msk.f32.vlgmr.msrb.gmra.mxu3 %vm137_vm1, %v4115_v23  ;;  %3164 = vmatpush.msra.mxu1 %v5865_v53  ;;  %v3111_v53 = vld [vmem:[#allocation2 + $0xe0] sm:$0xff] }
 0x5af   :  { %3198 = vmatpush.msra.mxu2 %v5855_v2  ;;  %3936 = vmatmul.msk.f32.vlgmr.msrb.gmra.mxu1 %vm137_vm1, %v4117_v46 }
 0x5b0   :  { %3938 = vmatmul.msk.f32.vlgmr.msrb.gmra.mxu2 %vm137_vm1, %v4117_v46  ;;  %3165 = vmatpush.msra.mxu1 %v5871_v13  ;;  %v3110_v13 = vld [vmem:[#allocation2 + $0xd8] sm:$0xff] }
 0x5b1   :  { %3199 = vmatpush.msra.mxu2 %v5861_v45  ;;  %3133 = vmatpush.msrb.mxu0 %v3111_v53 }
 0x5b2   :  { %3166 = vmatpush.msra.mxu1 %v5877_v49  ;;  %v5985_v49 = vld [vmem:[#allocation4 + $0x178] sm:$0xff] }
 0x5b3   :  { %3200 = vmatpush.msra.mxu2 %v5867_v37  ;;  %3134 = vmatpush.msrb.mxu0 %v3110_v13 }
 0x5b4   :  { %3167 = vmatpush.msra.mxu1 %v5883_v17  ;;  %3228 = vmatpush.msra.mxu3 %v5985_v49  ;;  %v3109_v17 = vld [vmem:[#allocation2 + $0xd0] sm:$0xff] }
 0x5b5   :  { %3201 = vmatpush.msra.mxu2 %v5873_v47  ;;  %3135 = vmatpush.msrb.mxu0 %v3109_v17 }
 0x5b6   :  { %3168 = vmatpush.msra.mxu1 %v5889_v33  ;;  %v5988_v33 = vld [vmem:[#allocation4 + $0x170] sm:$0xff] }
 0x5b7   :  { %3202 = vmatpush.msra.mxu2 %v5879_v63  ;;  %3229 = vmatpush.msra.mxu3 %v5988_v33 }
 0x5b8   :  { %3293 = vmatpush.msrb.mxu1 %v5719_v18  ;;  %3136 = vmatpush.msrb.mxu0 %v3108_v6  ;;  %v4009_v6 = vld [vmem:[%s6256_s5 + $0x7] ss:$0 sm:$0xff] }
 0x5b9   :  { %3203 = vmatpush.msra.mxu2 %v5885_v15  ;;  %3230 = vmatpush.msra.mxu3 %v5991_v0 }
 0x5ba   :  { %3294 = vmatpush.msrb.mxu1 %v5728_v4  ;;  %3137 = vmatpush.msrb.mxu0 %v3107_v51 }
 0x5bb   :  { %3204 = vmatpush.msra.mxu2 %v5891_v31  ;;  %3231 = vmatpush.msra.mxu3 %v5994_v11 }
 0x5bc   :  { %3295 = vmatpush.msrb.mxu1 %v5738_v5  ;;  %3262 = vmatpush.msra.mxu0 %v5997_v7 }
 0x5bd   :  { %3327 = vmatpush.msrb.mxu2 %v5724_v9  ;;  %3232 = vmatpush.msra.mxu3 %v6000_v1 }
 0x5be   :  { %3296 = vmatpush.msrb.mxu1 %v5898_v32  ;;  %3263 = vmatpush.msra.mxu0 %v6003_v19 }
 0x5bf   :  { %3328 = vmatpush.msrb.mxu2 %v5734_v10  ;;  %3233 = vmatpush.msra.mxu3 %v6006_v44 }
 0x5c0   :  { %3264 = vmatpush.msra.mxu0 %v6009_v20  ;;  %3297 = vmatpush.msrb.mxu1 %v6023_v27 }
 0x5c1   :  { %3329 = vmatpush.msrb.mxu2 %v6477_v26  ;;  %3234 = vmatpush.msra.mxu3 %v6012_v21 }
 0x5c2   :  { %3265 = vmatpush.msra.mxu0 %v6015_v55  ;;  %3298 = vmatpush.msrb.mxu1 %v6030_v42 }
 0x5c3   :  { %3330 = vmatpush.msrb.mxu2 %v5754_v38  ;;  %3235 = vmatpush.msra.mxu3 %v6018_v48 }
 0x5c4   :  { %3266 = vmatpush.msra.mxu0 %v6021_v54  ;;  %3299 = vmatpush.msrb.mxu1 %v6037_v40 }
 0x5c5   :  { %3331 = vmatpush.msrb.mxu2 %v6478_v28  ;;  %3358 = vmatpush.msrb.mxu3 %v5730_v34  ;;  %v6042_v34 = vld [vmem:[#allocation2 + $0x140] sm:$0xff] }
 0x5c6   :  { %3267 = vmatpush.msra.mxu0 %v6028_v12  ;;  %3300 = vmatpush.msrb.mxu1 %v6044_v62 }
 0x5c7   :  { %3332 = vmatpush.msrb.mxu2 %v5778_v30  ;;  %3359 = vmatpush.msrb.mxu3 %v5740_v57  ;;  %v4006_v57 = vld [vmem:[%s6256_s5 + $0x3] ss:$0 sm:$0xff] }
 0x5c8   :  { %3268 = vmatpush.msra.mxu0 %v6035_v56 }
 0x5c9   :  { %3333 = vmatpush.msrb.mxu2 %v5784_v50  ;;  %3360 = vmatpush.msrb.mxu3 %v5751_v52  ;;  %v4005_v52 = vld [vmem:[%s6256_s5 + $0x4] ss:$0 sm:$0xff] }
 0x5ca   :  { %3269 = vmatpush.msra.mxu0 %v6042_v34 }
 0x5cb   :  { %3334 = vmatpush.msrb.mxu2 %v5792_v36  ;;  %3361 = vmatpush.msrb.mxu3 %v5759_v3 }
 0x5cd   :  { %3362 = vmatpush.msrb.mxu3 %v5774_v8 }
 0x5cf   :  { %3363 = vmatpush.msrb.mxu3 %v5782_v14  ;;  %v4008_v14 = vld [vmem:[%s6256_s5 + $0x5] ss:$0 sm:$0xff] }
 0x5d1   :  { %3364 = vmatpush.msrb.mxu3 %v5790_v39  ;;  %v4007_v39 = vld [vmem:[%s6256_s5 + $0x6] ss:$0 sm:$0xff] }
 0x5d3   :  { %3365 = vmatpush.msrb.mxu3 %v5799_v16 }
 0x614   :  { %v2875_v60 = vpop.f32.mrf.mxu0 }
 0x615   :  { %v2876_v8 = vadd.f32 %v4005_v52, %v2875_v60  ;;  %v3616_v60 = vld [vmem:[#allocation4 + $0x1b8] sm:$0xff] }
 0x61a   :  { %v2839_v3 = vpop.f32.mrf.mxu3 }
 0x61e   :  { %v2808_v43 = vpop.f32.mrf.mxu2 }
 0x61f   :  { %v2809_v24 = vadd.f32 %v4006_v57, %v2808_v43  ;;  %v3005_v35 = vpop.f32.mrf.mxu0 }
 0x620   :  { %v3006_v59 = vadd.f32 %v4007_v39, %v3005_v35  ;;  %v3646_v39 = vld [vmem:[#allocation2 + $0x190] sm:$0xff]  ;;  %v3645_v35 = vld [vmem:[#allocation2 + $0x188] sm:$0xff] }
 0x621   :  { %v2842_v29 = vadd.f32 %v2839_v3, %v2809_v24  ;;  %v3651_v24 = vld [vmem:[#allocation2 + $0x1b8] sm:$0xff]  ;;  %v3615_v3 = vld [vmem:[#allocation4 + $0x1b0] sm:$0xff] }
 0x623   :  { %4118 = vtanh.f32 %v2842_v29  ;;  %v2906_v58 = vpop.f32.mrf.mxu1  ;;  %v3650_v29 = vld [vmem:[#allocation2 + $0x1b0] sm:$0xff] }
 0x624   :  { %v2909_v61 = vadd.f32 %v2906_v58, %v2876_v8  ;;  %v3614_v8 = vld [vmem:[#allocation4 + $0x1a8] sm:$0xff] }
 0x625   :  { %v2971_v22 = vpop.f32.mrf.mxu3  ;;  %v3649_v58 = vld [vmem:[#allocation2 + $0x1a8] sm:$0xff] }
 0x626   :  { %4120 = vtanh.f32 %v2909_v61  ;;  %v3648_v61 = vld [vmem:[#allocation2 + $0x1a0] sm:$0xff] }
 0x629   :  { %v4119_v23 = vpop.eup %4118  ;;  %v2940_v46 = vpop.f32.mrf.mxu2 }
 0x62a   :  { %3927 = vst.msk [vmem:[%s6258_s7 + $0x18] sm:$0xff] %vm137_vm1, %v4119_v23  ;;  %v2941_v16 = vadd.f32 %v4008_v14, %v2940_v46  ;;  %3941 = vmatmul.msk.f32.vlgmr.msrb.gmra.mxu0 %vm137_vm1, %v4119_v23  ;;  %v3647_v14 = vld [vmem:[#allocation2 + $0x198] sm:$0xff]  ;;  %v3644_v23 = vld [vmem:[#allocation2 + $0x180] sm:$0xff] }
 0x62b   :  { %3396 = vmatpush.msrb.mxu0 %v5849_v25  ;;  %v4016_v46 = vld [vmem:[%s6256_s5 + $0x6] ss:$0 sm:$0xff] }
 0x62c   :  { %v4121_v41 = vpop.eup %4120  ;;  %v2974_v53 = vadd.f32 %v2971_v22, %v2941_v16  ;;  %v3036_v13 = vpop.f32.mrf.mxu1  ;;  %v4015_v16 = vld [vmem:[%s6256_s5 + $0x7] ss:$0 sm:$0xff] }
 0x62d   :  { %v3039_v17 = vadd.f32 %v3036_v13, %v3006_v59  ;;  %3942 = vmatmul.msk.f32.vlgmr.msra.gmra.mxu1 %vm137_vm1, %v4121_v41  ;;  %3945 = vmatmul.msk.f32.vlgmr.msra.gmra.mxu2 %vm137_vm1, %v4121_v41 }
 0x62e   :  { %4122 = vtanh.f32 %v2974_v53  ;;  %3397 = vmatpush.msrb.mxu0 %v5855_v2  ;;  %3427 = vmatpush.msra.mxu1 %v5985_v49 }
 0x62f   :  { %4124 = vtanh.f32 %v3039_v17  ;;  %3463 = vmatpush.msra.mxu2 %v5997_v7 }
 0x630   :  { %3398 = vmatpush.msrb.mxu0 %v5861_v45  ;;  %3428 = vmatpush.msra.mxu1 %v5988_v33 }
 0x631   :  { %3464 = vmatpush.msra.mxu2 %v6003_v19  ;;  %v3101_v51 = vpop.f32.mrf.mxu3 }
 0x632   :  { %3399 = vmatpush.msrb.mxu0 %v5867_v37  ;;  %3429 = vmatpush.msra.mxu1 %v5991_v0  ;;  %v4011_v0 = vld [vmem:[%s6256_s5 + $0x5] ss:$0 sm:$0xff] }
 0x633   :  { %v3070_v25 = vpop.f32.mrf.mxu2  ;;  %3465 = vmatpush.msra.mxu2 %v6009_v20 }
 0x634   :  { %v3071_v2 = vadd.f32 %v4009_v6, %v3070_v25  ;;  %v4123_v49 = vpop.eup %4122  ;;  %3400 = vmatpush.msrb.mxu0 %v5873_v47  ;;  %3430 = vmatpush.msra.mxu1 %v5994_v11  ;;  %v6153_v47 = vld [vmem:[#allocation4 + $0x1c8] sm:$0xff] }
 0x635   :  { %v4125_v57 = vpop.eup %4124  ;;  %3946 = vmatmul.msk.f32.vlgmr.msra.gmra.mxu3 %vm137_vm1, %v4123_v49  ;;  %3948 = vmatmul.msk.f32.vlgmr.msra.gmra.mxu0 %vm137_vm1, %v4123_v49 }
 0x636   :  { %v3104_v45 = vadd.f32 %v3101_v51, %v3071_v2  ;;  %3949 = vmatmul.msk.f32.vlgmr.msrb.gmra.mxu1 %vm137_vm1, %v4125_v57  ;;  %3951 = vmatmul.msk.f32.vlgmr.msrb.gmra.mxu2 %vm137_vm1, %v4125_v57  ;;  %v4018_v57 = vld [vmem:[%s6256_s5 + $0x7] ss:$0 sm:$0xff] }
 0x637   :  { %3401 = vmatpush.msrb.mxu0 %v5879_v63  ;;  %3494 = vmatpush.msra.mxu3 %v5719_v18 }
 0x638   :  { %4126 = vtanh.f32 %v3104_v45  ;;  %3431 = vmatpush.msra.mxu1 %v6000_v1  ;;  %3466 = vmatpush.msra.mxu2 %v6015_v55 }
 0x639   :  { %3402 = vmatpush.msrb.mxu0 %v5885_v15  ;;  %3495 = vmatpush.msra.mxu3 %v5728_v4  ;;  %v6134_v4 = vld [vmem:[#allocation4 + $0x1f0] sm:$0xff]  ;;  %v6156_v15 = vld [vmem:[#allocation4 + $0x1c0] sm:$0xff] }
 0x63a   :  { %3432 = vmatpush.msra.mxu1 %v6006_v44  ;;  %3467 = vmatpush.msra.mxu2 %v6021_v54 }
 0x63b   :  { %3403 = vmatpush.msrb.mxu0 %v5891_v31  ;;  %3496 = vmatpush.msra.mxu3 %v5738_v5  ;;  %v6141_v5 = vld [vmem:[#allocation4 + $0x1e0] sm:$0xff] }
 0x63c   :  { %3433 = vmatpush.msra.mxu1 %v6012_v21  ;;  %3468 = vmatpush.msra.mxu2 %v6028_v12 }
 0x63d   :  { %3528 = vmatpush.msra.mxu0 %v5724_v9  ;;  %3497 = vmatpush.msra.mxu3 %v5898_v32  ;;  %v6132_v9 = vld [vmem:[#allocation4 + $0x1f8] sm:$0xff] }
 0x63e   :  { %v4127_v18 = vpop.eup %4126  ;;  %3434 = vmatpush.msra.mxu1 %v6018_v48  ;;  %3469 = vmatpush.msra.mxu2 %v6035_v56 }
 0x63f   :  { %3106 = vst.msk [vmem:[%s6257_s6 + $0x18] sm:$0xff] %vm137_vm1, %v4127_v18  ;;  %3952 = vmatmul.msk.f32.vlgmr.msrb.gmra.mxu3 %vm137_vm1, %v4127_v18  ;;  %3529 = vmatpush.msra.mxu0 %v5734_v10  ;;  %v6138_v10 = vld [vmem:[#allocation4 + $0x1e8] sm:$0xff]  ;;  %v4017_v18 = vld [vmem:[%s6256_s5 + $0x6] ss:$0 sm:$0xff] }
 0x640   :  { %3498 = vmatpush.msra.mxu3 %v6023_v27  ;;  %3470 = vmatpush.msra.mxu2 %v6042_v34 }
 0x641   :  { %3530 = vmatpush.msra.mxu0 %v6477_v26  ;;  %3559 = vmatpush.msrb.mxu1 %v6132_v9  ;;  %v4012_v26 = vld [vmem:[%s6256_s5 + $0x6] ss:$0 sm:$0xff] }
 0x642   :  { %3499 = vmatpush.msra.mxu3 %v6030_v42  ;;  %3597 = vmatpush.msrb.mxu2 %v5997_v7 }
 0x643   :  { %3531 = vmatpush.msra.mxu0 %v5754_v38  ;;  %3560 = vmatpush.msrb.mxu1 %v6134_v4  ;;  %v4010_v38 = vld [vmem:[%s6256_s5 + $0x4] ss:$0 sm:$0xff] }
 0x644   :  { %3500 = vmatpush.msra.mxu3 %v6037_v40  ;;  %3598 = vmatpush.msrb.mxu2 %v6003_v19 }
 0x645   :  { %3532 = vmatpush.msra.mxu0 %v6478_v28  ;;  %3561 = vmatpush.msrb.mxu1 %v6138_v10 }
 0x646   :  { %3501 = vmatpush.msra.mxu3 %v6044_v62  ;;  %3599 = vmatpush.msrb.mxu2 %v6009_v20 }
 0x647   :  { %3533 = vmatpush.msra.mxu0 %v5778_v30  ;;  %3562 = vmatpush.msrb.mxu1 %v6141_v5  ;;  %v6150_v30 = vld [vmem:[#allocation4 + $0x1d0] sm:$0xff] }
 0x648   :  { %3600 = vmatpush.msrb.mxu2 %v6015_v55  ;;  %v4013_v55 = vld [vmem:[%s6256_s5 + $0x7] ss:$0 sm:$0xff]  ;;  %3628 = vmatpush.msrb.mxu3 %v3616_v60 }
 0x649   :  { %3534 = vmatpush.msra.mxu0 %v5784_v50 }
 0x64a   :  { %3601 = vmatpush.msrb.mxu2 %v6021_v54  ;;  %3629 = vmatpush.msrb.mxu3 %v3615_v3 }
 0x64b   :  { %3535 = vmatpush.msra.mxu0 %v5792_v36  ;;  %v6147_v36 = vld [vmem:[#allocation4 + $0x1d8] sm:$0xff] }
 0x64c   :  { %3602 = vmatpush.msrb.mxu2 %v6028_v12  ;;  %3563 = vmatpush.msrb.mxu1 %v6147_v36 }
 0x64d   :  { %3630 = vmatpush.msrb.mxu3 %v3614_v8 }
 0x64e   :  { %3603 = vmatpush.msrb.mxu2 %v6035_v56  ;;  %3564 = vmatpush.msrb.mxu1 %v6150_v30 }
 0x64f   :  { %3631 = vmatpush.msrb.mxu3 %v5898_v32  ;;  %v4014_v32 = vld [vmem:[%s6256_s5 + $0x5] ss:$0 sm:$0xff] }
 0x650   :  { %3604 = vmatpush.msrb.mxu2 %v6042_v34  ;;  %3565 = vmatpush.msrb.mxu1 %v6153_v47 }
 0x651   :  { %3632 = vmatpush.msrb.mxu3 %v6023_v27 }
 0x652   :  { %3566 = vmatpush.msrb.mxu1 %v6156_v15 }
 0x653   :  { %3633 = vmatpush.msrb.mxu3 %v6030_v42 }
 0x655   :  { %3634 = vmatpush.msrb.mxu3 %v6037_v40 }
 0x657   :  { %3635 = vmatpush.msrb.mxu3 %v6044_v62 }
 0x6a7   :  { %v3139_v50 = vpop.f32.mrf.mxu0 }
 0x6a8   :  { %v3140_v37 = vadd.f32 %v4010_v38, %v3139_v50 }
 0x6aa   :  { %v3170_v63 = vpop.f32.mrf.mxu1 }
 0x6ab   :  { %v3173_v31 = vadd.f32 %v3170_v63, %v3140_v37 }
 0x6ad   :  { %4128 = vtanh.f32 %v3173_v31 }
 0x6b0   :  { %v3206_v11 = vpop.f32.mrf.mxu2 }
 0x6b1   :  { %v3207_v44 = vadd.f32 %v4011_v0, %v3206_v11 }
 0x6b2   :  { %v3271_v28 = vpop.f32.mrf.mxu0 }
 0x6b3   :  { %v4129_v33 = vpop.eup %4128  ;;  %v3272_v7 = vadd.f32 %v4012_v26, %v3271_v28  ;;  %v3302_v1 = vpop.f32.mrf.mxu1 }
 0x6b4   :  { %3943 = vst.msk [vmem:[%s6258_s7 + $0x20] sm:$0xff] %vm137_vm1, %v4129_v33  ;;  %3954 = vmatmul.msk.f32.vlgmr.msrb.gmra.mxu0 %vm137_vm1, %v4129_v33 }
 0x6b5   :  { %v3305_v19 = vadd.f32 %v3302_v1, %v3272_v7  ;;  %3664 = vmatpush.msrb.mxu0 %v3651_v24 }
 0x6b7   :  { %4130 = vtanh.f32 %v3305_v19  ;;  %3665 = vmatpush.msrb.mxu0 %v3650_v29 }
 0x6b8   :  { %v3237_v20 = vpop.f32.mrf.mxu3 }
 0x6b9   :  { %v3240_v21 = vadd.f32 %v3237_v20, %v3207_v44  ;;  %v3336_v54 = vpop.f32.mrf.mxu2  ;;  %3666 = vmatpush.msrb.mxu0 %v3649_v58 }
 0x6ba   :  { %v3337_v12 = vadd.f32 %v4013_v55, %v3336_v54 }
 0x6bb   :  { %4132 = vtanh.f32 %v3240_v21  ;;  %3667 = vmatpush.msrb.mxu0 %v3648_v61 }
 0x6bd   :  { %v4131_v48 = vpop.eup %4130  ;;  %3668 = vmatpush.msrb.mxu0 %v3647_v14 }
 0x6be   :  { %3959 = vmatmul.msk.f32.vlgmr.msra.gmra.mxu3 %vm137_vm1, %v4131_v48  ;;  %3961 = vmatmul.msk.f32.vlgmr.msra.gmra.mxu0 %vm137_vm1, %v4131_v48 }
 0x6bf   :  { %3669 = vmatpush.msrb.mxu0 %v3646_v39  ;;  %3764 = vmatpush.msra.mxu3 %v6132_v9 }
 0x6c1   :  { %v4133_v56 = vpop.eup %4132  ;;  %3670 = vmatpush.msrb.mxu0 %v3645_v35  ;;  %3765 = vmatpush.msra.mxu3 %v6134_v4 }
 0x6c2   :  { %v3367_v34 = vpop.f32.mrf.mxu3  ;;  %3955 = vmatmul.msk.f32.vlgmr.msra.gmra.mxu1 %vm137_vm1, %v4133_v56  ;;  %3958 = vmatmul.msk.f32.vlgmr.msra.gmra.mxu2 %vm137_vm1, %v4133_v56 }
 0x6c3   :  { %v3370_v52 = vadd.f32 %v3367_v34, %v3337_v12  ;;  %3695 = vmatpush.msra.mxu1 %v6132_v9  ;;  %3733 = vmatpush.msra.mxu2 %v3651_v24 }
 0x6c4   :  { %3671 = vmatpush.msrb.mxu0 %v3644_v23  ;;  %3766 = vmatpush.msra.mxu3 %v6138_v10 }
 0x6c5   :  { %4134 = vtanh.f32 %v3370_v52  ;;  %3696 = vmatpush.msra.mxu1 %v6134_v4  ;;  %3734 = vmatpush.msra.mxu2 %v3650_v29 }
 0x6c6   :  { %3767 = vmatpush.msra.mxu3 %v6141_v5 }
 0x6c7   :  { %3697 = vmatpush.msra.mxu1 %v6138_v10  ;;  %3735 = vmatpush.msra.mxu2 %v3649_v58 }
 0x6c8   :  { %3768 = vmatpush.msra.mxu3 %v6147_v36 }
 0x6c9   :  { %3698 = vmatpush.msra.mxu1 %v6141_v5  ;;  %3736 = vmatpush.msra.mxu2 %v3648_v61 }
 0x6ca   :  { %3769 = vmatpush.msra.mxu3 %v6150_v30 }
 0x6cb   :  { %v4135_v43 = vpop.eup %4134  ;;  %3699 = vmatpush.msra.mxu1 %v6147_v36  ;;  %3737 = vmatpush.msra.mxu2 %v3647_v14 }
 0x6cc   :  { %3372 = vst.msk [vmem:[%s6257_s6 + $0x20] sm:$0xff] %vm137_vm1, %v4135_v43  ;;  %3962 = vmatmul.msk.f32.vlgmr.msrb.gmra.mxu1 %vm137_vm1, %v4135_v43  ;;  %3770 = vmatpush.msra.mxu3 %v6153_v47 }
 0x6cd   :  { %3700 = vmatpush.msra.mxu1 %v6150_v30  ;;  %3738 = vmatpush.msra.mxu2 %v3646_v39 }
 0x6ce   :  { %3771 = vmatpush.msra.mxu3 %v6156_v15 }
 0x6cf   :  { %3701 = vmatpush.msra.mxu1 %v6153_v47  ;;  %3739 = vmatpush.msra.mxu2 %v3645_v35  ;;  %v4019_v47 = vld [vmem:[%s6256_s5 + $0x7] ss:$0 sm:$0xff] }
 0x6d1   :  { %3702 = vmatpush.msra.mxu1 %v6156_v15  ;;  %3740 = vmatpush.msra.mxu2 %v3644_v23 }
 0x731   :  { %v3405_v27 = vpop.f32.mrf.mxu0 }
 0x732   :  { %v3406_v42 = vadd.f32 %v4014_v32, %v3405_v27 }
 0x73b   :  { %v3537_v59 = vpop.f32.mrf.mxu0 }
 0x73c   :  { %v3538_v53 = vadd.f32 %v4015_v16, %v3537_v59 }
 0x73f   :  { %v3436_v40 = vpop.f32.mrf.mxu1 }
 0x740   :  { %v3439_v62 = vadd.f32 %v3436_v40, %v3406_v42 }
 0x741   :  { %v3503_v13 = vpop.f32.mrf.mxu3 }
 0x742   :  { %4136 = vtanh.f32 %v3439_v62 }
 0x745   :  { %v3472_v22 = vpop.f32.mrf.mxu2 }
 0x746   :  { %v3473_v41 = vadd.f32 %v4016_v46, %v3472_v22 }
 0x748   :  { %v4137_v17 = vpop.eup %4136  ;;  %v3506_v6 = vadd.f32 %v3503_v13, %v3473_v41 }
 0x749   :  { %v3568_v25 = vpop.f32.mrf.mxu1  ;;  %3956 = vst.msk [vmem:[%s6258_s7 + $0x28] sm:$0xff] %vm137_vm1, %v4137_v17  ;;  %3964 = vmatmul.msk.f32.vlgmr.msrb.gmra.mxu2 %vm137_vm1, %v4137_v17 }
 0x74a   :  { %v3571_v2 = vadd.f32 %v3568_v25, %v3538_v53  ;;  %4138 = vtanh.f32 %v3506_v6 }
 0x74c   :  { %4140 = vtanh.f32 %v3571_v2 }
 0x750   :  { %v4139_v49 = vpop.eup %4138 }
 0x751   :  { %3965 = vmatmul.msk.f32.vlgmr.msrb.gmra.mxu3 %vm137_vm1, %v4139_v49  ;;  %3968 = vmatmul.msk.f32.vlgmr.msrb.gmra.mxu0 %vm137_vm1, %v4139_v49 }
 0x752   :  { %v4141_v51 = vpop.eup %4140 }
 0x753   :  { %3573 = vst.msk [vmem:[%s6257_s6 + $0x28] sm:$0xff] %vm137_vm1, %v4141_v51  ;;  %3969 = vmatmul.msk.f32.vlgmr.msra.gmra.mxu1 %vm137_vm1, %v4141_v51 }
 0x7cc   :  { %v3606_v4 = vpop.f32.mrf.mxu2 }
 0x7cd   :  { %v3607_v38 = vadd.f32 %v4017_v18, %v3606_v4 }
 0x7ce   :  { %v3673_v45 = vpop.f32.mrf.mxu0 }
 0x7cf   :  { %v3674_v9 = vadd.f32 %v4018_v57, %v3673_v45 }
 0x7d0   :  { %v3704_v10 = vpop.f32.mrf.mxu1 }
 0x7d1   :  { %v3707_v5 = vadd.f32 %v3704_v10, %v3674_v9 }
 0x7d3   :  { %4142 = vtanh.f32 %v3707_v5 }
 0x7d4   :  { %v3637_v36 = vpop.f32.mrf.mxu3 }
 0x7d5   :  { %v3640_v30 = vadd.f32 %v3637_v36, %v3607_v38 }
 0x7d7   :  { %4144 = vtanh.f32 %v3640_v30 }
 0x7d9   :  { %v4143_v50 = vpop.eup %4142 }
 0x7da   :  { %3709 = vst.msk [vmem:[%s6257_s6 + $0x30] sm:$0xff] %vm137_vm1, %v4143_v50  ;;  %3972 = vmatmul.msk.f32.vlgmr.msra.gmra.mxu3 %vm137_vm1, %v4143_v50 }
 0x7dd   :  { %v4145_v37 = vpop.eup %4144 }
 0x7de   :  { %3966 = vst.msk [vmem:[%s6258_s7 + $0x30] sm:$0xff] %vm137_vm1, %v4145_v37  ;;  %3971 = vmatmul.msk.f32.vlgmr.msra.gmra.mxu2 %vm137_vm1, %v4145_v37 }
 0x85d   :  { %v3773_v31 = vpop.f32.mrf.mxu3 }
 0x861   :  { %v3742_v63 = vpop.f32.mrf.mxu2 }
 0x862   :  { %v3743_v15 = vadd.f32 %v4019_v47, %v3742_v63 }
 0x864   :  { %v3776_v26 = vadd.f32 %v3773_v31, %v3743_v15 }
 0x866   :  { %4146 = vtanh.f32 %v3776_v26 }
 0x86c   :  { %v4147_v28 = vpop.eup %4146 }
 0x86d   :  { %3778 = vst.msk [vmem:[%s6257_s6 + $0x38] sm:$0xff] %vm137_vm1, %v4147_v28 }
 0x86e   :  { %3973 = vst.msk [vmem:[%s6258_s7 + $0x38] sm:$0xff] %vm137_vm1, %v4147_v28 }
 0x86f   :  { %3789 = vsyncpa [#allocation3], 1 }
 0x870   :  { %3790 = vsyncpa [#allocation5], 1 }

</bundles_post_ra>
